<compile_context>
chip_gen: v7x
topology: tpu7x:2x2x1
jax: 0.10.0
libtpu: 0.0.40
codegen_flags: <defaults>
</compile_context>

<pallas_src>
import functools

import jax
import jax.numpy as jnp
from jax.experimental import pallas as pl
from jax.experimental.pallas import tpu as pltpu


# ----------------------------------------------------------------------------
# Pallas kernel: full xLSTM stack recurrence + classifier head.
# All shapes entering the kernel are already (8,128)-tile aligned.
# ----------------------------------------------------------------------------
def _xlstm_classifier_kernel(emb_ref,   # [T*Bp, Dp]     f32   time-major flat embeddings
                             W_ref,     # [L, Dp, 4*Dp]  bf16  input->gates weights
                             R_ref,     # [L, Dp, 4*Dp]  bf16  recurrent h->gates weights
                             b_ref,     # [L, 1, 4*Dp]   f32   gate biases
                             wc_ref,    # [1, Dp]        f32   classifier weight
                             bc_ref,    # [1, 1]         f32   classifier bias
                             out_ref,   # [Bp, 128]      f32   logits (lane-broadcast)
                             x_scr,     # [T*Bp, Dp]     f32   current layer sequence buffer
                             *, seq_len, batch):
    T, B = seq_len, batch            # B is the padded batch (multiple of 8)
    D = emb_ref.shape[1]             # padded feature dim (multiple of 128)
    L = W_ref.shape[0]

    # Layer-0 input is the embedding; residual always targets the *original* embedding
    # (mirrors `x_original = x.clone(); for block: x = block(x) + x_original`).
    x_scr[...] = emb_ref[...]

    for l in range(L):                        # static unroll over layers (L is small)
        Wl = W_ref[l]                         # [Dp, 4*Dp]  bf16
        Rl = R_ref[l]                         # [Dp, 4*Dp]  bf16
        bl = b_ref[l]                         # [1, 4*Dp]   f32

        # Hoisted input projection for the whole sequence: one matmul + one bias
        # broadcast per layer instead of T of each inside the recurrence.
        pre_x = (jnp.dot(x_scr[...].astype(jnp.bfloat16), Wl,
                         preferred_element_type=jnp.float32)
                 + bl)                        # [T*Bp, 4*Dp]  f32

        # init_states(): zero hidden / cell / normalizer / stabilizer states.
        # States are carried as values (vregs) through the unrolled time loop.
        h = jnp.zeros((B, D), jnp.float32)
        c = jnp.zeros((B, D), jnp.float32)
        n = jnp.zeros((B, D), jnp.float32)
        m = jnp.zeros((B, D), jnp.float32)

        # TODO(synk): push Rl into MXU staging registers once per layer
        # (pltpu.matmul_push_rhs / matmul_acc_lhs / matmul_pop) to drop the
        # per-step RHS reload from the serial recurrent chain at scaled sizes.
        for t in range(T):                    # static unroll over time (T is small)
            # Gate pre-activations: hoisted x-part + recurrent part. [Bp, 4*Dp]
            pre = pre_x[t * B:(t + 1) * B, :] + jnp.dot(
                h.astype(jnp.bfloat16), Rl, preferred_element_type=jnp.float32)

            # Each gate occupies a full aligned 128-lane group -> zero-cost views.
            i_t = pre[:, 0 * D:1 * D]                     # input  gate (pre-exp)
            f_t = pre[:, 1 * D:2 * D]                     # forget gate (pre-exp)
            z_t = jnp.tanh(pre[:, 2 * D:3 * D])           # cell candidate
            o_t = jax.nn.sigmoid(pre[:, 3 * D:4 * D])     # output gate

            # Exponential gating with log-space stabilizer m_t (sLSTM).
            m_new = jnp.maximum(f_t + m, i_t)
            i_g = jnp.exp(i_t - m_new)
            f_g = jnp.exp(f_t + m - m_new)

            c = f_g * c + i_g * z_t
            n = f_g * n + i_g
            h = o_t * (c * pl.reciprocal(n, approx=True))
            m = m_new

            # Full-tile (8,128)-aligned unmasked store of the hidden state.
            x_scr[t * B:(t + 1) * B, :] = h

        # Residual connection to the original embedding, feeds the next layer.
        x_scr[...] = x_scr[...] + emb_ref[...]

    # rep = seq_out[:, -1, :]  (time-major flat -> last Bp rows). Dropout = identity.
    rep = x_scr[(T - 1) * B:T * B, :]                     # [Bp, Dp]
    # Classifier head as a VPU multiply + lane reduction (avoids a 1-column MXU pass).
    logits = jnp.sum(rep * wc_ref[...], axis=-1, keepdims=True) + bc_ref[...]   # [Bp, 1]
    # Lane-dense output: broadcast across 128 lanes so the store is an unmasked vst.
    out_ref[...] = jnp.broadcast_to(logits, out_ref.shape)


# ----------------------------------------------------------------------------
# Wrapper: parameter setup + embedding gather + tile padding + pallas_call.
# ----------------------------------------------------------------------------
def init_params(key, *, num_layers, vocab_size, input_size):
    D = input_size
    ks = jax.random.split(key, 5)
    scale = 0.1
    params = {
        "embedding": jax.random.normal(ks[0], (vocab_size, D), jnp.float32),
        "W": scale * jax.random.normal(ks[1], (num_layers, D, 4 * D), jnp.float32),
        "R": scale * jax.random.normal(ks[2], (num_layers, D, 4 * D), jnp.float32),
        "b": jnp.zeros((num_layers, 1, 4 * D), jnp.float32),
        "Wc": scale * jax.random.normal(ks[3], (1, D), jnp.float32),
        "bc": jnp.zeros((1, 1), jnp.float32),
    }
    return params


def _pad_gates(M, d_in, d_pad, rows_pad):
    """[L, rows, 4*d_in] -> [L, rows_pad, 4*d_pad] with each gate block lane-aligned."""
    L, rows, _ = M.shape
    out = jnp.zeros((L, rows_pad, 4 * d_pad), M.dtype)
    for g in range(4):
        out = out.at[:, :rows, g * d_pad:g * d_pad + d_in].set(
            M[:, :, g * d_in:(g + 1) * d_in])
    return out


@jax.jit
def xlstm_classifier_forward(tokens, params):
    """tokens: int32 [B, T]  ->  logits: f32 [B]"""
    emb_table = params["embedding"]                       # [V, D]
    B, T = tokens.shape
    D = emb_table.shape[1]

    # Pad batch to the sublane granule (8) and features to the lane granule (128)
    # so every tensor in the kernel is a full (8,128) tile.  Padding is zero, hence
    # numerically inert (see kernel header).
    B_pad = ((B + 7) // 8) * 8
    D_pad = ((D + 127) // 128) * 128

    # Time-major embeddings, zero-padded to [T, B_pad, D_pad], then flattened.
    emb_tm = jnp.take(emb_table, tokens.T, axis=0).astype(jnp.float32)   # [T, B, D]
    emb_pad = jnp.zeros((T, B_pad, D_pad), jnp.float32).at[:, :B, :D].set(emb_tm)
    emb_flat = emb_pad.reshape(T * B_pad, D_pad)

    # Per-gate lane-aligned padded weights; bf16 for the MXU, state math stays f32.
    W = _pad_gates(params["W"], D, D_pad, D_pad).astype(jnp.bfloat16)    # [L, Dp, 4Dp]
    R = _pad_gates(params["R"], D, D_pad, D_pad).astype(jnp.bfloat16)    # [L, Dp, 4Dp]
    b = _pad_gates(params["b"], D, D_pad, 1)                             # [L, 1, 4Dp]

    Wc = jnp.zeros((1, D_pad), jnp.float32).at[:, :D].set(params["Wc"])  # [1, Dp]
    bc = params["bc"]                                                    # [1, 1]

    kernel = functools.partial(_xlstm_classifier_kernel, seq_len=T, batch=B_pad)
    vmem = pl.BlockSpec(memory_space=pltpu.MemorySpace.VMEM)

    # TODO(synk): if L*D_pad*4*D_pad or B grow, stream W/R per layer (grid axis over L
    # or pl.ANY + make_async_copy) with vmem_limit_bytes, and add a batch-parallel
    # grid axis (dimension_semantics=("parallel",)) so v7x's two TensorCores split B.
    out = pl.pallas_call(
        kernel,
        out_shape=jax.ShapeDtypeStruct((B_pad, 128), jnp.float32),
        in_specs=[vmem] * 6,
        out_specs=vmem,
        scratch_shapes=[
            pltpu.VMEM((T * B_pad, D_pad), jnp.float32),  # x_scr (sequence buffer)
        ],
    )(emb_flat, W, R, b, Wc, bc)

    return out[:B, 0]                                     # .squeeze(-1)


# TODO(synk): block-diagonal gate projections (depth) and mLSTM-style up-projection
# (factor) of the reference xLSTM blocks are folded into dense gate matrices here.

if __name__ == "__main__":
    # Module hyper-parameters (small, consistent with the forward pass):
    #   layers='ss' (2 sLSTM blocks), batchSize=2, vocabularySize=32,
    #   inputSize=32, depth=4, factor=2, dropout_head=0.1 (identity at inference)
    num_layers = 2
    batch_size = 2
    vocab_size = 32
    input_size = 32
    seq_len = 8

    key = jax.random.PRNGKey(0)
    pkey, xkey = jax.random.split(key)

    params = init_params(pkey, num_layers=num_layers,
                         vocab_size=vocab_size, input_size=input_size)

    tokens = jax.random.randint(xkey, (batch_size, seq_len), 0, vocab_size,
                                dtype=jnp.int32)

    logits = xlstm_classifier_forward(tokens, params)
    jax.block_until_ready(logits)
    assert logits.shape == (batch_size,)
    print("KERNEL_OK")
</pallas_src>

<mosaic_0001>
module attributes {stable_mosaic.version = 11 : i64} {
  func.func @_xlstm_classifier_kernel(%arg0: memref<64x128xf32, #tpu.memory_space<vmem>>, %arg1: memref<2x128x512xbf16, #tpu.memory_space<vmem>>, %arg2: memref<2x128x512xbf16, #tpu.memory_space<vmem>>, %arg3: memref<2x1x512xf32, #tpu.memory_space<vmem>>, %arg4: memref<1x128xf32, #tpu.memory_space<vmem>>, %arg5: memref<1x1xf32, #tpu.memory_space<vmem>>, %arg6: memref<8x128xf32, #tpu.memory_space<vmem>>, %arg7: memref<64x128xf32, #tpu.memory_space<vmem>>) attributes {dimension_semantics = [], scalar_prefetch = 0 : i64, scratch_operands = 1 : i64, tpu.core_type = #tpu.core_type<tc>} {
    %c0 = arith.constant 0 : index
    %c0_0 = arith.constant 0 : index
    %0 = vector.load %arg0[%c0, %c0_0] : memref<64x128xf32, #tpu.memory_space<vmem>>, vector<64x128xf32>
    %c0_1 = arith.constant 0 : index
    %c0_2 = arith.constant 0 : index
    %1 = vector.load %arg7[%c0_1, %c0_2] : memref<64x128xf32, #tpu.memory_space<vmem>>, vector<64x128xf32>
    tpu.vector_store %arg7[%c0_1, %c0_2], %0 {strides = array<i32>} : memref<64x128xf32, #tpu.memory_space<vmem>>, vector<64x128xf32>,
    %c0_3 = arith.constant 0 : index
    %c0_4 = arith.constant 0 : index
    %c0_5 = arith.constant 0 : index
    %2 = vector.load %arg1[%c0_3, %c0_4, %c0_5] : memref<2x128x512xbf16, #tpu.memory_space<vmem>>, vector<1x128x512xbf16>
    %3 = vector.shape_cast %2 : vector<1x128x512xbf16> to vector<128x512xbf16>
    %c0_6 = arith.constant 0 : index
    %c0_7 = arith.constant 0 : index
    %c0_8 = arith.constant 0 : index
    %4 = vector.load %arg2[%c0_6, %c0_7, %c0_8] : memref<2x128x512xbf16, #tpu.memory_space<vmem>>, vector<1x128x512xbf16>
    %5 = vector.shape_cast %4 : vector<1x128x512xbf16> to vector<128x512xbf16>
    %c0_9 = arith.constant 0 : index
    %c0_10 = arith.constant 0 : index
    %c0_11 = arith.constant 0 : index
    %6 = vector.load %arg3[%c0_9, %c0_10, %c0_11] : memref<2x1x512xf32, #tpu.memory_space<vmem>>, vector<1x1x512xf32>
    %7 = vector.shape_cast %6 : vector<1x1x512xf32> to vector<1x512xf32>
    %c0_12 = arith.constant 0 : index
    %c0_13 = arith.constant 0 : index
    %8 = vector.load %arg7[%c0_12, %c0_13] : memref<64x128xf32, #tpu.memory_space<vmem>>, vector<64x128xf32>
    %9 = arith.truncf %8 : vector<64x128xf32> to vector<64x128xbf16>
    %cst = arith.constant dense<0.000000e+00> : vector<64x512xf32>
    %10 = tpu.matmul %9, %3, %cst {dimension_numbers = #tpu.dot_dimension_numbers<[1], [0], [0], [1], [0, 0, 1, 1], [], []>} : vector<64x128xbf16>, vector<128x512xbf16>, vector<64x512xf32> -> vector<64x512xf32>
    %11 = vector.broadcast %7 : vector<1x512xf32> to vector<64x512xf32>
    %12 = arith.addf %10, %11 : vector<64x512xf32>
    %cst_14 = arith.constant 0.000000e+00 : f32
    %13 = vector.broadcast %cst_14 : f32 to vector<8x128xf32>
    %cst_15 = arith.constant 0.000000e+00 : f32
    %14 = vector.broadcast %cst_15 : f32 to vector<8x128xf32>
    %cst_16 = arith.constant 0.000000e+00 : f32
    %15 = vector.broadcast %cst_16 : f32 to vector<8x128xf32>
    %cst_17 = arith.constant 0.000000e+00 : f32
    %16 = vector.broadcast %cst_17 : f32 to vector<8x128xf32>
    %17 = vector.extract_strided_slice %12 {offsets = [0, 0], sizes = [8, 512], strides = [1, 1]} : vector<64x512xf32> to vector<8x512xf32>
    %18 = arith.truncf %13 : vector<8x128xf32> to vector<8x128xbf16>
    %cst_18 = arith.constant dense<0.000000e+00> : vector<8x512xf32>
    %19 = tpu.matmul %18, %5, %cst_18 {dimension_numbers = #tpu.dot_dimension_numbers<[1], [0], [0], [1], [0, 0, 1, 1], [], []>} : vector<8x128xbf16>, vector<128x512xbf16>, vector<8x512xf32> -> vector<8x512xf32>
    %20 = arith.addf %17, %19 : vector<8x512xf32>
    %21 = vector.extract_strided_slice %20 {offsets = [0, 0], sizes = [8, 128], strides = [1, 1]} : vector<8x512xf32> to vector<8x128xf32>
    %22 = vector.extract_strided_slice %20 {offsets = [0, 128], sizes = [8, 128], strides = [1, 1]} : vector<8x512xf32> to vector<8x128xf32>
    %23 = vector.extract_strided_slice %20 {offsets = [0, 256], sizes = [8, 128], strides = [1, 1]} : vector<8x512xf32> to vector<8x128xf32>
    %24 = math.tanh %23 : vector<8x128xf32>
    %25 = vector.extract_strided_slice %20 {offsets = [0, 384], sizes = [8, 128], strides = [1, 1]} : vector<8x512xf32> to vector<8x128xf32>
    %26 = arith.negf %25 : vector<8x128xf32>
    %27 = math.exp %26 : vector<8x128xf32>
    %cst_19 = arith.constant 1.000000e+00 : f32
    %28 = vector.broadcast %cst_19 : f32 to vector<8x128xf32>
    %29 = arith.addf %28, %27 : vector<8x128xf32>
    %30 = arith.divf %28, %29 : vector<8x128xf32>
    %31 = arith.addf %22, %16 : vector<8x128xf32>
    %32 = arith.maximumf %31, %21 : vector<8x128xf32>
    %33 = arith.subf %21, %32 : vector<8x128xf32>
    %34 = math.exp %33 : vector<8x128xf32>
    %35 = arith.addf %22, %16 : vector<8x128xf32>
    %36 = arith.subf %35, %32 : vector<8x128xf32>
    %37 = math.exp %36 : vector<8x128xf32>
    %38 = arith.mulf %37, %14 : vector<8x128xf32>
    %39 = arith.mulf %34, %24 : vector<8x128xf32>
    %40 = arith.addf %38, %39 : vector<8x128xf32>
    %41 = arith.mulf %37, %15 : vector<8x128xf32>
    %42 = arith.addf %41, %34 : vector<8x128xf32>
    %43 = tpu.reciprocal %42 {approx = true} : vector<8x128xf32> -> vector<8x128xf32>
    %44 = arith.mulf %40, %43 : vector<8x128xf32>
    %45 = arith.mulf %30, %44 : vector<8x128xf32>
    %c0_20 = arith.constant 0 : index
    %c0_21 = arith.constant 0 : index
    %46 = vector.load %arg7[%c0_20, %c0_21] : memref<64x128xf32, #tpu.memory_space<vmem>>, vector<8x128xf32>
    tpu.vector_store %arg7[%c0_20, %c0_21], %45 {strides = array<i32>} : memref<64x128xf32, #tpu.memory_space<vmem>>, vector<8x128xf32>,
    %47 = vector.extract_strided_slice %12 {offsets = [8, 0], sizes = [8, 512], strides = [1, 1]} : vector<64x512xf32> to vector<8x512xf32>
    %48 = arith.truncf %45 : vector<8x128xf32> to vector<8x128xbf16>
    %cst_22 = arith.constant dense<0.000000e+00> : vector<8x512xf32>
    %49 = tpu.matmul %48, %5, %cst_22 {dimension_numbers = #tpu.dot_dimension_numbers<[1], [0], [0], [1], [0, 0, 1, 1], [], []>} : vector<8x128xbf16>, vector<128x512xbf16>, vector<8x512xf32> -> vector<8x512xf32>
    %50 = arith.addf %47, %49 : vector<8x512xf32>
    %51 = vector.extract_strided_slice %50 {offsets = [0, 0], sizes = [8, 128], strides = [1, 1]} : vector<8x512xf32> to vector<8x128xf32>
    %52 = vector.extract_strided_slice %50 {offsets = [0, 128], sizes = [8, 128], strides = [1, 1]} : vector<8x512xf32> to vector<8x128xf32>
    %53 = vector.extract_strided_slice %50 {offsets = [0, 256], sizes = [8, 128], strides = [1, 1]} : vector<8x512xf32> to vector<8x128xf32>
    %54 = math.tanh %53 : vector<8x128xf32>
    %55 = vector.extract_strided_slice %50 {offsets = [0, 384], sizes = [8, 128], strides = [1, 1]} : vector<8x512xf32> to vector<8x128xf32>
    %56 = arith.negf %55 : vector<8x128xf32>
    %57 = math.exp %56 : vector<8x128xf32>
    %cst_23 = arith.constant 1.000000e+00 : f32
    %58 = vector.broadcast %cst_23 : f32 to vector<8x128xf32>
    %59 = arith.addf %58, %57 : vector<8x128xf32>
    %60 = arith.divf %58, %59 : vector<8x128xf32>
    %61 = arith.addf %52, %32 : vector<8x128xf32>
    %62 = arith.maximumf %61, %51 : vector<8x128xf32>
    %63 = arith.subf %51, %62 : vector<8x128xf32>
    %64 = math.exp %63 : vector<8x128xf32>
    %65 = arith.addf %52, %32 : vector<8x128xf32>
    %66 = arith.subf %65, %62 : vector<8x128xf32>
    %67 = math.exp %66 : vector<8x128xf32>
    %68 = arith.mulf %67, %40 : vector<8x128xf32>
    %69 = arith.mulf %64, %54 : vector<8x128xf32>
    %70 = arith.addf %68, %69 : vector<8x128xf32>
    %71 = arith.mulf %67, %42 : vector<8x128xf32>
    %72 = arith.addf %71, %64 : vector<8x128xf32>
    %73 = tpu.reciprocal %72 {approx = true} : vector<8x128xf32> -> vector<8x128xf32>
    %74 = arith.mulf %70, %73 : vector<8x128xf32>
    %75 = arith.mulf %60, %74 : vector<8x128xf32>
    %c8 = arith.constant 8 : index
    %c0_24 = arith.constant 0 : index
    %76 = vector.load %arg7[%c8, %c0_24] : memref<64x128xf32, #tpu.memory_space<vmem>>, vector<8x128xf32>
    tpu.vector_store %arg7[%c8, %c0_24], %75 {strides = array<i32>} : memref<64x128xf32, #tpu.memory_space<vmem>>, vector<8x128xf32>,
    %77 = vector.extract_strided_slice %12 {offsets = [16, 0], sizes = [8, 512], strides = [1, 1]} : vector<64x512xf32> to vector<8x512xf32>
    %78 = arith.truncf %75 : vector<8x128xf32> to vector<8x128xbf16>
    %cst_25 = arith.constant dense<0.000000e+00> : vector<8x512xf32>
    %79 = tpu.matmul %78, %5, %cst_25 {dimension_numbers = #tpu.dot_dimension_numbers<[1], [0], [0], [1], [0, 0, 1, 1], [], []>} : vector<8x128xbf16>, vector<128x512xbf16>, vector<8x512xf32> -> vector<8x512xf32>
    %80 = arith.addf %77, %79 : vector<8x512xf32>
    %81 = vector.extract_strided_slice %80 {offsets = [0, 0], sizes = [8, 128], strides = [1, 1]} : vector<8x512xf32> to vector<8x128xf32>
    %82 = vector.extract_strided_slice %80 {offsets = [0, 128], sizes = [8, 128], strides = [1, 1]} : vector<8x512xf32> to vector<8x128xf32>
    %83 = vector.extract_strided_slice %80 {offsets = [0, 256], sizes = [8, 128], strides = [1, 1]} : vector<8x512xf32> to vector<8x128xf32>
    %84 = math.tanh %83 : vector<8x128xf32>
    %85 = vector.extract_strided_slice %80 {offsets = [0, 384], sizes = [8, 128], strides = [1, 1]} : vector<8x512xf32> to vector<8x128xf32>
    %86 = arith.negf %85 : vector<8x128xf32>
    %87 = math.exp %86 : vector<8x128xf32>
    %cst_26 = arith.constant 1.000000e+00 : f32
    %88 = vector.broadcast %cst_26 : f32 to vector<8x128xf32>
    %89 = arith.addf %88, %87 : vector<8x128xf32>
    %90 = arith.divf %88, %89 : vector<8x128xf32>
    %91 = arith.addf %82, %62 : vector<8x128xf32>
    %92 = arith.maximumf %91, %81 : vector<8x128xf32>
    %93 = arith.subf %81, %92 : vector<8x128xf32>
    %94 = math.exp %93 : vector<8x128xf32>
    %95 = arith.addf %82, %62 : vector<8x128xf32>
    %96 = arith.subf %95, %92 : vector<8x128xf32>
    %97 = math.exp %96 : vector<8x128xf32>
    %98 = arith.mulf %97, %70 : vector<8x128xf32>
    %99 = arith.mulf %94, %84 : vector<8x128xf32>
    %100 = arith.addf %98, %99 : vector<8x128xf32>
    %101 = arith.mulf %97, %72 : vector<8x128xf32>
    %102 = arith.addf %101, %94 : vector<8x128xf32>
    %103 = tpu.reciprocal %102 {approx = true} : vector<8x128xf32> -> vector<8x128xf32>
    %104 = arith.mulf %100, %103 : vector<8x128xf32>
    %105 = arith.mulf %90, %104 : vector<8x128xf32>
    %c16 = arith.constant 16 : index
    %c0_27 = arith.constant 0 : index
    %106 = vector.load %arg7[%c16, %c0_27] : memref<64x128xf32, #tpu.memory_space<vmem>>, vector<8x128xf32>
    tpu.vector_store %arg7[%c16, %c0_27], %105 {strides = array<i32>} : memref<64x128xf32, #tpu.memory_space<vmem>>, vector<8x128xf32>,
    %107 = vector.extract_strided_slice %12 {offsets = [24, 0], sizes = [8, 512], strides = [1, 1]} : vector<64x512xf32> to vector<8x512xf32>
    %108 = arith.truncf %105 : vector<8x128xf32> to vector<8x128xbf16>
    %cst_28 = arith.constant dense<0.000000e+00> : vector<8x512xf32>
    %109 = tpu.matmul %108, %5, %cst_28 {dimension_numbers = #tpu.dot_dimension_numbers<[1], [0], [0], [1], [0, 0, 1, 1], [], []>} : vector<8x128xbf16>, vector<128x512xbf16>, vector<8x512xf32> -> vector<8x512xf32>
    %110 = arith.addf %107, %109 : vector<8x512xf32>
    %111 = vector.extract_strided_slice %110 {offsets = [0, 0], sizes = [8, 128], strides = [1, 1]} : vector<8x512xf32> to vector<8x128xf32>
    %112 = vector.extract_strided_slice %110 {offsets = [0, 128], sizes = [8, 128], strides = [1, 1]} : vector<8x512xf32> to vector<8x128xf32>
    %113 = vector.extract_strided_slice %110 {offsets = [0, 256], sizes = [8, 128], strides = [1, 1]} : vector<8x512xf32> to vector<8x128xf32>
    %114 = math.tanh %113 : vector<8x128xf32>
    %115 = vector.extract_strided_slice %110 {offsets = [0, 384], sizes = [8, 128], strides = [1, 1]} : vector<8x512xf32> to vector<8x128xf32>
    %116 = arith.negf %115 : vector<8x128xf32>
    %117 = math.exp %116 : vector<8x128xf32>
    %cst_29 = arith.constant 1.000000e+00 : f32
    %118 = vector.broadcast %cst_29 : f32 to vector<8x128xf32>
    %119 = arith.addf %118, %117 : vector<8x128xf32>
    %120 = arith.divf %118, %119 : vector<8x128xf32>
    %121 = arith.addf %112, %92 : vector<8x128xf32>
    %122 = arith.maximumf %121, %111 : vector<8x128xf32>
    %123 = arith.subf %111, %122 : vector<8x128xf32>
    %124 = math.exp %123 : vector<8x128xf32>
    %125 = arith.addf %112, %92 : vector<8x128xf32>
    %126 = arith.subf %125, %122 : vector<8x128xf32>
    %127 = math.exp %126 : vector<8x128xf32>
    %128 = arith.mulf %127, %100 : vector<8x128xf32>
    %129 = arith.mulf %124, %114 : vector<8x128xf32>
    %130 = arith.addf %128, %129 : vector<8x128xf32>
    %131 = arith.mulf %127, %102 : vector<8x128xf32>
    %132 = arith.addf %131, %124 : vector<8x128xf32>
    %133 = tpu.reciprocal %132 {approx = true} : vector<8x128xf32> -> vector<8x128xf32>
    %134 = arith.mulf %130, %133 : vector<8x128xf32>
    %135 = arith.mulf %120, %134 : vector<8x128xf32>
    %c24 = arith.constant 24 : index
    %c0_30 = arith.constant 0 : index
    %136 = vector.load %arg7[%c24, %c0_30] : memref<64x128xf32, #tpu.memory_space<vmem>>, vector<8x128xf32>
    tpu.vector_store %arg7[%c24, %c0_30], %135 {strides = array<i32>} : memref<64x128xf32, #tpu.memory_space<vmem>>, vector<8x128xf32>,
    %137 = vector.extract_strided_slice %12 {offsets = [32, 0], sizes = [8, 512], strides = [1, 1]} : vector<64x512xf32> to vector<8x512xf32>
    %138 = arith.truncf %135 : vector<8x128xf32> to vector<8x128xbf16>
    %cst_31 = arith.constant dense<0.000000e+00> : vector<8x512xf32>
    %139 = tpu.matmul %138, %5, %cst_31 {dimension_numbers = #tpu.dot_dimension_numbers<[1], [0], [0], [1], [0, 0, 1, 1], [], []>} : vector<8x128xbf16>, vector<128x512xbf16>, vector<8x512xf32> -> vector<8x512xf32>
    %140 = arith.addf %137, %139 : vector<8x512xf32>
    %141 = vector.extract_strided_slice %140 {offsets = [0, 0], sizes = [8, 128], strides = [1, 1]} : vector<8x512xf32> to vector<8x128xf32>
    %142 = vector.extract_strided_slice %140 {offsets = [0, 128], sizes = [8, 128], strides = [1, 1]} : vector<8x512xf32> to vector<8x128xf32>
    %143 = vector.extract_strided_slice %140 {offsets = [0, 256], sizes = [8, 128], strides = [1, 1]} : vector<8x512xf32> to vector<8x128xf32>
    %144 = math.tanh %143 : vector<8x128xf32>
    %145 = vector.extract_strided_slice %140 {offsets = [0, 384], sizes = [8, 128], strides = [1, 1]} : vector<8x512xf32> to vector<8x128xf32>
    %146 = arith.negf %145 : vector<8x128xf32>
    %147 = math.exp %146 : vector<8x128xf32>
    %cst_32 = arith.constant 1.000000e+00 : f32
    %148 = vector.broadcast %cst_32 : f32 to vector<8x128xf32>
    %149 = arith.addf %148, %147 : vector<8x128xf32>
    %150 = arith.divf %148, %149 : vector<8x128xf32>
    %151 = arith.addf %142, %122 : vector<8x128xf32>
    %152 = arith.maximumf %151, %141 : vector<8x128xf32>
    %153 = arith.subf %141, %152 : vector<8x128xf32>
    %154 = math.exp %153 : vector<8x128xf32>
    %155 = arith.addf %142, %122 : vector<8x128xf32>
    %156 = arith.subf %155, %152 : vector<8x128xf32>
    %157 = math.exp %156 : vector<8x128xf32>
    %158 = arith.mulf %157, %130 : vector<8x128xf32>
    %159 = arith.mulf %154, %144 : vector<8x128xf32>
    %160 = arith.addf %158, %159 : vector<8x128xf32>
    %161 = arith.mulf %157, %132 : vector<8x128xf32>
    %162 = arith.addf %161, %154 : vector<8x128xf32>
    %163 = tpu.reciprocal %162 {approx = true} : vector<8x128xf32> -> vector<8x128xf32>
    %164 = arith.mulf %160, %163 : vector<8x128xf32>
    %165 = arith.mulf %150, %164 : vector<8x128xf32>
    %c32 = arith.constant 32 : index
    %c0_33 = arith.constant 0 : index
    %166 = vector.load %arg7[%c32, %c0_33] : memref<64x128xf32, #tpu.memory_space<vmem>>, vector<8x128xf32>
    tpu.vector_store %arg7[%c32, %c0_33], %165 {strides = array<i32>} : memref<64x128xf32, #tpu.memory_space<vmem>>, vector<8x128xf32>,
    %167 = vector.extract_strided_slice %12 {offsets = [40, 0], sizes = [8, 512], strides = [1, 1]} : vector<64x512xf32> to vector<8x512xf32>
    %168 = arith.truncf %165 : vector<8x128xf32> to vector<8x128xbf16>
    %cst_34 = arith.constant dense<0.000000e+00> : vector<8x512xf32>
    %169 = tpu.matmul %168, %5, %cst_34 {dimension_numbers = #tpu.dot_dimension_numbers<[1], [0], [0], [1], [0, 0, 1, 1], [], []>} : vector<8x128xbf16>, vector<128x512xbf16>, vector<8x512xf32> -> vector<8x512xf32>
    %170 = arith.addf %167, %169 : vector<8x512xf32>
    %171 = vector.extract_strided_slice %170 {offsets = [0, 0], sizes = [8, 128], strides = [1, 1]} : vector<8x512xf32> to vector<8x128xf32>
    %172 = vector.extract_strided_slice %170 {offsets = [0, 128], sizes = [8, 128], strides = [1, 1]} : vector<8x512xf32> to vector<8x128xf32>
    %173 = vector.extract_strided_slice %170 {offsets = [0, 256], sizes = [8, 128], strides = [1, 1]} : vector<8x512xf32> to vector<8x128xf32>
    %174 = math.tanh %173 : vector<8x128xf32>
    %175 = vector.extract_strided_slice %170 {offsets = [0, 384], sizes = [8, 128], strides = [1, 1]} : vector<8x512xf32> to vector<8x128xf32>
    %176 = arith.negf %175 : vector<8x128xf32>
    %177 = math.exp %176 : vector<8x128xf32>
    %cst_35 = arith.constant 1.000000e+00 : f32
    %178 = vector.broadcast %cst_35 : f32 to vector<8x128xf32>
    %179 = arith.addf %178, %177 : vector<8x128xf32>
    %180 = arith.divf %178, %179 : vector<8x128xf32>
    %181 = arith.addf %172, %152 : vector<8x128xf32>
    %182 = arith.maximumf %181, %171 : vector<8x128xf32>
    %183 = arith.subf %171, %182 : vector<8x128xf32>
    %184 = math.exp %183 : vector<8x128xf32>
    %185 = arith.addf %172, %152 : vector<8x128xf32>
    %186 = arith.subf %185, %182 : vector<8x128xf32>
    %187 = math.exp %186 : vector<8x128xf32>
    %188 = arith.mulf %187, %160 : vector<8x128xf32>
    %189 = arith.mulf %184, %174 : vector<8x128xf32>
    %190 = arith.addf %188, %189 : vector<8x128xf32>
    %191 = arith.mulf %187, %162 : vector<8x128xf32>
    %192 = arith.addf %191, %184 : vector<8x128xf32>
    %193 = tpu.reciprocal %192 {approx = true} : vector<8x128xf32> -> vector<8x128xf32>
    %194 = arith.mulf %190, %193 : vector<8x128xf32>
    %195 = arith.mulf %180, %194 : vector<8x128xf32>
    %c40 = arith.constant 40 : index
    %c0_36 = arith.constant 0 : index
    %196 = vector.load %arg7[%c40, %c0_36] : memref<64x128xf32, #tpu.memory_space<vmem>>, vector<8x128xf32>
    tpu.vector_store %arg7[%c40, %c0_36], %195 {strides = array<i32>} : memref<64x128xf32, #tpu.memory_space<vmem>>, vector<8x128xf32>,
    %197 = vector.extract_strided_slice %12 {offsets = [48, 0], sizes = [8, 512], strides = [1, 1]} : vector<64x512xf32> to vector<8x512xf32>
    %198 = arith.truncf %195 : vector<8x128xf32> to vector<8x128xbf16>
    %cst_37 = arith.constant dense<0.000000e+00> : vector<8x512xf32>
    %199 = tpu.matmul %198, %5, %cst_37 {dimension_numbers = #tpu.dot_dimension_numbers<[1], [0], [0], [1], [0, 0, 1, 1], [], []>} : vector<8x128xbf16>, vector<128x512xbf16>, vector<8x512xf32> -> vector<8x512xf32>
    %200 = arith.addf %197, %199 : vector<8x512xf32>
    %201 = vector.extract_strided_slice %200 {offsets = [0, 0], sizes = [8, 128], strides = [1, 1]} : vector<8x512xf32> to vector<8x128xf32>
    %202 = vector.extract_strided_slice %200 {offsets = [0, 128], sizes = [8, 128], strides = [1, 1]} : vector<8x512xf32> to vector<8x128xf32>
    %203 = vector.extract_strided_slice %200 {offsets = [0, 256], sizes = [8, 128], strides = [1, 1]} : vector<8x512xf32> to vector<8x128xf32>
    %204 = math.tanh %203 : vector<8x128xf32>
    %205 = vector.extract_strided_slice %200 {offsets = [0, 384], sizes = [8, 128], strides = [1, 1]} : vector<8x512xf32> to vector<8x128xf32>
    %206 = arith.negf %205 : vector<8x128xf32>
    %207 = math.exp %206 : vector<8x128xf32>
    %cst_38 = arith.constant 1.000000e+00 : f32
    %208 = vector.broadcast %cst_38 : f32 to vector<8x128xf32>
    %209 = arith.addf %208, %207 : vector<8x128xf32>
    %210 = arith.divf %208, %209 : vector<8x128xf32>
    %211 = arith.addf %202, %182 : vector<8x128xf32>
    %212 = arith.maximumf %211, %201 : vector<8x128xf32>
    %213 = arith.subf %201, %212 : vector<8x128xf32>
    %214 = math.exp %213 : vector<8x128xf32>
    %215 = arith.addf %202, %182 : vector<8x128xf32>
    %216 = arith.subf %215, %212 : vector<8x128xf32>
    %217 = math.exp %216 : vector<8x128xf32>
    %218 = arith.mulf %217, %190 : vector<8x128xf32>
    %219 = arith.mulf %214, %204 : vector<8x128xf32>
    %220 = arith.addf %218, %219 : vector<8x128xf32>
    %221 = arith.mulf %217, %192 : vector<8x128xf32>
    %222 = arith.addf %221, %214 : vector<8x128xf32>
    %223 = tpu.reciprocal %222 {approx = true} : vector<8x128xf32> -> vector<8x128xf32>
    %224 = arith.mulf %220, %223 : vector<8x128xf32>
    %225 = arith.mulf %210, %224 : vector<8x128xf32>
    %c48 = arith.constant 48 : index
    %c0_39 = arith.constant 0 : index
    %226 = vector.load %arg7[%c48, %c0_39] : memref<64x128xf32, #tpu.memory_space<vmem>>, vector<8x128xf32>
    tpu.vector_store %arg7[%c48, %c0_39], %225 {strides = array<i32>} : memref<64x128xf32, #tpu.memory_space<vmem>>, vector<8x128xf32>,
    %227 = vector.extract_strided_slice %12 {offsets = [56, 0], sizes = [8, 512], strides = [1, 1]} : vector<64x512xf32> to vector<8x512xf32>
    %228 = arith.truncf %225 : vector<8x128xf32> to vector<8x128xbf16>
    %cst_40 = arith.constant dense<0.000000e+00> : vector<8x512xf32>
    %229 = tpu.matmul %228, %5, %cst_40 {dimension_numbers = #tpu.dot_dimension_numbers<[1], [0], [0], [1], [0, 0, 1, 1], [], []>} : vector<8x128xbf16>, vector<128x512xbf16>, vector<8x512xf32> -> vector<8x512xf32>
    %230 = arith.addf %227, %229 : vector<8x512xf32>
    %231 = vector.extract_strided_slice %230 {offsets = [0, 0], sizes = [8, 128], strides = [1, 1]} : vector<8x512xf32> to vector<8x128xf32>
    %232 = vector.extract_strided_slice %230 {offsets = [0, 128], sizes = [8, 128], strides = [1, 1]} : vector<8x512xf32> to vector<8x128xf32>
    %233 = vector.extract_strided_slice %230 {offsets = [0, 256], sizes = [8, 128], strides = [1, 1]} : vector<8x512xf32> to vector<8x128xf32>
    %234 = math.tanh %233 : vector<8x128xf32>
    %235 = vector.extract_strided_slice %230 {offsets = [0, 384], sizes = [8, 128], strides = [1, 1]} : vector<8x512xf32> to vector<8x128xf32>
    %236 = arith.negf %235 : vector<8x128xf32>
    %237 = math.exp %236 : vector<8x128xf32>
    %cst_41 = arith.constant 1.000000e+00 : f32
    %238 = vector.broadcast %cst_41 : f32 to vector<8x128xf32>
    %239 = arith.addf %238, %237 : vector<8x128xf32>
    %240 = arith.divf %238, %239 : vector<8x128xf32>
    %241 = arith.addf %232, %212 : vector<8x128xf32>
    %242 = arith.maximumf %241, %231 : vector<8x128xf32>
    %243 = arith.subf %231, %242 : vector<8x128xf32>
    %244 = math.exp %243 : vector<8x128xf32>
    %245 = arith.addf %232, %212 : vector<8x128xf32>
    %246 = arith.subf %245, %242 : vector<8x128xf32>
    %247 = math.exp %246 : vector<8x128xf32>
    %248 = arith.mulf %247, %220 : vector<8x128xf32>
    %249 = arith.mulf %244, %234 : vector<8x128xf32>
    %250 = arith.addf %248, %249 : vector<8x128xf32>
    %251 = arith.mulf %247, %222 : vector<8x128xf32>
    %252 = arith.addf %251, %244 : vector<8x128xf32>
    %253 = tpu.reciprocal %252 {approx = true} : vector<8x128xf32> -> vector<8x128xf32>
    %254 = arith.mulf %250, %253 : vector<8x128xf32>
    %255 = arith.mulf %240, %254 : vector<8x128xf32>
    %c56 = arith.constant 56 : index
    %c0_42 = arith.constant 0 : index
    %256 = vector.load %arg7[%c56, %c0_42] : memref<64x128xf32, #tpu.memory_space<vmem>>, vector<8x128xf32>
    tpu.vector_store %arg7[%c56, %c0_42], %255 {strides = array<i32>} : memref<64x128xf32, #tpu.memory_space<vmem>>, vector<8x128xf32>,
    %c0_43 = arith.constant 0 : index
    %c0_44 = arith.constant 0 : index
    %257 = vector.load %arg7[%c0_43, %c0_44] : memref<64x128xf32, #tpu.memory_space<vmem>>, vector<64x128xf32>
    %c0_45 = arith.constant 0 : index
    %c0_46 = arith.constant 0 : index
    %258 = vector.load %arg0[%c0_45, %c0_46] : memref<64x128xf32, #tpu.memory_space<vmem>>, vector<64x128xf32>
    %259 = arith.addf %257, %258 : vector<64x128xf32>
    %c0_47 = arith.constant 0 : index
    %c0_48 = arith.constant 0 : index
    %260 = vector.load %arg7[%c0_47, %c0_48] : memref<64x128xf32, #tpu.memory_space<vmem>>, vector<64x128xf32>
    tpu.vector_store %arg7[%c0_47, %c0_48], %259 {strides = array<i32>} : memref<64x128xf32, #tpu.memory_space<vmem>>, vector<64x128xf32>,
    %c1 = arith.constant 1 : index
    %c0_49 = arith.constant 0 : index
    %c0_50 = arith.constant 0 : index
    %261 = vector.load %arg1[%c1, %c0_49, %c0_50] : memref<2x128x512xbf16, #tpu.memory_space<vmem>>, vector<1x128x512xbf16>
    %262 = vector.shape_cast %261 : vector<1x128x512xbf16> to vector<128x512xbf16>
    %c1_51 = arith.constant 1 : index
    %c0_52 = arith.constant 0 : index
    %c0_53 = arith.constant 0 : index
    %263 = vector.load %arg2[%c1_51, %c0_52, %c0_53] : memref<2x128x512xbf16, #tpu.memory_space<vmem>>, vector<1x128x512xbf16>
    %264 = vector.shape_cast %263 : vector<1x128x512xbf16> to vector<128x512xbf16>
    %c1_54 = arith.constant 1 : index
    %c0_55 = arith.constant 0 : index
    %c0_56 = arith.constant 0 : index
    %265 = vector.load %arg3[%c1_54, %c0_55, %c0_56] : memref<2x1x512xf32, #tpu.memory_space<vmem>>, vector<1x1x512xf32>
    %266 = vector.shape_cast %265 : vector<1x1x512xf32> to vector<1x512xf32>
    %c0_57 = arith.constant 0 : index
    %c0_58 = arith.constant 0 : index
    %267 = vector.load %arg7[%c0_57, %c0_58] : memref<64x128xf32, #tpu.memory_space<vmem>>, vector<64x128xf32>
    %268 = arith.truncf %267 : vector<64x128xf32> to vector<64x128xbf16>
    %cst_59 = arith.constant dense<0.000000e+00> : vector<64x512xf32>
    %269 = tpu.matmul %268, %262, %cst_59 {dimension_numbers = #tpu.dot_dimension_numbers<[1], [0], [0], [1], [0, 0, 1, 1], [], []>} : vector<64x128xbf16>, vector<128x512xbf16>, vector<64x512xf32> -> vector<64x512xf32>
    %270 = vector.broadcast %266 : vector<1x512xf32> to vector<64x512xf32>
    %271 = arith.addf %269, %270 : vector<64x512xf32>
    %cst_60 = arith.constant 0.000000e+00 : f32
    %272 = vector.broadcast %cst_60 : f32 to vector<8x128xf32>
    %cst_61 = arith.constant 0.000000e+00 : f32
    %273 = vector.broadcast %cst_61 : f32 to vector<8x128xf32>
    %cst_62 = arith.constant 0.000000e+00 : f32
    %274 = vector.broadcast %cst_62 : f32 to vector<8x128xf32>
    %cst_63 = arith.constant 0.000000e+00 : f32
    %275 = vector.broadcast %cst_63 : f32 to vector<8x128xf32>
    %276 = vector.extract_strided_slice %271 {offsets = [0, 0], sizes = [8, 512], strides = [1, 1]} : vector<64x512xf32> to vector<8x512xf32>
    %277 = arith.truncf %272 : vector<8x128xf32> to vector<8x128xbf16>
    %cst_64 = arith.constant dense<0.000000e+00> : vector<8x512xf32>
    %278 = tpu.matmul %277, %264, %cst_64 {dimension_numbers = #tpu.dot_dimension_numbers<[1], [0], [0], [1], [0, 0, 1, 1], [], []>} : vector<8x128xbf16>, vector<128x512xbf16>, vector<8x512xf32> -> vector<8x512xf32>
    %279 = arith.addf %276, %278 : vector<8x512xf32>
    %280 = vector.extract_strided_slice %279 {offsets = [0, 0], sizes = [8, 128], strides = [1, 1]} : vector<8x512xf32> to vector<8x128xf32>
    %281 = vector.extract_strided_slice %279 {offsets = [0, 128], sizes = [8, 128], strides = [1, 1]} : vector<8x512xf32> to vector<8x128xf32>
    %282 = vector.extract_strided_slice %279 {offsets = [0, 256], sizes = [8, 128], strides = [1, 1]} : vector<8x512xf32> to vector<8x128xf32>
    %283 = math.tanh %282 : vector<8x128xf32>
    %284 = vector.extract_strided_slice %279 {offsets = [0, 384], sizes = [8, 128], strides = [1, 1]} : vector<8x512xf32> to vector<8x128xf32>
    %285 = arith.negf %284 : vector<8x128xf32>
    %286 = math.exp %285 : vector<8x128xf32>
    %cst_65 = arith.constant 1.000000e+00 : f32
    %287 = vector.broadcast %cst_65 : f32 to vector<8x128xf32>
    %288 = arith.addf %287, %286 : vector<8x128xf32>
    %289 = arith.divf %287, %288 : vector<8x128xf32>
    %290 = arith.addf %281, %275 : vector<8x128xf32>
    %291 = arith.maximumf %290, %280 : vector<8x128xf32>
    %292 = arith.subf %280, %291 : vector<8x128xf32>
    %293 = math.exp %292 : vector<8x128xf32>
    %294 = arith.addf %281, %275 : vector<8x128xf32>
    %295 = arith.subf %294, %291 : vector<8x128xf32>
    %296 = math.exp %295 : vector<8x128xf32>
    %297 = arith.mulf %296, %273 : vector<8x128xf32>
    %298 = arith.mulf %293, %283 : vector<8x128xf32>
    %299 = arith.addf %297, %298 : vector<8x128xf32>
    %300 = arith.mulf %296, %274 : vector<8x128xf32>
    %301 = arith.addf %300, %293 : vector<8x128xf32>
    %302 = tpu.reciprocal %301 {approx = true} : vector<8x128xf32> -> vector<8x128xf32>
    %303 = arith.mulf %299, %302 : vector<8x128xf32>
    %304 = arith.mulf %289, %303 : vector<8x128xf32>
    %c0_66 = arith.constant 0 : index
    %c0_67 = arith.constant 0 : index
    %305 = vector.load %arg7[%c0_66, %c0_67] : memref<64x128xf32, #tpu.memory_space<vmem>>, vector<8x128xf32>
    tpu.vector_store %arg7[%c0_66, %c0_67], %304 {strides = array<i32>} : memref<64x128xf32, #tpu.memory_space<vmem>>, vector<8x128xf32>,
    %306 = vector.extract_strided_slice %271 {offsets = [8, 0], sizes = [8, 512], strides = [1, 1]} : vector<64x512xf32> to vector<8x512xf32>
    %307 = arith.truncf %304 : vector<8x128xf32> to vector<8x128xbf16>
    %cst_68 = arith.constant dense<0.000000e+00> : vector<8x512xf32>
    %308 = tpu.matmul %307, %264, %cst_68 {dimension_numbers = #tpu.dot_dimension_numbers<[1], [0], [0], [1], [0, 0, 1, 1], [], []>} : vector<8x128xbf16>, vector<128x512xbf16>, vector<8x512xf32> -> vector<8x512xf32>
    %309 = arith.addf %306, %308 : vector<8x512xf32>
    %310 = vector.extract_strided_slice %309 {offsets = [0, 0], sizes = [8, 128], strides = [1, 1]} : vector<8x512xf32> to vector<8x128xf32>
    %311 = vector.extract_strided_slice %309 {offsets = [0, 128], sizes = [8, 128], strides = [1, 1]} : vector<8x512xf32> to vector<8x128xf32>
    %312 = vector.extract_strided_slice %309 {offsets = [0, 256], sizes = [8, 128], strides = [1, 1]} : vector<8x512xf32> to vector<8x128xf32>
    %313 = math.tanh %312 : vector<8x128xf32>
    %314 = vector.extract_strided_slice %309 {offsets = [0, 384], sizes = [8, 128], strides = [1, 1]} : vector<8x512xf32> to vector<8x128xf32>
    %315 = arith.negf %314 : vector<8x128xf32>
    %316 = math.exp %315 : vector<8x128xf32>
    %cst_69 = arith.constant 1.000000e+00 : f32
    %317 = vector.broadcast %cst_69 : f32 to vector<8x128xf32>
    %318 = arith.addf %317, %316 : vector<8x128xf32>
    %319 = arith.divf %317, %318 : vector<8x128xf32>
    %320 = arith.addf %311, %291 : vector<8x128xf32>
    %321 = arith.maximumf %320, %310 : vector<8x128xf32>
    %322 = arith.subf %310, %321 : vector<8x128xf32>
    %323 = math.exp %322 : vector<8x128xf32>
    %324 = arith.addf %311, %291 : vector<8x128xf32>
    %325 = arith.subf %324, %321 : vector<8x128xf32>
    %326 = math.exp %325 : vector<8x128xf32>
    %327 = arith.mulf %326, %299 : vector<8x128xf32>
    %328 = arith.mulf %323, %313 : vector<8x128xf32>
    %329 = arith.addf %327, %328 : vector<8x128xf32>
    %330 = arith.mulf %326, %301 : vector<8x128xf32>
    %331 = arith.addf %330, %323 : vector<8x128xf32>
    %332 = tpu.reciprocal %331 {approx = true} : vector<8x128xf32> -> vector<8x128xf32>
    %333 = arith.mulf %329, %332 : vector<8x128xf32>
    %334 = arith.mulf %319, %333 : vector<8x128xf32>
    %c8_70 = arith.constant 8 : index
    %c0_71 = arith.constant 0 : index
    %335 = vector.load %arg7[%c8_70, %c0_71] : memref<64x128xf32, #tpu.memory_space<vmem>>, vector<8x128xf32>
    tpu.vector_store %arg7[%c8_70, %c0_71], %334 {strides = array<i32>} : memref<64x128xf32, #tpu.memory_space<vmem>>, vector<8x128xf32>,
    %336 = vector.extract_strided_slice %271 {offsets = [16, 0], sizes = [8, 512], strides = [1, 1]} : vector<64x512xf32> to vector<8x512xf32>
    %337 = arith.truncf %334 : vector<8x128xf32> to vector<8x128xbf16>
    %cst_72 = arith.constant dense<0.000000e+00> : vector<8x512xf32>
    %338 = tpu.matmul %337, %264, %cst_72 {dimension_numbers = #tpu.dot_dimension_numbers<[1], [0], [0], [1], [0, 0, 1, 1], [], []>} : vector<8x128xbf16>, vector<128x512xbf16>, vector<8x512xf32> -> vector<8x512xf32>
    %339 = arith.addf %336, %338 : vector<8x512xf32>
    %340 = vector.extract_strided_slice %339 {offsets = [0, 0], sizes = [8, 128], strides = [1, 1]} : vector<8x512xf32> to vector<8x128xf32>
    %341 = vector.extract_strided_slice %339 {offsets = [0, 128], sizes = [8, 128], strides = [1, 1]} : vector<8x512xf32> to vector<8x128xf32>
    %342 = vector.extract_strided_slice %339 {offsets = [0, 256], sizes = [8, 128], strides = [1, 1]} : vector<8x512xf32> to vector<8x128xf32>
    %343 = math.tanh %342 : vector<8x128xf32>
    %344 = vector.extract_strided_slice %339 {offsets = [0, 384], sizes = [8, 128], strides = [1, 1]} : vector<8x512xf32> to vector<8x128xf32>
    %345 = arith.negf %344 : vector<8x128xf32>
    %346 = math.exp %345 : vector<8x128xf32>
    %cst_73 = arith.constant 1.000000e+00 : f32
    %347 = vector.broadcast %cst_73 : f32 to vector<8x128xf32>
    %348 = arith.addf %347, %346 : vector<8x128xf32>
    %349 = arith.divf %347, %348 : vector<8x128xf32>
    %350 = arith.addf %341, %321 : vector<8x128xf32>
    %351 = arith.maximumf %350, %340 : vector<8x128xf32>
    %352 = arith.subf %340, %351 : vector<8x128xf32>
    %353 = math.exp %352 : vector<8x128xf32>
    %354 = arith.addf %341, %321 : vector<8x128xf32>
    %355 = arith.subf %354, %351 : vector<8x128xf32>
    %356 = math.exp %355 : vector<8x128xf32>
    %357 = arith.mulf %356, %329 : vector<8x128xf32>
    %358 = arith.mulf %353, %343 : vector<8x128xf32>
    %359 = arith.addf %357, %358 : vector<8x128xf32>
    %360 = arith.mulf %356, %331 : vector<8x128xf32>
    %361 = arith.addf %360, %353 : vector<8x128xf32>
    %362 = tpu.reciprocal %361 {approx = true} : vector<8x128xf32> -> vector<8x128xf32>
    %363 = arith.mulf %359, %362 : vector<8x128xf32>
    %364 = arith.mulf %349, %363 : vector<8x128xf32>
    %c16_74 = arith.constant 16 : index
    %c0_75 = arith.constant 0 : index
    %365 = vector.load %arg7[%c16_74, %c0_75] : memref<64x128xf32, #tpu.memory_space<vmem>>, vector<8x128xf32>
    tpu.vector_store %arg7[%c16_74, %c0_75], %364 {strides = array<i32>} : memref<64x128xf32, #tpu.memory_space<vmem>>, vector<8x128xf32>,
    %366 = vector.extract_strided_slice %271 {offsets = [24, 0], sizes = [8, 512], strides = [1, 1]} : vector<64x512xf32> to vector<8x512xf32>
    %367 = arith.truncf %364 : vector<8x128xf32> to vector<8x128xbf16>
    %cst_76 = arith.constant dense<0.000000e+00> : vector<8x512xf32>
    %368 = tpu.matmul %367, %264, %cst_76 {dimension_numbers = #tpu.dot_dimension_numbers<[1], [0], [0], [1], [0, 0, 1, 1], [], []>} : vector<8x128xbf16>, vector<128x512xbf16>, vector<8x512xf32> -> vector<8x512xf32>
    %369 = arith.addf %366, %368 : vector<8x512xf32>
    %370 = vector.extract_strided_slice %369 {offsets = [0, 0], sizes = [8, 128], strides = [1, 1]} : vector<8x512xf32> to vector<8x128xf32>
    %371 = vector.extract_strided_slice %369 {offsets = [0, 128], sizes = [8, 128], strides = [1, 1]} : vector<8x512xf32> to vector<8x128xf32>
    %372 = vector.extract_strided_slice %369 {offsets = [0, 256], sizes = [8, 128], strides = [1, 1]} : vector<8x512xf32> to vector<8x128xf32>
    %373 = math.tanh %372 : vector<8x128xf32>
    %374 = vector.extract_strided_slice %369 {offsets = [0, 384], sizes = [8, 128], strides = [1, 1]} : vector<8x512xf32> to vector<8x128xf32>
    %375 = arith.negf %374 : vector<8x128xf32>
    %376 = math.exp %375 : vector<8x128xf32>
    %cst_77 = arith.constant 1.000000e+00 : f32
    %377 = vector.broadcast %cst_77 : f32 to vector<8x128xf32>
    %378 = arith.addf %377, %376 : vector<8x128xf32>
    %379 = arith.divf %377, %378 : vector<8x128xf32>
    %380 = arith.addf %371, %351 : vector<8x128xf32>
    %381 = arith.maximumf %380, %370 : vector<8x128xf32>
    %382 = arith.subf %370, %381 : vector<8x128xf32>
    %383 = math.exp %382 : vector<8x128xf32>
    %384 = arith.addf %371, %351 : vector<8x128xf32>
    %385 = arith.subf %384, %381 : vector<8x128xf32>
    %386 = math.exp %385 : vector<8x128xf32>
    %387 = arith.mulf %386, %359 : vector<8x128xf32>
    %388 = arith.mulf %383, %373 : vector<8x128xf32>
    %389 = arith.addf %387, %388 : vector<8x128xf32>
    %390 = arith.mulf %386, %361 : vector<8x128xf32>
    %391 = arith.addf %390, %383 : vector<8x128xf32>
    %392 = tpu.reciprocal %391 {approx = true} : vector<8x128xf32> -> vector<8x128xf32>
    %393 = arith.mulf %389, %392 : vector<8x128xf32>
    %394 = arith.mulf %379, %393 : vector<8x128xf32>
    %c24_78 = arith.constant 24 : index
    %c0_79 = arith.constant 0 : index
    %395 = vector.load %arg7[%c24_78, %c0_79] : memref<64x128xf32, #tpu.memory_space<vmem>>, vector<8x128xf32>
    tpu.vector_store %arg7[%c24_78, %c0_79], %394 {strides = array<i32>} : memref<64x128xf32, #tpu.memory_space<vmem>>, vector<8x128xf32>,
    %396 = vector.extract_strided_slice %271 {offsets = [32, 0], sizes = [8, 512], strides = [1, 1]} : vector<64x512xf32> to vector<8x512xf32>
    %397 = arith.truncf %394 : vector<8x128xf32> to vector<8x128xbf16>
    %cst_80 = arith.constant dense<0.000000e+00> : vector<8x512xf32>
    %398 = tpu.matmul %397, %264, %cst_80 {dimension_numbers = #tpu.dot_dimension_numbers<[1], [0], [0], [1], [0, 0, 1, 1], [], []>} : vector<8x128xbf16>, vector<128x512xbf16>, vector<8x512xf32> -> vector<8x512xf32>
    %399 = arith.addf %396, %398 : vector<8x512xf32>
    %400 = vector.extract_strided_slice %399 {offsets = [0, 0], sizes = [8, 128], strides = [1, 1]} : vector<8x512xf32> to vector<8x128xf32>
    %401 = vector.extract_strided_slice %399 {offsets = [0, 128], sizes = [8, 128], strides = [1, 1]} : vector<8x512xf32> to vector<8x128xf32>
    %402 = vector.extract_strided_slice %399 {offsets = [0, 256], sizes = [8, 128], strides = [1, 1]} : vector<8x512xf32> to vector<8x128xf32>
    %403 = math.tanh %402 : vector<8x128xf32>
    %404 = vector.extract_strided_slice %399 {offsets = [0, 384], sizes = [8, 128], strides = [1, 1]} : vector<8x512xf32> to vector<8x128xf32>
    %405 = arith.negf %404 : vector<8x128xf32>
    %406 = math.exp %405 : vector<8x128xf32>
    %cst_81 = arith.constant 1.000000e+00 : f32
    %407 = vector.broadcast %cst_81 : f32 to vector<8x128xf32>
    %408 = arith.addf %407, %406 : vector<8x128xf32>
    %409 = arith.divf %407, %408 : vector<8x128xf32>
    %410 = arith.addf %401, %381 : vector<8x128xf32>
    %411 = arith.maximumf %410, %400 : vector<8x128xf32>
    %412 = arith.subf %400, %411 : vector<8x128xf32>
    %413 = math.exp %412 : vector<8x128xf32>
    %414 = arith.addf %401, %381 : vector<8x128xf32>
    %415 = arith.subf %414, %411 : vector<8x128xf32>
    %416 = math.exp %415 : vector<8x128xf32>
    %417 = arith.mulf %416, %389 : vector<8x128xf32>
    %418 = arith.mulf %413, %403 : vector<8x128xf32>
    %419 = arith.addf %417, %418 : vector<8x128xf32>
    %420 = arith.mulf %416, %391 : vector<8x128xf32>
    %421 = arith.addf %420, %413 : vector<8x128xf32>
    %422 = tpu.reciprocal %421 {approx = true} : vector<8x128xf32> -> vector<8x128xf32>
    %423 = arith.mulf %419, %422 : vector<8x128xf32>
    %424 = arith.mulf %409, %423 : vector<8x128xf32>
    %c32_82 = arith.constant 32 : index
    %c0_83 = arith.constant 0 : index
    %425 = vector.load %arg7[%c32_82, %c0_83] : memref<64x128xf32, #tpu.memory_space<vmem>>, vector<8x128xf32>
    tpu.vector_store %arg7[%c32_82, %c0_83], %424 {strides = array<i32>} : memref<64x128xf32, #tpu.memory_space<vmem>>, vector<8x128xf32>,
    %426 = vector.extract_strided_slice %271 {offsets = [40, 0], sizes = [8, 512], strides = [1, 1]} : vector<64x512xf32> to vector<8x512xf32>
    %427 = arith.truncf %424 : vector<8x128xf32> to vector<8x128xbf16>
    %cst_84 = arith.constant dense<0.000000e+00> : vector<8x512xf32>
    %428 = tpu.matmul %427, %264, %cst_84 {dimension_numbers = #tpu.dot_dimension_numbers<[1], [0], [0], [1], [0, 0, 1, 1], [], []>} : vector<8x128xbf16>, vector<128x512xbf16>, vector<8x512xf32> -> vector<8x512xf32>
    %429 = arith.addf %426, %428 : vector<8x512xf32>
    %430 = vector.extract_strided_slice %429 {offsets = [0, 0], sizes = [8, 128], strides = [1, 1]} : vector<8x512xf32> to vector<8x128xf32>
    %431 = vector.extract_strided_slice %429 {offsets = [0, 128], sizes = [8, 128], strides = [1, 1]} : vector<8x512xf32> to vector<8x128xf32>
    %432 = vector.extract_strided_slice %429 {offsets = [0, 256], sizes = [8, 128], strides = [1, 1]} : vector<8x512xf32> to vector<8x128xf32>
    %433 = math.tanh %432 : vector<8x128xf32>
    %434 = vector.extract_strided_slice %429 {offsets = [0, 384], sizes = [8, 128], strides = [1, 1]} : vector<8x512xf32> to vector<8x128xf32>
    %435 = arith.negf %434 : vector<8x128xf32>
    %436 = math.exp %435 : vector<8x128xf32>
    %cst_85 = arith.constant 1.000000e+00 : f32
    %437 = vector.broadcast %cst_85 : f32 to vector<8x128xf32>
    %438 = arith.addf %437, %436 : vector<8x128xf32>
    %439 = arith.divf %437, %438 : vector<8x128xf32>
    %440 = arith.addf %431, %411 : vector<8x128xf32>
    %441 = arith.maximumf %440, %430 : vector<8x128xf32>
    %442 = arith.subf %430, %441 : vector<8x128xf32>
    %443 = math.exp %442 : vector<8x128xf32>
    %444 = arith.addf %431, %411 : vector<8x128xf32>
    %445 = arith.subf %444, %441 : vector<8x128xf32>
    %446 = math.exp %445 : vector<8x128xf32>
    %447 = arith.mulf %446, %419 : vector<8x128xf32>
    %448 = arith.mulf %443, %433 : vector<8x128xf32>
    %449 = arith.addf %447, %448 : vector<8x128xf32>
    %450 = arith.mulf %446, %421 : vector<8x128xf32>
    %451 = arith.addf %450, %443 : vector<8x128xf32>
    %452 = tpu.reciprocal %451 {approx = true} : vector<8x128xf32> -> vector<8x128xf32>
    %453 = arith.mulf %449, %452 : vector<8x128xf32>
    %454 = arith.mulf %439, %453 : vector<8x128xf32>
    %c40_86 = arith.constant 40 : index
    %c0_87 = arith.constant 0 : index
    %455 = vector.load %arg7[%c40_86, %c0_87] : memref<64x128xf32, #tpu.memory_space<vmem>>, vector<8x128xf32>
    tpu.vector_store %arg7[%c40_86, %c0_87], %454 {strides = array<i32>} : memref<64x128xf32, #tpu.memory_space<vmem>>, vector<8x128xf32>,
    %456 = vector.extract_strided_slice %271 {offsets = [48, 0], sizes = [8, 512], strides = [1, 1]} : vector<64x512xf32> to vector<8x512xf32>
    %457 = arith.truncf %454 : vector<8x128xf32> to vector<8x128xbf16>
    %cst_88 = arith.constant dense<0.000000e+00> : vector<8x512xf32>
    %458 = tpu.matmul %457, %264, %cst_88 {dimension_numbers = #tpu.dot_dimension_numbers<[1], [0], [0], [1], [0, 0, 1, 1], [], []>} : vector<8x128xbf16>, vector<128x512xbf16>, vector<8x512xf32> -> vector<8x512xf32>
    %459 = arith.addf %456, %458 : vector<8x512xf32>
    %460 = vector.extract_strided_slice %459 {offsets = [0, 0], sizes = [8, 128], strides = [1, 1]} : vector<8x512xf32> to vector<8x128xf32>
    %461 = vector.extract_strided_slice %459 {offsets = [0, 128], sizes = [8, 128], strides = [1, 1]} : vector<8x512xf32> to vector<8x128xf32>
    %462 = vector.extract_strided_slice %459 {offsets = [0, 256], sizes = [8, 128], strides = [1, 1]} : vector<8x512xf32> to vector<8x128xf32>
    %463 = math.tanh %462 : vector<8x128xf32>
    %464 = vector.extract_strided_slice %459 {offsets = [0, 384], sizes = [8, 128], strides = [1, 1]} : vector<8x512xf32> to vector<8x128xf32>
    %465 = arith.negf %464 : vector<8x128xf32>
    %466 = math.exp %465 : vector<8x128xf32>
    %cst_89 = arith.constant 1.000000e+00 : f32
    %467 = vector.broadcast %cst_89 : f32 to vector<8x128xf32>
    %468 = arith.addf %467, %466 : vector<8x128xf32>
    %469 = arith.divf %467, %468 : vector<8x128xf32>
    %470 = arith.addf %461, %441 : vector<8x128xf32>
    %471 = arith.maximumf %470, %460 : vector<8x128xf32>
    %472 = arith.subf %460, %471 : vector<8x128xf32>
    %473 = math.exp %472 : vector<8x128xf32>
    %474 = arith.addf %461, %441 : vector<8x128xf32>
    %475 = arith.subf %474, %471 : vector<8x128xf32>
    %476 = math.exp %475 : vector<8x128xf32>
    %477 = arith.mulf %476, %449 : vector<8x128xf32>
    %478 = arith.mulf %473, %463 : vector<8x128xf32>
    %479 = arith.addf %477, %478 : vector<8x128xf32>
    %480 = arith.mulf %476, %451 : vector<8x128xf32>
    %481 = arith.addf %480, %473 : vector<8x128xf32>
    %482 = tpu.reciprocal %481 {approx = true} : vector<8x128xf32> -> vector<8x128xf32>
    %483 = arith.mulf %479, %482 : vector<8x128xf32>
    %484 = arith.mulf %469, %483 : vector<8x128xf32>
    %c48_90 = arith.constant 48 : index
    %c0_91 = arith.constant 0 : index
    %485 = vector.load %arg7[%c48_90, %c0_91] : memref<64x128xf32, #tpu.memory_space<vmem>>, vector<8x128xf32>
    tpu.vector_store %arg7[%c48_90, %c0_91], %484 {strides = array<i32>} : memref<64x128xf32, #tpu.memory_space<vmem>>, vector<8x128xf32>,
    %486 = vector.extract_strided_slice %271 {offsets = [56, 0], sizes = [8, 512], strides = [1, 1]} : vector<64x512xf32> to vector<8x512xf32>
    %487 = arith.truncf %484 : vector<8x128xf32> to vector<8x128xbf16>
    %cst_92 = arith.constant dense<0.000000e+00> : vector<8x512xf32>
    %488 = tpu.matmul %487, %264, %cst_92 {dimension_numbers = #tpu.dot_dimension_numbers<[1], [0], [0], [1], [0, 0, 1, 1], [], []>} : vector<8x128xbf16>, vector<128x512xbf16>, vector<8x512xf32> -> vector<8x512xf32>
    %489 = arith.addf %486, %488 : vector<8x512xf32>
    %490 = vector.extract_strided_slice %489 {offsets = [0, 0], sizes = [8, 128], strides = [1, 1]} : vector<8x512xf32> to vector<8x128xf32>
    %491 = vector.extract_strided_slice %489 {offsets = [0, 128], sizes = [8, 128], strides = [1, 1]} : vector<8x512xf32> to vector<8x128xf32>
    %492 = vector.extract_strided_slice %489 {offsets = [0, 256], sizes = [8, 128], strides = [1, 1]} : vector<8x512xf32> to vector<8x128xf32>
    %493 = math.tanh %492 : vector<8x128xf32>
    %494 = vector.extract_strided_slice %489 {offsets = [0, 384], sizes = [8, 128], strides = [1, 1]} : vector<8x512xf32> to vector<8x128xf32>
    %495 = arith.negf %494 : vector<8x128xf32>
    %496 = math.exp %495 : vector<8x128xf32>
    %cst_93 = arith.constant 1.000000e+00 : f32
    %497 = vector.broadcast %cst_93 : f32 to vector<8x128xf32>
    %498 = arith.addf %497, %496 : vector<8x128xf32>
    %499 = arith.divf %497, %498 : vector<8x128xf32>
    %500 = arith.addf %491, %471 : vector<8x128xf32>
    %501 = arith.maximumf %500, %490 : vector<8x128xf32>
    %502 = arith.subf %490, %501 : vector<8x128xf32>
    %503 = math.exp %502 : vector<8x128xf32>
    %504 = arith.addf %491, %471 : vector<8x128xf32>
    %505 = arith.subf %504, %501 : vector<8x128xf32>
    %506 = math.exp %505 : vector<8x128xf32>
    %507 = arith.mulf %506, %479 : vector<8x128xf32>
    %508 = arith.mulf %503, %493 : vector<8x128xf32>
    %509 = arith.addf %507, %508 : vector<8x128xf32>
    %510 = arith.mulf %506, %481 : vector<8x128xf32>
    %511 = arith.addf %510, %503 : vector<8x128xf32>
    %512 = tpu.reciprocal %511 {approx = true} : vector<8x128xf32> -> vector<8x128xf32>
    %513 = arith.mulf %509, %512 : vector<8x128xf32>
    %514 = arith.mulf %499, %513 : vector<8x128xf32>
    %c56_94 = arith.constant 56 : index
    %c0_95 = arith.constant 0 : index
    %515 = vector.load %arg7[%c56_94, %c0_95] : memref<64x128xf32, #tpu.memory_space<vmem>>, vector<8x128xf32>
    tpu.vector_store %arg7[%c56_94, %c0_95], %514 {strides = array<i32>} : memref<64x128xf32, #tpu.memory_space<vmem>>, vector<8x128xf32>,
    %c0_96 = arith.constant 0 : index
    %c0_97 = arith.constant 0 : index
    %516 = vector.load %arg7[%c0_96, %c0_97] : memref<64x128xf32, #tpu.memory_space<vmem>>, vector<64x128xf32>
    %c0_98 = arith.constant 0 : index
    %c0_99 = arith.constant 0 : index
    %517 = vector.load %arg0[%c0_98, %c0_99] : memref<64x128xf32, #tpu.memory_space<vmem>>, vector<64x128xf32>
    %518 = arith.addf %516, %517 : vector<64x128xf32>
    %c0_100 = arith.constant 0 : index
    %c0_101 = arith.constant 0 : index
    %519 = vector.load %arg7[%c0_100, %c0_101] : memref<64x128xf32, #tpu.memory_space<vmem>>, vector<64x128xf32>
    tpu.vector_store %arg7[%c0_100, %c0_101], %518 {strides = array<i32>} : memref<64x128xf32, #tpu.memory_space<vmem>>, vector<64x128xf32>,
    %c56_102 = arith.constant 56 : index
    %c0_103 = arith.constant 0 : index
    %520 = vector.load %arg7[%c56_102, %c0_103] : memref<64x128xf32, #tpu.memory_space<vmem>>, vector<8x128xf32>
    %c0_104 = arith.constant 0 : index
    %c0_105 = arith.constant 0 : index
    %521 = vector.load %arg4[%c0_104, %c0_105] : memref<1x128xf32, #tpu.memory_space<vmem>>, vector<1x128xf32>
    %522 = vector.broadcast %521 : vector<1x128xf32> to vector<8x128xf32>
    %523 = arith.mulf %520, %522 : vector<8x128xf32>
    %cst_106 = arith.constant dense<0.000000e+00> : vector<8xf32>
    %524 = vector.multi_reduction <add>, %523, %cst_106 [1] : vector<8x128xf32> to vector<8xf32>
    %525 = vector.shape_cast %524 : vector<8xf32> to vector<8x1xf32>
    %c0_107 = arith.constant 0 : index
    %c0_108 = arith.constant 0 : index
    %526 = vector.load %arg5[%c0_107, %c0_108] : memref<1x1xf32, #tpu.memory_space<vmem>>, vector<1x1xf32>
    %527 = vector.broadcast %526 : vector<1x1xf32> to vector<8x1xf32>
    %528 = arith.addf %525, %527 : vector<8x1xf32>
    %529 = vector.shape_cast %528 : vector<8x1xf32> to vector<8x1xf32>
    %530 = vector.broadcast %529 : vector<8x1xf32> to vector<8x128xf32>
    %c0_109 = arith.constant 0 : index
    %c0_110 = arith.constant 0 : index
    %531 = vector.load %arg6[%c0_109, %c0_110] : memref<8x128xf32, #tpu.memory_space<vmem>>, vector<8x128xf32>
    tpu.vector_store %arg6[%c0_109, %c0_110], %530 {strides = array<i32>} : memref<8x128xf32, #tpu.memory_space<vmem>>, vector<8x128xf32>,
    return
  }
}

</mosaic_0001>

<bundles_post_ra>
// kernel: xlstm_classifier_forward.1
= control target key start
LH: loop header
LB: loop body
LE: loop exit
PB: predicated region body
PF: predicated region fallthrough
CT: control target
= control target key end

     0   :  { %v5672_v1 = vmov 0   ;;  %s5661_s1 = inlined_call_operand.vmem [shape: bf16[2,128,512], index: 1, kind: input, shape index: {}]   ;;  %s5662_s2 = inlined_call_operand.vmem [shape: bf16[2,128,512], index: 2, kind: input, shape index: {}]   ;;  %s5663_s0 = inlined_call_operand.vmem [shape: f32[64,128], index: 0, kind: input, shape index: {}]   ;;  %s5664_s3 = inlined_call_operand.vmem [shape: f32[2,1,512], index: 3, kind: input, shape index: {}]   ;;  %s5665_s5 = inlined_call_operand.<no memory space> [shape: f32[1,1], index: 5, kind: input, shape index: {}]   ;;  %s5666_s4 = inlined_call_operand.vmem [shape: f32[1,128], index: 4, kind: input, shape index: {}]   ;;  %s5667_s6 = inlined_call_operand.vmem [shape: f32[8,128], index: 6, kind: output, shape index: {}]  }
   0x1   :  { %v3251_v0 = vld [vmem:[%s5661_s1 + $0x4] ss:$16 sps:$4 sm:$0xff]   ;;  %332 = vmatprep.mubr.bf16.mxu0 %v5672_v1  ;;  %405 = vmatprep.mubr.bf16.mxu1 %v5672_v1  ;;  %v3253_v2 = vld [vmem:[%s5661_s1 + $0xc] ss:$16 sps:$4 sm:$0xff]   ;;  %v3255_v3 = vld [vmem:[%s5661_s1] ss:$16 sps:$4 sm:$0xff]  }
   0x2   :  { %3250 = vset.pattern.permute.xlu0 %v5672_v1  ;;  %300 = vmatprep.subr.bf16.mxu0 %v3251_v0  ;;  %v3256_v4 = vld [vmem:[%s5661_s1 + $0x8] ss:$16 sps:$4 sm:$0xff]   ;;  %v3257_v5 = vld [vmem:[%s5661_s1 + $0x24] ss:$16 sps:$4 sm:$0xff]   ;;  %v3259_v6 = vld [vmem:[%s5661_s1 + $0x2c] ss:$16 sps:$4 sm:$0xff]  }
   0x3   :  { %373 = vmatprep.subr.bf16.mxu1 %v3253_v2  ;;  %301 = vmatpush1.bf16.msra.mxu0 %v3255_v3  ;;  %v3261_v7 = vld [vmem:[%s5661_s1 + $0x20] ss:$16 sps:$4 sm:$0xff]   ;;  %v3262_v8 = vld [vmem:[%s5661_s1 + $0x28] ss:$16 sps:$4 sm:$0xff]   ;;  %v3263_v9 = vld [vmem:[%s5661_s1 + $0x44] ss:$16 sps:$4 sm:$0xff]  }
   0x4   :  { %374 = vmatpush1.bf16.msra.mxu1 %v3256_v4  ;;  %302 = vmatprep.subr.bf16.mxu0 %v3257_v5  ;;  %v3265_v10 = vld [vmem:[%s5661_s1 + $0x4c] ss:$16 sps:$4 sm:$0xff]   ;;  %v3267_v11 = vld [vmem:[%s5661_s1 + $0x40] ss:$16 sps:$4 sm:$0xff]   ;;  %v3268_v12 = vld [vmem:[%s5661_s1 + $0x48] ss:$16 sps:$4 sm:$0xff]  }
   0x5   :  { %375 = vmatprep.subr.bf16.mxu1 %v3259_v6  ;;  %v3269_v13 = vld [vmem:[%s5661_s1 + $0x64] ss:$16 sps:$4 sm:$0xff]   ;;  %v3271_v14 = vld [vmem:[%s5661_s1 + $0x6c] ss:$16 sps:$4 sm:$0xff]   ;;  %v3273_v15 = vld [vmem:[%s5661_s1 + $0x60] ss:$16 sps:$4 sm:$0xff]  }
   0x6   :  { %v3274_v16 = vld [vmem:[%s5661_s1 + $0x68] ss:$16 sps:$4 sm:$0xff]   ;;  %v3275_v17 = vld [vmem:[%s5661_s1 + $0x84] ss:$16 sps:$4 sm:$0xff]   ;;  %v3277_v18 = vld [vmem:[%s5661_s1 + $0x8c] ss:$16 sps:$4 sm:$0xff]  }
   0x7   :  { %303 = vmatpush1.bf16.msra.mxu0 %v3261_v7  ;;  %v3279_v19 = vld [vmem:[%s5661_s1 + $0x80] ss:$16 sps:$4 sm:$0xff]   ;;  %v3280_v20 = vld [vmem:[%s5661_s1 + $0x88] ss:$16 sps:$4 sm:$0xff]   ;;  %v3281_v21 = vld [vmem:[%s5661_s1 + $0xa4] ss:$16 sps:$4 sm:$0xff]  }
   0x8   :  { %376 = vmatpush1.bf16.msra.mxu1 %v3262_v8  ;;  %304 = vmatprep.subr.bf16.mxu0 %v3263_v9  ;;  %v3283_v22 = vld [vmem:[%s5661_s1 + $0xac] ss:$16 sps:$4 sm:$0xff]   ;;  %v3285_v23 = vld [vmem:[%s5661_s1 + $0xa0] ss:$16 sps:$4 sm:$0xff]   ;;  %v3286_v24 = vld [vmem:[%s5661_s1 + $0xa8] ss:$16 sps:$4 sm:$0xff]  }
   0x9   :  { %377 = vmatprep.subr.bf16.mxu1 %v3265_v10  ;;  %v3287_v25 = vld [vmem:[%s5661_s1 + $0xc4] ss:$16 sps:$4 sm:$0xff]   ;;  %v3289_v26 = vld [vmem:[%s5661_s1 + $0xcc] ss:$16 sps:$4 sm:$0xff]   ;;  %v3291_v27 = vld [vmem:[%s5661_s1 + $0xc0] ss:$16 sps:$4 sm:$0xff]  }
   0xa   :  { %v3292_v28 = vld [vmem:[%s5661_s1 + $0xc8] ss:$16 sps:$4 sm:$0xff]   ;;  %v3293_v29 = vld [vmem:[%s5661_s1 + $0xe4] ss:$16 sps:$4 sm:$0xff]   ;;  %v3295_v30 = vld [vmem:[%s5661_s1 + $0xec] ss:$16 sps:$4 sm:$0xff]  }
   0xb   :  { %305 = vmatpush1.bf16.msra.mxu0 %v3267_v11  ;;  %v3297_v31 = vld [vmem:[%s5661_s1 + $0xe0] ss:$16 sps:$4 sm:$0xff]   ;;  %v3298_v32 = vld [vmem:[%s5661_s1 + $0xe8] ss:$16 sps:$4 sm:$0xff]   ;;  %v3843_v35 = vld [vmem:[%s5662_s2 + $0x4] ss:$16 sps:$4 sm:$0xff]  }
   0xc   :  { %378 = vmatpush1.bf16.msra.mxu1 %v3268_v12  ;;  %306 = vmatprep.subr.bf16.mxu0 %v3269_v13  ;;  %v26_v33 = vld [vmem:[%s5663_s0] sm:$0xff]  ;;  %v27_v34 = vld [vmem:[%s5663_s0 + $0x8] sm:$0xff]  ;;  %v28_v44 = vld [vmem:[%s5663_s0 + $0x10] sm:$0xff] }
   0xd   :  { %379 = vmatprep.subr.bf16.mxu1 %v3271_v14  ;;  %v3848_v36 = vld [vmem:[%s5662_s2 + $0xc] ss:$16 sps:$4 sm:$0xff]   ;;  %v115_v37 = vpack.c.bf16 %v27_v34, %v26_v33  ;;  %v3853_v38 = vld [vmem:[%s5662_s2] ss:$16 sps:$4 sm:$0xff]   ;;  %v3858_v39 = vld [vmem:[%s5662_s2 + $0x8] ss:$16 sps:$4 sm:$0xff]   ;;  %v120_v14 = vlaneseq }
   0xe   :  { %v3865_v40 = vld [vmem:[%s5662_s2 + $0x24] ss:$16 sps:$4 sm:$0xff]   ;;  %v3870_v41 = vld [vmem:[%s5662_s2 + $0x2c] ss:$16 sps:$4 sm:$0xff]   ;;  %v3875_v42 = vld [vmem:[%s5662_s2 + $0x20] ss:$16 sps:$4 sm:$0xff]  }
   0xf   :  { %307 = vmatpush1.bf16.msra.mxu0 %v3273_v15  ;;  %v3880_v43 = vld [vmem:[%s5662_s2 + $0x28] ss:$16 sps:$4 sm:$0xff]   ;;  %v3893_v46 = vld [vmem:[%s5662_s2 + $0x44] ss:$16 sps:$4 sm:$0xff]   ;;  %v3900_v47 = vld [vmem:[%s5662_s2 + $0x4c] ss:$16 sps:$4 sm:$0xff]  }
  0x10   :  { %380 = vmatpush1.bf16.msra.mxu1 %v3274_v16  ;;  %308 = vmatprep.subr.bf16.mxu0 %v3275_v17  ;;  %v29_v45 = vld [vmem:[%s5663_s0 + $0x18] sm:$0xff]  ;;  %v3907_v49 = vld [vmem:[%s5662_s2 + $0x40] ss:$16 sps:$4 sm:$0xff]   ;;  %v3919_v51 = vld [vmem:[%s5662_s2 + $0x64] ss:$16 sps:$4 sm:$0xff]   ;;  %v4096_v15 = vshrl.u32 %v120_v14, 7 }
  0x11   :  { %381 = vmatprep.subr.bf16.mxu1 %v3277_v18  ;;  %v116_v48 = vpack.c.bf16 %v29_v45, %v28_v44  ;;  %v3912_v50 = vld [vmem:[%s5662_s2 + $0x48] ss:$16 sps:$4 sm:$0xff]   ;;  %v3926_v52 = vld [vmem:[%s5662_s2 + $0x6c] ss:$16 sps:$4 sm:$0xff]   ;;  %v3931_v53 = vld [vmem:[%s5662_s2 + $0x60] ss:$16 sps:$4 sm:$0xff]  }
  0x12   :  { %v3936_v54 = vld [vmem:[%s5662_s2 + $0x68] ss:$16 sps:$4 sm:$0xff]   ;;  %v30_v55 = vld [vmem:[%s5663_s0 + $0x20] sm:$0xff]  ;;  %v3956_v58 = vld [vmem:[%s5662_s2 + $0x8c] ss:$16 sps:$4 sm:$0xff]   ;;  %5676 = vst [vmem:[#allocation4_spill] sm:$0xff] %v4096_v15 }
  0x13   :  { %309 = vmatpush1.bf16.msra.mxu0 %v3279_v19  ;;  %v31_v56 = vld [vmem:[%s5663_s0 + $0x28] sm:$0xff]  ;;  %v3951_v57 = vld [vmem:[%s5662_s2 + $0x84] ss:$16 sps:$4 sm:$0xff]   ;;  %v3963_v59 = vld [vmem:[%s5662_s2 + $0x80] ss:$16 sps:$4 sm:$0xff]   ;;  %v5670_v16 = vsub.s32 2, %v4096_v15 }
  0x14   :  { %382 = vmatpush1.bf16.msra.mxu1 %v3280_v20  ;;  %310 = vmatprep.subr.bf16.mxu0 %v3281_v21  ;;  %v3968_v60 = vld [vmem:[%s5662_s2 + $0x88] ss:$16 sps:$4 sm:$0xff]   ;;  %v117_v61 = vpack.c.bf16 %v31_v56, %v30_v55  ;;  %v3973_v62 = vld [vmem:[%s5662_s2 + $0xa4] ss:$16 sps:$4 sm:$0xff]   ;;  %v3978_v63 = vld [vmem:[%s5662_s2 + $0xac] ss:$16 sps:$4 sm:$0xff]  }
  0x15   :  { %383 = vmatprep.subr.bf16.mxu1 %v3283_v22  ;;  %v3987_v0 = vld [vmem:[%s5662_s2 + $0xa0] ss:$16 sps:$4 sm:$0xff]   ;;  %v3992_v2 = vld [vmem:[%s5662_s2 + $0xa8] ss:$16 sps:$4 sm:$0xff]   ;;  %v4003_v5 = vld [vmem:[%s5662_s2 + $0xc4] ss:$16 sps:$4 sm:$0xff]  }
  0x16   :  { %v32_v3 = vld [vmem:[%s5663_s0 + $0x30] sm:$0xff]  ;;  %v33_v4 = vld [vmem:[%s5663_s0 + $0x38] sm:$0xff]  ;;  %v5668_v17 = vsub.s32 3, %v4096_v15  ;;  %v5671_v18 = vsub.s32 0, %v4096_v15  ;;  %v106_v19 = vld [vmem:[%s5664_s3] sm:$0xf] }
  0x17   :  { %311 = vmatpush1.bf16.msra.mxu0 %v3285_v23  ;;  %v4008_v6 = vld [vmem:[%s5662_s2 + $0xcc] ss:$16 sps:$4 sm:$0xff]   ;;  %v4019_v7 = vld [vmem:[%s5662_s2 + $0xc0] ss:$16 sps:$4 sm:$0xff]   ;;  %v4024_v8 = vld [vmem:[%s5662_s2 + $0xc8] ss:$16 sps:$4 sm:$0xff]   ;;  %v118_v9 = vpack.c.bf16 %v33_v4, %v32_v3  ;;  %v4107_v21 = vrot.slane %v106_v19, %v5670_v16 }
  0x18   :  { %384 = vmatpush1.bf16.msra.mxu1 %v3286_v24  ;;  %312 = vmatprep.subr.bf16.mxu0 %v3287_v25  ;;  %v4029_v10 = vld [vmem:[%s5662_s2 + $0xe4] ss:$16 sps:$4 sm:$0xff]   ;;  %v4034_v11 = vld [vmem:[%s5662_s2 + $0xec] ss:$16 sps:$4 sm:$0xff]   ;;  %v4043_v12 = vld [vmem:[%s5662_s2 + $0xe0] ss:$16 sps:$4 sm:$0xff]   ;;  %v4115_v24 = vrot.slane %v106_v19, %v5668_v17  ;;  %v123_v25 = vrot.slane %v106_v19, %v5671_v18 }
  0x19   :  { %385 = vmatprep.subr.bf16.mxu1 %v3289_v26  ;;  %v4048_v13 = vld [vmem:[%s5662_s2 + $0xe8] ss:$16 sps:$4 sm:$0xff]   ;;  %v5669_v20 = vsub.s32 1, %v4096_v15 }
  0x1b   :  { %313 = vmatpush1.bf16.msra.mxu0 %v3291_v27 }
  0x1c   :  { %386 = vmatpush1.bf16.msra.mxu1 %v3292_v28  ;;  %314 = vmatprep.subr.bf16.mxu0 %v3293_v29  ;;  %v127_v28 = vrot.slane %v106_v19, %v5669_v20 }
  0x1d   :  { %387 = vmatprep.subr.bf16.mxu1 %v3295_v30 }
  0x1f   :  { %315 = vmatpush1.bf16.msra.mxu0 %v3297_v31 }
  0x20   :  { %388 = vmatpush1.bf16.msra.mxu1 %v3298_v32  ;;  %606 = vmatprep.subr.bf16.mxu0 %v3843_v35 }
  0x21   :  { %647 = vmatprep.subr.bf16.mxu1 %v3848_v36 }
  0x22   :  { %333 = vmatmul.mubr.bf16.vlgmr.msra.gmra.mrb[0].mxu0 %v115_v37 }
  0x23   :  { %406 = vmatmul.mubr.bf16.vlgmr.msra.gmra.mrb[0].mxu1 %v115_v37  ;;  %607 = vmatpush1.bf16.msra.mxu0 %v3853_v38 }
  0x24   :  { %648 = vmatpush1.bf16.msra.mxu1 %v3858_v39  ;;  %608 = vmatprep.subr.bf16.mxu0 %v3865_v40 }
  0x25   :  { %649 = vmatprep.subr.bf16.mxu1 %v3870_v41  ;;  %342 = vmatprep.mubr.bf16.mxu0 %v5672_v1 }
  0x26   :  { %415 = vmatprep.mubr.bf16.mxu1 %v5672_v1 }
  0x27   :  { %609 = vmatpush1.bf16.msra.mxu0 %v3875_v42 }
  0x28   :  { %650 = vmatpush1.bf16.msra.mxu1 %v3880_v43  ;;  %610 = vmatprep.subr.bf16.mxu0 %v3893_v46 }
  0x29   :  { %651 = vmatprep.subr.bf16.mxu1 %v3900_v47 }
  0x2a   :  { %343 = vmatmul.mubr.bf16.gmra.mrb[4].mxu0 %v116_v48 }
  0x2b   :  { %416 = vmatmul.mubr.bf16.gmra.mrb[4].mxu1 %v116_v48  ;;  %611 = vmatpush1.bf16.msra.mxu0 %v3907_v49 }
  0x2c   :  { %652 = vmatpush1.bf16.msra.mxu1 %v3912_v50  ;;  %612 = vmatprep.subr.bf16.mxu0 %v3919_v51 }
  0x2d   :  { %653 = vmatprep.subr.bf16.mxu1 %v3926_v52  ;;  %352 = vmatprep.mubr.bf16.mxu0 %v5672_v1 }
  0x2e   :  { %425 = vmatprep.mubr.bf16.mxu1 %v5672_v1 }
  0x2f   :  { %613 = vmatpush1.bf16.msra.mxu0 %v3931_v53 }
  0x30   :  { %654 = vmatpush1.bf16.msra.mxu1 %v3936_v54  ;;  %614 = vmatprep.subr.bf16.mxu0 %v3951_v57 }
  0x31   :  { %655 = vmatprep.subr.bf16.mxu1 %v3956_v58 }
  0x32   :  { %353 = vmatmul.mubr.bf16.gmra.mrb[8].mxu0 %v117_v61 }
  0x33   :  { %426 = vmatmul.mubr.bf16.gmra.mrb[8].mxu1 %v117_v61  ;;  %615 = vmatpush1.bf16.msra.mxu0 %v3963_v59 }
  0x34   :  { %656 = vmatpush1.bf16.msra.mxu1 %v3968_v60  ;;  %616 = vmatprep.subr.bf16.mxu0 %v3973_v62 }
  0x35   :  { %657 = vmatprep.subr.bf16.mxu1 %v3978_v63  ;;  %362 = vmatprep.mubr.bf16.mxu0 %v5672_v1 }
  0x36   :  { %435 = vmatprep.mubr.bf16.mxu1 %v5672_v1 }
  0x37   :  { %617 = vmatpush1.bf16.msra.mxu0 %v3987_v0 }
  0x38   :  { %658 = vmatpush1.bf16.msra.mxu1 %v3992_v2  ;;  %618 = vmatprep.subr.bf16.mxu0 %v4003_v5 }
  0x39   :  { %659 = vmatprep.subr.bf16.mxu1 %v4008_v6 }
  0x3a   :  { %363 = vmatmul.mubr.bf16.gmra.mrb[12].mxu0 %v118_v9 }
  0x3b   :  { %436 = vmatmul.mubr.bf16.gmra.mrb[12].mxu1 %v118_v9  ;;  %619 = vmatpush1.bf16.msra.mxu0 %v4019_v7 }
  0x3c   :  { %660 = vmatpush1.bf16.msra.mxu1 %v4024_v8  ;;  %620 = vmatprep.subr.bf16.mxu0 %v4029_v10 }
  0x3d   :  { %661 = vmatprep.subr.bf16.mxu1 %v4034_v11  ;;  %638 = vmatprep.mubr.bf16.mxu0 %v5672_v1 }
  0x3e   :  { %679 = vmatprep.mubr.bf16.mxu1 %v5672_v1 }
  0x3f   :  { %621 = vmatpush1.bf16.msra.mxu0 %v4043_v12 }
  0x40   :  { %662 = vmatpush1.bf16.msra.mxu1 %v4048_v13  ;;  %716 = vmatprep.subr.bf16.mxu0 %v3843_v35 }
  0x41   :  { %757 = vmatprep.subr.bf16.mxu1 %v3848_v36 }
  0x42   :  { %639 = vmatmul.mubr.bf16.vlgmr.msra.gmra.mrb[16].mxu0 %v5672_v1 }
  0x43   :  { %680 = vmatmul.mubr.bf16.vlgmr.msra.gmra.mrb[16].mxu1 %v5672_v1  ;;  %717 = vmatpush1.bf16.msra.mxu0 %v3853_v38 }
  0x44   :  { %758 = vmatpush1.bf16.msra.mxu1 %v3858_v39  ;;  %718 = vmatprep.subr.bf16.mxu0 %v3865_v40 }
  0x45   :  { %759 = vmatprep.subr.bf16.mxu1 %v3870_v41  ;;  %748 = vmatprep.mubr.bf16.mxu0 %v5672_v1 }
  0x46   :  { %789 = vmatprep.mubr.bf16.mxu1 %v5672_v1 }
  0x47   :  { %719 = vmatpush1.bf16.msra.mxu0 %v3875_v42 }
  0x48   :  { %760 = vmatpush1.bf16.msra.mxu1 %v3880_v43  ;;  %720 = vmatprep.subr.bf16.mxu0 %v3893_v46 }
  0x49   :  { %761 = vmatprep.subr.bf16.mxu1 %v3900_v47 }
  0x4b   :  { %721 = vmatpush1.bf16.msra.mxu0 %v3907_v49 }
  0x4c   :  { %762 = vmatpush1.bf16.msra.mxu1 %v3912_v50  ;;  %722 = vmatprep.subr.bf16.mxu0 %v3919_v51 }
  0x4d   :  { %763 = vmatprep.subr.bf16.mxu1 %v3926_v52 }
  0x4f   :  { %723 = vmatpush1.bf16.msra.mxu0 %v3931_v53 }
  0x50   :  { %764 = vmatpush1.bf16.msra.mxu1 %v3936_v54  ;;  %724 = vmatprep.subr.bf16.mxu0 %v3951_v57 }
  0x51   :  { %765 = vmatprep.subr.bf16.mxu1 %v3956_v58 }
  0x53   :  { %725 = vmatpush1.bf16.msra.mxu0 %v3963_v59 }
  0x54   :  { %766 = vmatpush1.bf16.msra.mxu1 %v3968_v60  ;;  %726 = vmatprep.subr.bf16.mxu0 %v3973_v62 }
  0x55   :  { %767 = vmatprep.subr.bf16.mxu1 %v3978_v63 }
  0x57   :  { %727 = vmatpush1.bf16.msra.mxu0 %v3987_v0 }
  0x58   :  { %768 = vmatpush1.bf16.msra.mxu1 %v3992_v2  ;;  %728 = vmatprep.subr.bf16.mxu0 %v4003_v5 }
  0x59   :  { %769 = vmatprep.subr.bf16.mxu1 %v4008_v6 }
  0x5b   :  { %729 = vmatpush1.bf16.msra.mxu0 %v4019_v7 }
  0x5c   :  { %770 = vmatpush1.bf16.msra.mxu1 %v4024_v8  ;;  %730 = vmatprep.subr.bf16.mxu0 %v4029_v10 }
  0x5d   :  { %771 = vmatprep.subr.bf16.mxu1 %v4034_v11 }
  0x5f   :  { %731 = vmatpush1.bf16.msra.mxu0 %v4043_v12 }
  0x60   :  { %772 = vmatpush1.bf16.msra.mxu1 %v4048_v13  ;;  %827 = vmatprep.subr.bf16.mxu0 %v3843_v35 }
  0x61   :  { %868 = vmatprep.subr.bf16.mxu1 %v3848_v36 }
  0xf5   :  { %v4109_v22 = vpop.f32.mrb[0].mxu0 }
  0xf6   :  { %v4111_v23 = vpop.f32.mrb[0].mxu1  ;;  %v336_v26 = vpop.f32.mrb[1].mxu0 }
  0xf7   :  { %v409_v27 = vpop.f32.mrb[1].mxu1  ;;  %v338_v29 = vpop.f32.mrb[2].mxu0 }
  0xf8   :  { %v411_v30 = vpop.f32.mrb[2].mxu1  ;;  %v4121_v31 = vadd.f32 %v338_v29, %v123_v25  ;;  %v340_v32 = vpop.f32.mrb[3].mxu0 }
  0xf9   :  { %v4124_v33 = vadd.f32 %v411_v30, %v4107_v21  ;;  %v413_v34 = vpop.f32.mrb[3].mxu1  ;;  %v4126_v37 = vadd.f32 %v340_v32, %v127_v28 }
  0xfa   :  { %v4129_v44 = vadd.f32 %v413_v34, %v4115_v24 }
  0xfd   :  { %v344_v45 = vpop.f32.mrb[4].mxu0 }
  0xfe   :  { %v417_v48 = vpop.f32.mrb[4].mxu1  ;;  %v4131_v55 = vadd.f32 %v344_v45, %v123_v25  ;;  %v346_v56 = vpop.f32.mrb[5].mxu0 }
  0xff   :  { %v4134_v61 = vadd.f32 %v417_v48, %v4107_v21  ;;  %v419_v3 = vpop.f32.mrb[5].mxu1  ;;  %v4136_v4 = vadd.f32 %v346_v56, %v127_v28  ;;  %v348_v9 = vpop.f32.mrb[6].mxu0 }
 0x100   :  { %v4139_v14 = vadd.f32 %v419_v3, %v4115_v24  ;;  %v421_v19 = vpop.f32.mrb[6].mxu1  ;;  %v4141_v29 = vadd.f32 %v348_v9, %v123_v25  ;;  %v350_v30 = vpop.f32.mrb[7].mxu0 }
 0x101   :  { %v4144_v32 = vadd.f32 %v421_v19, %v4107_v21  ;;  %v423_v34 = vpop.f32.mrb[7].mxu1  ;;  %v4146_v45 = vadd.f32 %v350_v30, %v127_v28 }
 0x102   :  { %5677 = vst [vmem:[#allocation5_spill] sm:$0xff] %v4139_v14  ;;  %5678 = vst [vmem:[#allocation6_spill] sm:$0xff] %v4141_v29  ;;  %v4149_v48 = vadd.f32 %v423_v34, %v4115_v24 }
 0x103   :  { %5679 = vst [vmem:[#allocation7_spill] sm:$0xff] %v4144_v32  ;;  %5680 = vst [vmem:[#allocation8_spill] sm:$0xff] %v4146_v45 }
 0x104   :  { %5681 = vst [vmem:[#allocation9_spill] sm:$0xff] %v4149_v48 }
 0x105   :  { %v354_v17 = vpop.f32.mrb[8].mxu0 }
 0x106   :  { %v427_v56 = vpop.f32.mrb[8].mxu1  ;;  %v4151_v20 = vadd.f32 %v354_v17, %v123_v25  ;;  %v356_v16 = vpop.f32.mrb[9].mxu0 }
 0x107   :  { %v4154_v3 = vadd.f32 %v427_v56, %v4107_v21  ;;  %v429_v9 = vpop.f32.mrb[9].mxu1  ;;  %v4156_v18 = vadd.f32 %v356_v16, %v127_v28  ;;  %v358_v1 = vpop.f32.mrb[10].mxu0 }
 0x108   :  { %5682 = vst [vmem:[#allocation10_spill] sm:$0xff] %v4151_v20  ;;  %v4159_v19 = vadd.f32 %v429_v9, %v4115_v24  ;;  %v431_v30 = vpop.f32.mrb[10].mxu1  ;;  %v4161_v15 = vadd.f32 %v358_v1, %v123_v25  ;;  %v360_v34 = vpop.f32.mrb[11].mxu0 }
 0x109   :  { %5683 = vst [vmem:[#allocation11_spill] sm:$0xff] %v4154_v3  ;;  %5684 = vst [vmem:[#allocation12_spill] sm:$0xff] %v4156_v18  ;;  %v4164_v48 = vadd.f32 %v431_v30, %v4107_v21  ;;  %v433_v17 = vpop.f32.mrb[11].mxu1  ;;  %v4166_v20 = vadd.f32 %v360_v34, %v127_v28 }
 0x10a   :  { %5685 = vst [vmem:[#allocation13_spill] sm:$0xff] %v4159_v19  ;;  %5686 = vst [vmem:[#allocation14_spill] sm:$0xff] %v4161_v15  ;;  %v4169_v56 = vadd.f32 %v433_v17, %v4115_v24 }
 0x10b   :  { %5687 = vst [vmem:[#allocation15_spill] sm:$0xff] %v4164_v48  ;;  %5688 = vst [vmem:[#allocation16_spill] sm:$0xff] %v4166_v20 }
 0x10c   :  { %5689 = vst [vmem:[#allocation17_spill] sm:$0xff] %v4169_v56 }
 0x10d   :  { %v364_v3 = vpop.f32.mrb[12].mxu0 }
 0x10e   :  { %v437_v16 = vpop.f32.mrb[12].mxu1  ;;  %v4171_v18 = vadd.f32 %v364_v3, %v123_v25  ;;  %v366_v45 = vpop.f32.mrb[13].mxu0 }
 0x10f   :  { %v4174_v9 = vadd.f32 %v437_v16, %v4107_v21  ;;  %v439_v1 = vpop.f32.mrb[13].mxu1  ;;  %v4176_v15 = vadd.f32 %v366_v45, %v127_v28  ;;  %v368_v19 = vpop.f32.mrb[14].mxu0  ;;  %v335_v45 = vadd.f32 %v4109_v22, %v123_v25 }
 0x110   :  { %5690 = vst [vmem:[#allocation18_spill] sm:$0xff] %v4171_v18  ;;  %v4179_v30 = vadd.f32 %v439_v1, %v4115_v24  ;;  %v441_v34 = vpop.f32.mrb[14].mxu1  ;;  %v4181_v20 = vadd.f32 %v368_v19, %v123_v25  ;;  %v370_v17 = vpop.f32.mrb[15].mxu0  ;;  %v337_v1 = vadd.f32 %v336_v26, %v127_v28 }
 0x111   :  { %5691 = vst [vmem:[#allocation19_spill] sm:$0xff] %v4174_v9  ;;  %5692 = vst [vmem:[#allocation20_spill] sm:$0xff] %v4176_v15  ;;  %v4184_v56 = vadd.f32 %v441_v34, %v4107_v21  ;;  %v443_v3 = vpop.f32.mrb[15].mxu1  ;;  %v4186_v18 = vadd.f32 %v370_v17, %v127_v28  ;;  %v408_v15 = vadd.f32 %v4111_v23, %v4107_v21 }
 0x112   :  { %5693 = vst [vmem:[#allocation21_spill] sm:$0xff] %v4179_v30  ;;  %5694 = vst [vmem:[#allocation22_spill] sm:$0xff] %v4181_v20  ;;  %v4189_v16 = vadd.f32 %v443_v3, %v4115_v24  ;;  %v410_v30 = vadd.f32 %v409_v27, %v4115_v24 }
 0x113   :  { %5695 = vst [vmem:[#allocation23_spill] sm:$0xff] %v4184_v56  ;;  %5696 = vst [vmem:[#allocation24_spill] sm:$0xff] %v4186_v18 }
 0x114   :  { %5697 = vst [vmem:[#allocation25_spill] sm:$0xff] %v4189_v16 }
 0x115   :  { %v640_v19 = vpop.f32.mrb[16].mxu0 }
 0x116   :  { %v681_v20 = vpop.f32.mrb[16].mxu1  ;;  %v688_v9 = vadd.f32 %v640_v19, %v335_v45  ;;  %v642_v34 = vpop.f32.mrb[17].mxu0 }
 0x117   :  { %v690_v48 = vadd.f32 %v681_v20, %v408_v15  ;;  %v683_v56 = vpop.f32.mrb[17].mxu1  ;;  %v689_v32 = vadd.f32 %v642_v34, %v337_v1  ;;  %v644_v18 = vpop.f32.mrb[18].mxu0  ;;  %v5698_v1 = vmov 0  }
 0x118   :  { %v691_v17 = vadd.f32 %v683_v56, %v410_v30  ;;  %v685_v29 = vpop.f32.mrb[18].mxu1  ;;  %v645_v3 = vpop.f32.mrb[19].mxu0 }
 0x119   :  { %v686_v16 = vpop.f32.mrb[19].mxu1  ;;  %v4195_v14 = vmax.f32 %v689_v32, %v688_v9  ;;  %3443 = vtanh.f32 %v690_v48 }
 0x11a   :  { %v3102_v22 = vmul.f32 -1.442695, %v691_v17 }
 0x11b   :  { %v701_v21 = vsub.f32 %v688_v9, %v4195_v14  ;;  %v704_v23 = vsub.f32 %v689_v32, %v4195_v14 }
 0x11c   :  { %3445 = vpow2.f32 %v3102_v22 }
 0x11d   :  { %v702_v24 = vmul.f32 1.442695, %v701_v21  ;;  %v705_v25 = vmul.f32 1.442695, %v704_v23 }
 0x11f   :  { %3447 = vpow2.f32 %v702_v24 }
 0x120   :  { %3449 = vpow2.f32 %v705_v25 }
 0x123   :  { %v3444_v15 = vpop.eup %3443 }
 0x126   :  { %v3446_v20 = vpop.eup %3445 }
 0x127   :  { %v696_v30 = vadd.f32 1.0, %v3446_v20 }
 0x129   :  { %v3448_v26 = vpop.eup %3447 }
 0x12a   :  { %v3450_v18 = vpop.eup %3449  ;;  %v708_v27 = vmul.f32 %v3448_v26, %v3444_v15 }
 0x12b   :  { %v707_v28 = vmul.f32 0.0, %v3450_v18 }
 0x12d   :  { %v4199_v29 = vadd.f32 %v708_v27, %v707_v28  ;;  %v4201_v56 = vadd.f32 %v3448_v26, %v707_v28 }
 0x12f   :  { %3451 = vrcp.f32 %v4201_v56 }
 0x130   :  { %3453 = vrcp.f32 %v696_v30 }
 0x139   :  { %v3452_v32 = vpop.eup %3451 }
 0x13a   :  { %v712_v48 = vmul.f32 %v3452_v32, %v4199_v29  ;;  %v3454_v9 = vpop.eup %3453 }
 0x13c   :  { %v4205_v16 = vmul.f32 %v3454_v9, %v712_v48 }
 0x13e   :  { %v715_v45 = vpack.c.bf16 %v4205_v16, %v4205_v16 }
 0x140   :  { %749 = vmatmul.mubr.bf16.vlgmr.msra.gmra.mrb[20].mxu0 %v715_v45  ;;  %790 = vmatmul.mubr.bf16.vlgmr.msra.gmra.mrb[20].mxu1 %v715_v45 }
 0x141   :  { %828 = vmatpush1.bf16.msra.mxu0 %v3853_v38  ;;  %869 = vmatpush1.bf16.msra.mxu1 %v3858_v39 }
 0x142   :  { %829 = vmatprep.subr.bf16.mxu0 %v3865_v40  ;;  %870 = vmatprep.subr.bf16.mxu1 %v3870_v41 }
 0x143   :  { %859 = vmatprep.mubr.bf16.mxu0 %v5698_v1  ;;  %900 = vmatprep.mubr.bf16.mxu1 %v5698_v1 }
 0x145   :  { %830 = vmatpush1.bf16.msra.mxu0 %v3875_v42  ;;  %871 = vmatpush1.bf16.msra.mxu1 %v3880_v43 }
 0x146   :  { %831 = vmatprep.subr.bf16.mxu0 %v3893_v46  ;;  %872 = vmatprep.subr.bf16.mxu1 %v3900_v47 }
 0x149   :  { %832 = vmatpush1.bf16.msra.mxu0 %v3907_v49  ;;  %873 = vmatpush1.bf16.msra.mxu1 %v3912_v50 }
 0x14a   :  { %833 = vmatprep.subr.bf16.mxu0 %v3919_v51  ;;  %874 = vmatprep.subr.bf16.mxu1 %v3926_v52 }
 0x14d   :  { %834 = vmatpush1.bf16.msra.mxu0 %v3931_v53  ;;  %875 = vmatpush1.bf16.msra.mxu1 %v3936_v54 }
 0x14e   :  { %835 = vmatprep.subr.bf16.mxu0 %v3951_v57  ;;  %876 = vmatprep.subr.bf16.mxu1 %v3956_v58 }
 0x151   :  { %836 = vmatpush1.bf16.msra.mxu0 %v3963_v59  ;;  %877 = vmatpush1.bf16.msra.mxu1 %v3968_v60 }
 0x152   :  { %837 = vmatprep.subr.bf16.mxu0 %v3973_v62  ;;  %878 = vmatprep.subr.bf16.mxu1 %v3978_v63 }
 0x155   :  { %838 = vmatpush1.bf16.msra.mxu0 %v3987_v0  ;;  %879 = vmatpush1.bf16.msra.mxu1 %v3992_v2 }
 0x156   :  { %839 = vmatprep.subr.bf16.mxu0 %v4003_v5  ;;  %880 = vmatprep.subr.bf16.mxu1 %v4008_v6 }
 0x159   :  { %840 = vmatpush1.bf16.msra.mxu0 %v4019_v7  ;;  %881 = vmatpush1.bf16.msra.mxu1 %v4024_v8 }
 0x15a   :  { %841 = vmatprep.subr.bf16.mxu0 %v4029_v10  ;;  %882 = vmatprep.subr.bf16.mxu1 %v4034_v11 }
 0x15d   :  { %842 = vmatpush1.bf16.msra.mxu0 %v4043_v12  ;;  %883 = vmatpush1.bf16.msra.mxu1 %v4048_v13 }
 0x15e   :  { %938 = vmatprep.subr.bf16.mxu0 %v3843_v35  ;;  %979 = vmatprep.subr.bf16.mxu1 %v3848_v36 }
 0x213   :  { %v750_v19 = vpop.f32.mrb[20].mxu0  ;;  %v791_v34 = vpop.f32.mrb[20].mxu1 }
 0x214   :  { %v798_v17 = vadd.f32 %v750_v19, %v4121_v31  ;;  %v800_v3 = vadd.f32 %v791_v34, %v4124_v33  ;;  %v752_v22 = vpop.f32.mrb[21].mxu0  ;;  %v793_v21 = vpop.f32.mrb[21].mxu1 }
 0x215   :  { %v799_v23 = vadd.f32 %v752_v22, %v4126_v37  ;;  %v801_v24 = vadd.f32 %v793_v21, %v4129_v44  ;;  %v754_v25 = vpop.f32.mrb[22].mxu0  ;;  %v795_v15 = vpop.f32.mrb[22].mxu1 }
 0x216   :  { %v755_v20 = vpop.f32.mrb[23].mxu0  ;;  %v796_v26 = vpop.f32.mrb[23].mxu1  ;;  %3455 = vtanh.f32 %v800_v3 }
 0x217   :  { %v809_v18 = vadd.f32 %v799_v23, %v4195_v14  ;;  %v3103_v28 = vmul.f32 -1.442695, %v801_v24  ;;  %v1500_v24 = vld [vmem:[%s5663_s0] sm:$0xff] }
 0x218   :  { %v1508_v15 = vadd.f32 %v1500_v24, %v4205_v16 }
 0x219   :  { %v4248_v27 = vmax.f32 %v809_v18, %v798_v17  ;;  %3457 = vpow2.f32 %v3103_v28 }
 0x21b   :  { %v811_v30 = vsub.f32 %v798_v17, %v4248_v27  ;;  %v814_v31 = vsub.f32 %v809_v18, %v4248_v27 }
 0x21d   :  { %v812_v33 = vmul.f32 1.442695, %v811_v30  ;;  %v815_v32 = vmul.f32 1.442695, %v814_v31 }
 0x21f   :  { %3459 = vpow2.f32 %v812_v33 }
 0x220   :  { %3461 = vpow2.f32 %v815_v32  ;;  %v3456_v37 = vpop.eup %3455 }
 0x223   :  { %v3458_v44 = vpop.eup %3457 }
 0x224   :  { %v806_v17 = vadd.f32 1.0, %v3458_v44 }
 0x229   :  { %v3460_v48 = vpop.eup %3459 }
 0x22a   :  { %v3462_v9 = vpop.eup %3461  ;;  %v818_v45 = vmul.f32 %v3460_v48, %v3456_v37  ;;  %v5699_v37 = vld [vmem:[#allocation5_spill] sm:$0xff] }
 0x22b   :  { %v820_v14 = vmul.f32 %v3462_v9, %v4201_v56  ;;  %v817_v19 = vmul.f32 %v3462_v9, %v4199_v29  ;;  %v1501_v29 = vld [vmem:[%s5663_s0 + $0x8] sm:$0xff] }
 0x22d   :  { %v4254_v34 = vadd.f32 %v3460_v48, %v820_v14  ;;  %v4256_v22 = vadd.f32 %v818_v45, %v817_v19 }
 0x22f   :  { %3463 = vrcp.f32 %v4254_v34 }
 0x230   :  { %3465 = vrcp.f32 %v806_v17 }
 0x239   :  { %v3464_v3 = vpop.eup %3463 }
 0x23a   :  { %v823_v21 = vmul.f32 %v3464_v3, %v4256_v22  ;;  %v3466_v23 = vpop.eup %3465 }
 0x23c   :  { %v824_v56 = vmul.f32 %v3466_v23, %v823_v21 }
 0x23e   :  { %v826_v25 = vpack.c.bf16 %v824_v56, %v824_v56  ;;  %v1509_v20 = vadd.f32 %v1501_v29, %v824_v56 }
 0x240   :  { %860 = vmatmul.mubr.bf16.vlgmr.msra.gmra.mrb[24].mxu0 %v826_v25  ;;  %901 = vmatmul.mubr.bf16.vlgmr.msra.gmra.mrb[24].mxu1 %v826_v25  ;;  %v4267_v26 = vpack.c.bf16 %v1509_v20, %v1508_v15 }
 0x241   :  { %939 = vmatpush1.bf16.msra.mxu0 %v3853_v38  ;;  %980 = vmatpush1.bf16.msra.mxu1 %v3858_v39 }
 0x242   :  { %940 = vmatprep.subr.bf16.mxu0 %v3865_v40  ;;  %981 = vmatprep.subr.bf16.mxu1 %v3870_v41 }
 0x243   :  { %970 = vmatprep.mubr.bf16.mxu0 %v5698_v1  ;;  %1011 = vmatprep.mubr.bf16.mxu1 %v5698_v1 }
 0x245   :  { %941 = vmatpush1.bf16.msra.mxu0 %v3875_v42  ;;  %982 = vmatpush1.bf16.msra.mxu1 %v3880_v43 }
 0x246   :  { %942 = vmatprep.subr.bf16.mxu0 %v3893_v46  ;;  %983 = vmatprep.subr.bf16.mxu1 %v3900_v47 }
 0x249   :  { %943 = vmatpush1.bf16.msra.mxu0 %v3907_v49  ;;  %984 = vmatpush1.bf16.msra.mxu1 %v3912_v50 }
 0x24a   :  { %944 = vmatprep.subr.bf16.mxu0 %v3919_v51  ;;  %985 = vmatprep.subr.bf16.mxu1 %v3926_v52 }
 0x24d   :  { %945 = vmatpush1.bf16.msra.mxu0 %v3931_v53  ;;  %986 = vmatpush1.bf16.msra.mxu1 %v3936_v54 }
 0x24e   :  { %946 = vmatprep.subr.bf16.mxu0 %v3951_v57  ;;  %987 = vmatprep.subr.bf16.mxu1 %v3956_v58 }
 0x251   :  { %947 = vmatpush1.bf16.msra.mxu0 %v3963_v59  ;;  %988 = vmatpush1.bf16.msra.mxu1 %v3968_v60 }
 0x252   :  { %948 = vmatprep.subr.bf16.mxu0 %v3973_v62  ;;  %989 = vmatprep.subr.bf16.mxu1 %v3978_v63 }
 0x255   :  { %949 = vmatpush1.bf16.msra.mxu0 %v3987_v0  ;;  %990 = vmatpush1.bf16.msra.mxu1 %v3992_v2 }
 0x256   :  { %950 = vmatprep.subr.bf16.mxu0 %v4003_v5  ;;  %991 = vmatprep.subr.bf16.mxu1 %v4008_v6 }
 0x259   :  { %951 = vmatpush1.bf16.msra.mxu0 %v4019_v7  ;;  %992 = vmatpush1.bf16.msra.mxu1 %v4024_v8 }
 0x25a   :  { %952 = vmatprep.subr.bf16.mxu0 %v4029_v10  ;;  %993 = vmatprep.subr.bf16.mxu1 %v4034_v11 }
 0x25d   :  { %953 = vmatpush1.bf16.msra.mxu0 %v4043_v12  ;;  %994 = vmatpush1.bf16.msra.mxu1 %v4048_v13 }
 0x25e   :  { %1049 = vmatprep.subr.bf16.mxu0 %v3843_v35  ;;  %1090 = vmatprep.subr.bf16.mxu1 %v3848_v36 }
 0x313   :  { %v861_v16 = vpop.f32.mrb[24].mxu0  ;;  %v902_v18 = vpop.f32.mrb[24].mxu1 }
 0x314   :  { %v909_v28 = vadd.f32 %v861_v16, %v4131_v55  ;;  %v911_v30 = vadd.f32 %v902_v18, %v4134_v61  ;;  %v863_v31 = vpop.f32.mrb[25].mxu0  ;;  %v904_v33 = vpop.f32.mrb[25].mxu1 }
 0x315   :  { %v910_v32 = vadd.f32 %v863_v31, %v4136_v4  ;;  %v912_v44 = vadd.f32 %v904_v33, %v5699_v37  ;;  %v865_v48 = vpop.f32.mrb[26].mxu0  ;;  %v906_v9 = vpop.f32.mrb[26].mxu1 }
 0x316   :  { %v866_v45 = vpop.f32.mrb[27].mxu0  ;;  %v907_v14 = vpop.f32.mrb[27].mxu1  ;;  %3467 = vtanh.f32 %v911_v30 }
 0x317   :  { %v920_v35 = vadd.f32 %v910_v32, %v4248_v27  ;;  %v3104_v36 = vmul.f32 -1.442695, %v912_v44 }
 0x319   :  { %v4308_v19 = vmax.f32 %v920_v35, %v909_v28  ;;  %3469 = vpow2.f32 %v3104_v36 }
 0x31b   :  { %v922_v17 = vsub.f32 %v909_v28, %v4308_v19  ;;  %v925_v55 = vsub.f32 %v920_v35, %v4308_v19 }
 0x31d   :  { %v923_v61 = vmul.f32 1.442695, %v922_v17  ;;  %v926_v3 = vmul.f32 1.442695, %v925_v55 }
 0x31f   :  { %3471 = vpow2.f32 %v923_v61 }
 0x320   :  { %3473 = vpow2.f32 %v926_v3  ;;  %v3468_v4 = vpop.eup %3467 }
 0x323   :  { %v3470_v21 = vpop.eup %3469 }
 0x324   :  { %v917_v15 = vadd.f32 1.0, %v3470_v21  ;;  %v1502_v21 = vld [vmem:[%s5663_s0 + $0x10] sm:$0xff] }
 0x329   :  { %v3472_v23 = vpop.eup %3471 }
 0x32a   :  { %v3474_v24 = vpop.eup %3473  ;;  %v929_v29 = vmul.f32 %v3472_v23, %v3468_v4 }
 0x32b   :  { %v931_v27 = vmul.f32 %v3474_v24, %v4254_v34  ;;  %v928_v56 = vmul.f32 %v3474_v24, %v4256_v22 }
 0x32d   :  { %v4314_v25 = vadd.f32 %v3472_v23, %v931_v27  ;;  %v4316_v20 = vadd.f32 %v929_v29, %v928_v56  ;;  %v1503_v23 = vld [vmem:[%s5663_s0 + $0x18] sm:$0xff] }
 0x32f   :  { %3475 = vrcp.f32 %v4314_v25 }
 0x330   :  { %3477 = vrcp.f32 %v917_v15  ;;  %v4397_v15 = vld [vmem:[%s5662_s2] ss:$16 sps:$4 sm:$0xff]  }
 0x339   :  { %v3476_v16 = vpop.eup %3475 }
 0x33a   :  { %v934_v18 = vmul.f32 %v3476_v16, %v4316_v20  ;;  %v3478_v28 = vpop.eup %3477  ;;  %v4409_v16 = vld [vmem:[%s5662_s2 + $0x24] ss:$16 sps:$4 sm:$0xff]  }
 0x33c   :  { %v4320_v30 = vmul.f32 %v3478_v28, %v934_v18  ;;  %v4415_v18 = vld [vmem:[%s5662_s2 + $0x2c] ss:$16 sps:$4 sm:$0xff]   ;;  %v4423_v28 = vld [vmem:[%s5662_s2 + $0x20] ss:$16 sps:$4 sm:$0xff]  }
 0x33e   :  { %v937_v31 = vpack.c.bf16 %v4320_v30, %v4320_v30  ;;  %v1510_v27 = vadd.f32 %v1502_v21, %v4320_v30  ;;  %v4429_v30 = vld [vmem:[%s5662_s2 + $0x28] ss:$16 sps:$4 sm:$0xff]  }
 0x340   :  { %971 = vmatmul.mubr.bf16.vlgmr.msra.gmra.mrb[28].mxu0 %v937_v31  ;;  %1012 = vmatmul.mubr.bf16.vlgmr.msra.gmra.mrb[28].mxu1 %v937_v31  ;;  %v4435_v31 = vld [vmem:[%s5662_s2 + $0x44] ss:$16 sps:$4 sm:$0xff]  }
 0x341   :  { %1050 = vmatpush1.bf16.msra.mxu0 %v3853_v38  ;;  %1091 = vmatpush1.bf16.msra.mxu1 %v3858_v39  ;;  %v4359_v38 = vld [vmem:[%s5662_s2 + $0x4] ss:$16 sps:$4 sm:$0xff]   ;;  %v4365_v39 = vld [vmem:[%s5662_s2 + $0xc] ss:$16 sps:$4 sm:$0xff]  }
 0x342   :  { %1051 = vmatprep.subr.bf16.mxu0 %v3865_v40  ;;  %1092 = vmatprep.subr.bf16.mxu1 %v3870_v41 }
 0x343   :  { %1081 = vmatprep.mubr.bf16.mxu0 %v5698_v1  ;;  %1122 = vmatprep.mubr.bf16.mxu1 %v5698_v1 }
 0x345   :  { %1052 = vmatpush1.bf16.msra.mxu0 %v3875_v42  ;;  %1093 = vmatpush1.bf16.msra.mxu1 %v3880_v43  ;;  %v5700_v42 = vld [vmem:[#allocation6_spill] sm:$0xff] }
 0x346   :  { %1053 = vmatprep.subr.bf16.mxu0 %v3893_v46  ;;  %1094 = vmatprep.subr.bf16.mxu1 %v3900_v47  ;;  %v5701_v46 = vld [vmem:[#allocation7_spill] sm:$0xff] }
 0x349   :  { %1054 = vmatpush1.bf16.msra.mxu0 %v3907_v49  ;;  %1095 = vmatpush1.bf16.msra.mxu1 %v3912_v50 }
 0x34a   :  { %1055 = vmatprep.subr.bf16.mxu0 %v3919_v51  ;;  %1096 = vmatprep.subr.bf16.mxu1 %v3926_v52  ;;  %v5702_v51 = vld [vmem:[#allocation8_spill] sm:$0xff] }
 0x34d   :  { %1056 = vmatpush1.bf16.msra.mxu0 %v3931_v53  ;;  %1097 = vmatpush1.bf16.msra.mxu1 %v3936_v54  ;;  %v5703_v53 = vld [vmem:[#allocation9_spill] sm:$0xff] }
 0x34e   :  { %1057 = vmatprep.subr.bf16.mxu0 %v3951_v57  ;;  %1098 = vmatprep.subr.bf16.mxu1 %v3956_v58 }
 0x351   :  { %1058 = vmatpush1.bf16.msra.mxu0 %v3963_v59  ;;  %1099 = vmatpush1.bf16.msra.mxu1 %v3968_v60 }
 0x352   :  { %1059 = vmatprep.subr.bf16.mxu0 %v3973_v62  ;;  %1100 = vmatprep.subr.bf16.mxu1 %v3978_v63 }
 0x355   :  { %1060 = vmatpush1.bf16.msra.mxu0 %v3987_v0  ;;  %1101 = vmatpush1.bf16.msra.mxu1 %v3992_v2 }
 0x356   :  { %1061 = vmatprep.subr.bf16.mxu0 %v4003_v5  ;;  %1102 = vmatprep.subr.bf16.mxu1 %v4008_v6 }
 0x359   :  { %1062 = vmatpush1.bf16.msra.mxu0 %v4019_v7  ;;  %1103 = vmatpush1.bf16.msra.mxu1 %v4024_v8 }
 0x35a   :  { %1063 = vmatprep.subr.bf16.mxu0 %v4029_v10  ;;  %1104 = vmatprep.subr.bf16.mxu1 %v4034_v11 }
 0x35d   :  { %1064 = vmatpush1.bf16.msra.mxu0 %v4043_v12  ;;  %1105 = vmatpush1.bf16.msra.mxu1 %v4048_v13 }
 0x35e   :  { %1160 = vmatprep.subr.bf16.mxu0 %v4359_v38  ;;  %1201 = vmatprep.subr.bf16.mxu1 %v4365_v39 }
 0x413   :  { %v972_v40 = vpop.f32.mrb[28].mxu0  ;;  %v1013_v41 = vpop.f32.mrb[28].mxu1 }
 0x414   :  { %v1020_v43 = vadd.f32 %v972_v40, %v5700_v42  ;;  %v1022_v47 = vadd.f32 %v1013_v41, %v5701_v46  ;;  %v974_v49 = vpop.f32.mrb[29].mxu0  ;;  %v1015_v50 = vpop.f32.mrb[29].mxu1  ;;  %v4441_v40 = vld [vmem:[%s5662_s2 + $0x4c] ss:$16 sps:$4 sm:$0xff]   ;;  %v4447_v41 = vld [vmem:[%s5662_s2 + $0x40] ss:$16 sps:$4 sm:$0xff]  }
 0x415   :  { %v1021_v52 = vadd.f32 %v974_v49, %v5702_v51  ;;  %v1023_v54 = vadd.f32 %v1015_v50, %v5703_v53  ;;  %v976_v57 = vpop.f32.mrb[30].mxu0  ;;  %v1017_v58 = vpop.f32.mrb[30].mxu1  ;;  %v4453_v42 = vld [vmem:[%s5662_s2 + $0x48] ss:$16 sps:$4 sm:$0xff]   ;;  %v4465_v46 = vld [vmem:[%s5662_s2 + $0x6c] ss:$16 sps:$4 sm:$0xff]  }
 0x416   :  { %v977_v59 = vpop.f32.mrb[31].mxu0  ;;  %v1018_v60 = vpop.f32.mrb[31].mxu1  ;;  %3479 = vtanh.f32 %v1022_v47  ;;  %v4471_v47 = vld [vmem:[%s5662_s2 + $0x60] ss:$16 sps:$4 sm:$0xff]   ;;  %v4477_v49 = vld [vmem:[%s5662_s2 + $0x68] ss:$16 sps:$4 sm:$0xff]  }
 0x417   :  { %v1031_v62 = vadd.f32 %v1021_v52, %v4308_v19  ;;  %v3105_v34 = vmul.f32 -1.442695, %v1023_v54  ;;  %v4483_v50 = vld [vmem:[%s5662_s2 + $0x84] ss:$16 sps:$4 sm:$0xff]   ;;  %v4489_v51 = vld [vmem:[%s5662_s2 + $0x8c] ss:$16 sps:$4 sm:$0xff]  }
 0x418   :  { %v4495_v52 = vld [vmem:[%s5662_s2 + $0x80] ss:$16 sps:$4 sm:$0xff]   ;;  %v4501_v53 = vld [vmem:[%s5662_s2 + $0x88] ss:$16 sps:$4 sm:$0xff]   ;;  %v4507_v54 = vld [vmem:[%s5662_s2 + $0xa4] ss:$16 sps:$4 sm:$0xff]  }
 0x419   :  { %v4373_v63 = vmax.f32 %v1031_v62, %v1020_v43  ;;  %3481 = vpow2.f32 %v3105_v34  ;;  %v4513_v57 = vld [vmem:[%s5662_s2 + $0xac] ss:$16 sps:$4 sm:$0xff]   ;;  %v5706_v60 = vld [vmem:[#allocation12_spill] sm:$0xff] }
 0x41a   :  { %v5705_v58 = vld [vmem:[#allocation11_spill] sm:$0xff] }
 0x41b   :  { %v1033_v22 = vsub.f32 %v1020_v43, %v4373_v63  ;;  %v1036_v33 = vsub.f32 %v1031_v62, %v4373_v63  ;;  %v4459_v43 = vld [vmem:[%s5662_s2 + $0x64] ss:$16 sps:$4 sm:$0xff]   ;;  %v5707_v62 = vld [vmem:[#allocation13_spill] sm:$0xff] }
 0x41d   :  { %v1034_v32 = vmul.f32 1.442695, %v1033_v22  ;;  %v1037_v37 = vmul.f32 1.442695, %v1036_v33 }
 0x41f   :  { %3483 = vpow2.f32 %v1034_v32 }
 0x420   :  { %3485 = vpow2.f32 %v1037_v37  ;;  %v3480_v44 = vpop.eup %3479 }
 0x423   :  { %v3482_v48 = vpop.eup %3481 }
 0x424   :  { %v1028_v17 = vadd.f32 1.0, %v3482_v48 }
 0x429   :  { %v3484_v9 = vpop.eup %3483 }
 0x42a   :  { %v3486_v45 = vpop.eup %3485  ;;  %v1040_v14 = vmul.f32 %v3484_v9, %v3480_v44 }
 0x42b   :  { %v1042_v35 = vmul.f32 %v3486_v45, %v4314_v25  ;;  %v1039_v19 = vmul.f32 %v3486_v45, %v4316_v20  ;;  %v4403_v20 = vld [vmem:[%s5662_s2 + $0x8] ss:$16 sps:$4 sm:$0xff]  }
 0x42d   :  { %v4379_v36 = vadd.f32 %v3484_v9, %v1042_v35  ;;  %v4381_v55 = vadd.f32 %v1040_v14, %v1039_v19 }
 0x42f   :  { %3487 = vrcp.f32 %v4379_v36 }
 0x430   :  { %3489 = vrcp.f32 %v1028_v17 }
 0x439   :  { %v3488_v61 = vpop.eup %3487 }
 0x43a   :  { %v1045_v3 = vmul.f32 %v3488_v61, %v4381_v55  ;;  %v3490_v4 = vpop.eup %3489 }
 0x43c   :  { %v1046_v24 = vmul.f32 %v3490_v4, %v1045_v3 }
 0x43e   :  { %v1048_v29 = vpack.c.bf16 %v1046_v24, %v1046_v24  ;;  %v1511_v56 = vadd.f32 %v1503_v23, %v1046_v24 }
 0x440   :  { %1082 = vmatmul.mubr.bf16.vlgmr.msra.gmra.mrb[32].mxu0 %v1048_v29  ;;  %1123 = vmatmul.mubr.bf16.vlgmr.msra.gmra.mrb[32].mxu1 %v1048_v29  ;;  %v4392_v25 = vpack.c.bf16 %v1511_v56, %v1510_v27 }
 0x441   :  { %1161 = vmatpush1.bf16.msra.mxu0 %v4397_v15  ;;  %1202 = vmatpush1.bf16.msra.mxu1 %v4403_v20 }
 0x442   :  { %1162 = vmatprep.subr.bf16.mxu0 %v4409_v16  ;;  %1203 = vmatprep.subr.bf16.mxu1 %v4415_v18 }
 0x443   :  { %1192 = vmatprep.mubr.bf16.mxu0 %v5698_v1  ;;  %1233 = vmatprep.mubr.bf16.mxu1 %v5698_v1 }
 0x445   :  { %1163 = vmatpush1.bf16.msra.mxu0 %v4423_v28  ;;  %1204 = vmatpush1.bf16.msra.mxu1 %v4429_v30 }
 0x446   :  { %1164 = vmatprep.subr.bf16.mxu0 %v4435_v31  ;;  %1205 = vmatprep.subr.bf16.mxu1 %v4441_v40 }
 0x449   :  { %1165 = vmatpush1.bf16.msra.mxu0 %v4447_v41  ;;  %1206 = vmatpush1.bf16.msra.mxu1 %v4453_v42 }
 0x44a   :  { %1166 = vmatprep.subr.bf16.mxu0 %v4459_v43  ;;  %1207 = vmatprep.subr.bf16.mxu1 %v4465_v46 }
 0x44d   :  { %1167 = vmatpush1.bf16.msra.mxu0 %v4471_v47  ;;  %1208 = vmatpush1.bf16.msra.mxu1 %v4477_v49 }
 0x44e   :  { %1168 = vmatprep.subr.bf16.mxu0 %v4483_v50  ;;  %1209 = vmatprep.subr.bf16.mxu1 %v4489_v51 }
 0x451   :  { %1169 = vmatpush1.bf16.msra.mxu0 %v4495_v52  ;;  %1210 = vmatpush1.bf16.msra.mxu1 %v4501_v53 }
 0x452   :  { %1170 = vmatprep.subr.bf16.mxu0 %v4507_v54  ;;  %1211 = vmatprep.subr.bf16.mxu1 %v4513_v57 }
 0x455   :  { %1171 = vmatpush1.bf16.msra.mxu0 %v3987_v0  ;;  %1212 = vmatpush1.bf16.msra.mxu1 %v3992_v2 }
 0x456   :  { %1172 = vmatprep.subr.bf16.mxu0 %v4003_v5  ;;  %1213 = vmatprep.subr.bf16.mxu1 %v4008_v6  ;;  %v5704_v5 = vld [vmem:[#allocation10_spill] sm:$0xff] }
 0x459   :  { %1173 = vmatpush1.bf16.msra.mxu0 %v4019_v7  ;;  %1214 = vmatpush1.bf16.msra.mxu1 %v4024_v8 }
 0x45a   :  { %1174 = vmatprep.subr.bf16.mxu0 %v4029_v10  ;;  %1215 = vmatprep.subr.bf16.mxu1 %v4034_v11 }
 0x45d   :  { %1175 = vmatpush1.bf16.msra.mxu0 %v4043_v12  ;;  %1216 = vmatpush1.bf16.msra.mxu1 %v4048_v13 }
 0x45e   :  { %1271 = vmatprep.subr.bf16.mxu0 %v4359_v38  ;;  %1312 = vmatprep.subr.bf16.mxu1 %v4365_v39 }
 0x513   :  { %v1083_v0 = vpop.f32.mrb[32].mxu0  ;;  %v1124_v2 = vpop.f32.mrb[32].mxu1 }
 0x514   :  { %v1131_v6 = vadd.f32 %v1083_v0, %v5704_v5  ;;  %v1133_v7 = vadd.f32 %v1124_v2, %v5705_v58  ;;  %v1085_v59 = vpop.f32.mrb[33].mxu0  ;;  %v1126_v8 = vpop.f32.mrb[33].mxu1  ;;  %v4586_v2 = vld [vmem:[%s5662_s2 + $0xc4] ss:$16 sps:$4 sm:$0xff]   ;;  %v4592_v5 = vld [vmem:[%s5662_s2 + $0xcc] ss:$16 sps:$4 sm:$0xff]  }
 0x515   :  { %v1132_v10 = vadd.f32 %v1085_v59, %v5706_v60  ;;  %v1134_v11 = vadd.f32 %v1126_v8, %v5707_v62  ;;  %v1087_v34 = vpop.f32.mrb[34].mxu0  ;;  %v1128_v12 = vpop.f32.mrb[34].mxu1  ;;  %v4604_v58 = vld [vmem:[%s5662_s2 + $0xc8] ss:$16 sps:$4 sm:$0xff]   ;;  %v4616_v59 = vld [vmem:[%s5662_s2 + $0xec] ss:$16 sps:$4 sm:$0xff]  }
 0x516   :  { %v1088_v22 = vpop.f32.mrb[35].mxu0  ;;  %v1129_v13 = vpop.f32.mrb[35].mxu1  ;;  %3491 = vtanh.f32 %v1133_v7  ;;  %v4610_v7 = vld [vmem:[%s5662_s2 + $0xe4] ss:$16 sps:$4 sm:$0xff]   ;;  %v4622_v8 = vld [vmem:[%s5662_s2 + $0xe0] ss:$16 sps:$4 sm:$0xff]  }
 0x517   :  { %v1142_v33 = vadd.f32 %v1132_v10, %v4373_v63  ;;  %v3106_v37 = vmul.f32 -1.442695, %v1134_v11  ;;  %v4628_v60 = vld [vmem:[%s5662_s2 + $0xe8] ss:$16 sps:$4 sm:$0xff]  }
 0x518   :  { %v5708_v11 = vld [vmem:[#allocation14_spill] sm:$0xff]  ;;  %v5709_v12 = vld [vmem:[#allocation15_spill] sm:$0xff] }
 0x519   :  { %v4533_v32 = vmax.f32 %v1142_v33, %v1131_v6  ;;  %3493 = vpow2.f32 %v3106_v37  ;;  %v5710_v37 = vld [vmem:[#allocation16_spill] sm:$0xff] }
 0x51b   :  { %v1144_v44 = vsub.f32 %v1131_v6, %v4533_v32  ;;  %v1147_v48 = vsub.f32 %v1142_v33, %v4533_v32  ;;  %v4598_v6 = vld [vmem:[%s5662_s2 + $0xc0] ss:$16 sps:$4 sm:$0xff]  }
 0x51d   :  { %v1145_v9 = vmul.f32 1.442695, %v1144_v44  ;;  %v1148_v45 = vmul.f32 1.442695, %v1147_v48  ;;  %v5711_v48 = vld [vmem:[#allocation17_spill] sm:$0xff] }
 0x51f   :  { %3495 = vpow2.f32 %v1145_v9 }
 0x520   :  { %3497 = vpow2.f32 %v1148_v45  ;;  %v3492_v14 = vpop.eup %3491 }
 0x523   :  { %v3494_v35 = vpop.eup %3493 }
 0x524   :  { %v1139_v21 = vadd.f32 1.0, %v3494_v35 }
 0x529   :  { %v3496_v19 = vpop.eup %3495 }
 0x52a   :  { %v3498_v17 = vpop.eup %3497  ;;  %v1151_v61 = vmul.f32 %v3496_v19, %v3492_v14 }
 0x52b   :  { %v1153_v63 = vmul.f32 %v3498_v17, %v4379_v36  ;;  %v1150_v3 = vmul.f32 %v3498_v17, %v4381_v55  ;;  %v4574_v36 = vld [vmem:[%s5662_s2 + $0xa0] ss:$16 sps:$4 sm:$0xff]   ;;  %v4580_v55 = vld [vmem:[%s5662_s2 + $0xa8] ss:$16 sps:$4 sm:$0xff]  }
 0x52d   :  { %v4539_v4 = vadd.f32 %v3496_v19, %v1153_v63  ;;  %v4541_v23 = vadd.f32 %v1151_v61, %v1150_v3 }
 0x52f   :  { %3499 = vrcp.f32 %v4539_v4 }
 0x530   :  { %3501 = vrcp.f32 %v1139_v21 }
 0x539   :  { %v3500_v24 = vpop.eup %3499 }
 0x53a   :  { %v1156_v29 = vmul.f32 %v3500_v24, %v4541_v23  ;;  %v3502_v27 = vpop.eup %3501 }
 0x53c   :  { %v4545_v56 = vmul.f32 %v3502_v27, %v1156_v29 }
 0x53e   :  { %v1159_v0 = vpack.c.bf16 %v4545_v56, %v4545_v56 }
 0x540   :  { %1193 = vmatmul.mubr.bf16.vlgmr.msra.gmra.mrb[36].mxu0 %v1159_v0  ;;  %1234 = vmatmul.mubr.bf16.vlgmr.msra.gmra.mrb[36].mxu1 %v1159_v0 }
 0x541   :  { %1272 = vmatpush1.bf16.msra.mxu0 %v4397_v15  ;;  %1313 = vmatpush1.bf16.msra.mxu1 %v4403_v20 }
 0x542   :  { %1273 = vmatprep.subr.bf16.mxu0 %v4409_v16  ;;  %1314 = vmatprep.subr.bf16.mxu1 %v4415_v18 }
 0x543   :  { %1303 = vmatprep.mubr.bf16.mxu0 %v5698_v1  ;;  %1344 = vmatprep.mubr.bf16.mxu1 %v5698_v1 }
 0x545   :  { %1274 = vmatpush1.bf16.msra.mxu0 %v4423_v28  ;;  %1315 = vmatpush1.bf16.msra.mxu1 %v4429_v30 }
 0x546   :  { %1275 = vmatprep.subr.bf16.mxu0 %v4435_v31  ;;  %1316 = vmatprep.subr.bf16.mxu1 %v4441_v40 }
 0x549   :  { %1276 = vmatpush1.bf16.msra.mxu0 %v4447_v41  ;;  %1317 = vmatpush1.bf16.msra.mxu1 %v4453_v42 }
 0x54a   :  { %1277 = vmatprep.subr.bf16.mxu0 %v4459_v43  ;;  %1318 = vmatprep.subr.bf16.mxu1 %v4465_v46 }
 0x54d   :  { %1278 = vmatpush1.bf16.msra.mxu0 %v4471_v47  ;;  %1319 = vmatpush1.bf16.msra.mxu1 %v4477_v49 }
 0x54e   :  { %1279 = vmatprep.subr.bf16.mxu0 %v4483_v50  ;;  %1320 = vmatprep.subr.bf16.mxu1 %v4489_v51 }
 0x551   :  { %1280 = vmatpush1.bf16.msra.mxu0 %v4495_v52  ;;  %1321 = vmatpush1.bf16.msra.mxu1 %v4501_v53 }
 0x552   :  { %1281 = vmatprep.subr.bf16.mxu0 %v4507_v54  ;;  %1322 = vmatprep.subr.bf16.mxu1 %v4513_v57 }
 0x555   :  { %1282 = vmatpush1.bf16.msra.mxu0 %v4574_v36  ;;  %1323 = vmatpush1.bf16.msra.mxu1 %v4580_v55 }
 0x556   :  { %1283 = vmatprep.subr.bf16.mxu0 %v4586_v2  ;;  %1324 = vmatprep.subr.bf16.mxu1 %v4592_v5 }
 0x559   :  { %1284 = vmatpush1.bf16.msra.mxu0 %v4598_v6  ;;  %1325 = vmatpush1.bf16.msra.mxu1 %v4604_v58 }
 0x55a   :  { %1285 = vmatprep.subr.bf16.mxu0 %v4610_v7  ;;  %1326 = vmatprep.subr.bf16.mxu1 %v4616_v59 }
 0x55d   :  { %1286 = vmatpush1.bf16.msra.mxu0 %v4622_v8  ;;  %1327 = vmatpush1.bf16.msra.mxu1 %v4628_v60 }
 0x55e   :  { %1382 = vmatprep.subr.bf16.mxu0 %v4359_v38  ;;  %1423 = vmatprep.subr.bf16.mxu1 %v4365_v39 }
 0x613   :  { %v1194_v10 = vpop.f32.mrb[36].mxu0  ;;  %v1235_v62 = vpop.f32.mrb[36].mxu1 }
 0x614   :  { %v1242_v34 = vadd.f32 %v1194_v10, %v5708_v11  ;;  %v1244_v22 = vadd.f32 %v1235_v62, %v5709_v12  ;;  %v1196_v13 = vpop.f32.mrb[37].mxu0  ;;  %v1237_v33 = vpop.f32.mrb[37].mxu1 }
 0x615   :  { %v1243_v44 = vadd.f32 %v1196_v13, %v5710_v37  ;;  %v1245_v9 = vadd.f32 %v1237_v33, %v5711_v48  ;;  %v1198_v45 = vpop.f32.mrb[38].mxu0  ;;  %v1239_v14 = vpop.f32.mrb[38].mxu1  ;;  %v1504_v37 = vld [vmem:[%s5663_s0 + $0x20] sm:$0xff] }
 0x616   :  { %v1199_v35 = vpop.f32.mrb[39].mxu0  ;;  %v1240_v19 = vpop.f32.mrb[39].mxu1  ;;  %3503 = vtanh.f32 %v1244_v22  ;;  %v1512_v48 = vadd.f32 %v1504_v37, %v4545_v56  ;;  %v3373_v37 = vld [vmem:[%s5661_s1 + $0x184] ss:$16 sps:$4 sm:$0xff]  }
 0x617   :  { %v1253_v38 = vadd.f32 %v1243_v44, %v4533_v32  ;;  %v3107_v39 = vmul.f32 -1.442695, %v1245_v9 }
 0x619   :  { %v4638_v17 = vmax.f32 %v1253_v38, %v1242_v34  ;;  %3505 = vpow2.f32 %v3107_v39 }
 0x61b   :  { %v1255_v61 = vsub.f32 %v1242_v34, %v4638_v17  ;;  %v1258_v63 = vsub.f32 %v1253_v38, %v4638_v17 }
 0x61d   :  { %v1256_v3 = vmul.f32 1.442695, %v1255_v61  ;;  %v1259_v21 = vmul.f32 1.442695, %v1258_v63 }
 0x61f   :  { %3507 = vpow2.f32 %v1256_v3  ;;  %v3347_v3 = vld [vmem:[%s5661_s1 + $0x100] ss:$16 sps:$4 sm:$0xff]  }
 0x620   :  { %3509 = vpow2.f32 %v1259_v21  ;;  %v3504_v24 = vpop.eup %3503  ;;  %v3350_v21 = vld [vmem:[%s5661_s1 + $0x108] ss:$16 sps:$4 sm:$0xff]  }
 0x623   :  { %v3506_v29 = vpop.eup %3505 }
 0x624   :  { %v1250_v34 = vadd.f32 1.0, %v3506_v29  ;;  %v3355_v29 = vld [vmem:[%s5661_s1 + $0x124] ss:$16 sps:$4 sm:$0xff]  }
 0x629   :  { %v3508_v27 = vpop.eup %3507 }
 0x62a   :  { %v3510_v0 = vpop.eup %3509  ;;  %v1262_v10 = vmul.f32 %v3508_v27, %v3504_v24 }
 0x62b   :  { %v1264_v32 = vmul.f32 %v3510_v0, %v4539_v4  ;;  %v1261_v62 = vmul.f32 %v3510_v0, %v4541_v23  ;;  %v1505_v4 = vld [vmem:[%s5663_s0 + $0x28] sm:$0xff]  ;;  %v3353_v0 = vld [vmem:[%s5661_s1 + $0x120] ss:$16 sps:$4 sm:$0xff]  }
 0x62d   :  { %v4644_v11 = vadd.f32 %v3508_v27, %v1264_v32  ;;  %v4646_v12 = vadd.f32 %v1262_v10, %v1261_v62  ;;  %v3358_v27 = vld [vmem:[%s5661_s1 + $0x12c] ss:$16 sps:$4 sm:$0xff]   ;;  %v3356_v10 = vld [vmem:[%s5661_s1 + $0x128] ss:$16 sps:$4 sm:$0xff]   ;;  %v3361_v32 = vld [vmem:[%s5661_s1 + $0x144] ss:$16 sps:$4 sm:$0xff]  }
 0x62e   :  { %v3364_v62 = vld [vmem:[%s5661_s1 + $0x14c] ss:$16 sps:$4 sm:$0xff]  }
 0x62f   :  { %3511 = vrcp.f32 %v4644_v11 }
 0x630   :  { %3513 = vrcp.f32 %v1250_v34  ;;  %v3362_v34 = vld [vmem:[%s5661_s1 + $0x148] ss:$16 sps:$4 sm:$0xff]  }
 0x639   :  { %v3512_v22 = vpop.eup %3511 }
 0x63a   :  { %v1267_v13 = vmul.f32 %v3512_v22, %v4646_v12  ;;  %v3514_v33 = vpop.eup %3513  ;;  %v3370_v22 = vld [vmem:[%s5661_s1 + $0x16c] ss:$16 sps:$4 sm:$0xff]  }
 0x63c   :  { %v1268_v23 = vmul.f32 %v3514_v33, %v1267_v13  ;;  %v3365_v13 = vld [vmem:[%s5661_s1 + $0x160] ss:$16 sps:$4 sm:$0xff]   ;;  %v3368_v33 = vld [vmem:[%s5661_s1 + $0x168] ss:$16 sps:$4 sm:$0xff]  }
 0x63e   :  { %v1270_v44 = vpack.c.bf16 %v1268_v23, %v1268_v23  ;;  %v1513_v9 = vadd.f32 %v1505_v4, %v1268_v23  ;;  %v3376_v4 = vld [vmem:[%s5661_s1 + $0x18c] ss:$16 sps:$4 sm:$0xff]   ;;  %v3371_v23 = vld [vmem:[%s5661_s1 + $0x180] ss:$16 sps:$4 sm:$0xff]  }
 0x640   :  { %1304 = vmatmul.mubr.bf16.vlgmr.msra.gmra.mrb[40].mxu0 %v1270_v44  ;;  %1345 = vmatmul.mubr.bf16.vlgmr.msra.gmra.mrb[40].mxu1 %v1270_v44  ;;  %v4657_v45 = vpack.c.bf16 %v1513_v9, %v1512_v48  ;;  %v3374_v44 = vld [vmem:[%s5661_s1 + $0x188] ss:$16 sps:$4 sm:$0xff]   ;;  %v3379_v48 = vld [vmem:[%s5661_s1 + $0x1a4] ss:$16 sps:$4 sm:$0xff]   ;;  %v3382_v9 = vld [vmem:[%s5661_s1 + $0x1ac] ss:$16 sps:$4 sm:$0xff]  }
 0x641   :  { %1383 = vmatpush1.bf16.msra.mxu0 %v4397_v15  ;;  %1424 = vmatpush1.bf16.msra.mxu1 %v4403_v20  ;;  %v3349_v15 = vld [vmem:[%s5661_s1 + $0x104] ss:$16 sps:$4 sm:$0xff]   ;;  %v3352_v20 = vld [vmem:[%s5661_s1 + $0x10c] ss:$16 sps:$4 sm:$0xff]  }
 0x642   :  { %1384 = vmatprep.subr.bf16.mxu0 %v4409_v16  ;;  %1425 = vmatprep.subr.bf16.mxu1 %v4415_v18 }
 0x643   :  { %1414 = vmatprep.mubr.bf16.mxu0 %v5698_v1  ;;  %1455 = vmatprep.mubr.bf16.mxu1 %v5698_v1 }
 0x645   :  { %1385 = vmatpush1.bf16.msra.mxu0 %v4423_v28  ;;  %1426 = vmatpush1.bf16.msra.mxu1 %v4429_v30  ;;  %v5712_v28 = vld [vmem:[#allocation18_spill] sm:$0xff] }
 0x646   :  { %1386 = vmatprep.subr.bf16.mxu0 %v4435_v31  ;;  %1427 = vmatprep.subr.bf16.mxu1 %v4441_v40  ;;  %v5713_v31 = vld [vmem:[#allocation19_spill] sm:$0xff] }
 0x649   :  { %1387 = vmatpush1.bf16.msra.mxu0 %v4447_v41  ;;  %1428 = vmatpush1.bf16.msra.mxu1 %v4453_v42 }
 0x64a   :  { %1388 = vmatprep.subr.bf16.mxu0 %v4459_v43  ;;  %1429 = vmatprep.subr.bf16.mxu1 %v4465_v46  ;;  %v5714_v43 = vld [vmem:[#allocation20_spill] sm:$0xff] }
 0x64d   :  { %1389 = vmatpush1.bf16.msra.mxu0 %v4471_v47  ;;  %1430 = vmatpush1.bf16.msra.mxu1 %v4477_v49  ;;  %v5715_v47 = vld [vmem:[#allocation21_spill] sm:$0xff] }
 0x64e   :  { %1390 = vmatprep.subr.bf16.mxu0 %v4483_v50  ;;  %1431 = vmatprep.subr.bf16.mxu1 %v4489_v51 }
 0x651   :  { %1391 = vmatpush1.bf16.msra.mxu0 %v4495_v52  ;;  %1432 = vmatpush1.bf16.msra.mxu1 %v4501_v53 }
 0x652   :  { %1392 = vmatprep.subr.bf16.mxu0 %v4507_v54  ;;  %1433 = vmatprep.subr.bf16.mxu1 %v4513_v57 }
 0x655   :  { %1393 = vmatpush1.bf16.msra.mxu0 %v4574_v36  ;;  %1434 = vmatpush1.bf16.msra.mxu1 %v4580_v55 }
 0x656   :  { %1394 = vmatprep.subr.bf16.mxu0 %v4586_v2  ;;  %1435 = vmatprep.subr.bf16.mxu1 %v4592_v5 }
 0x659   :  { %1395 = vmatpush1.bf16.msra.mxu0 %v4598_v6  ;;  %1436 = vmatpush1.bf16.msra.mxu1 %v4604_v58 }
 0x65a   :  { %1396 = vmatprep.subr.bf16.mxu0 %v4610_v7  ;;  %1437 = vmatprep.subr.bf16.mxu1 %v4616_v59 }
 0x65d   :  { %1397 = vmatpush1.bf16.msra.mxu0 %v4622_v8  ;;  %1438 = vmatpush1.bf16.msra.mxu1 %v4628_v60 }
 0x65e   :  { %1785 = vmatprep.subr.bf16.mxu0 %v3349_v15  ;;  %1858 = vmatprep.subr.bf16.mxu1 %v3352_v20  ;;  %v3377_v15 = vld [vmem:[%s5661_s1 + $0x1a0] ss:$16 sps:$4 sm:$0xff]   ;;  %v3380_v20 = vld [vmem:[%s5661_s1 + $0x1a8] ss:$16 sps:$4 sm:$0xff]  }
 0x713   :  { %v1305_v16 = vpop.f32.mrb[40].mxu0  ;;  %v1346_v18 = vpop.f32.mrb[40].mxu1 }
 0x714   :  { %v1353_v30 = vadd.f32 %v1305_v16, %v5712_v28  ;;  %v1355_v40 = vadd.f32 %v1346_v18, %v5713_v31  ;;  %v1307_v41 = vpop.f32.mrb[41].mxu0  ;;  %v1348_v42 = vpop.f32.mrb[41].mxu1  ;;  %v3385_v16 = vld [vmem:[%s5661_s1 + $0x1c4] ss:$16 sps:$4 sm:$0xff]   ;;  %v3388_v18 = vld [vmem:[%s5661_s1 + $0x1cc] ss:$16 sps:$4 sm:$0xff]  }
 0x715   :  { %v1354_v46 = vadd.f32 %v1307_v41, %v5714_v43  ;;  %v1356_v49 = vadd.f32 %v1348_v42, %v5715_v47  ;;  %v1309_v50 = vpop.f32.mrb[42].mxu0  ;;  %v1350_v51 = vpop.f32.mrb[42].mxu1  ;;  %v3383_v28 = vld [vmem:[%s5661_s1 + $0x1c0] ss:$16 sps:$4 sm:$0xff]   ;;  %v3391_v31 = vld [vmem:[%s5661_s1 + $0x1e4] ss:$16 sps:$4 sm:$0xff]  }
 0x716   :  { %v1310_v52 = vpop.f32.mrb[43].mxu0  ;;  %v1351_v53 = vpop.f32.mrb[43].mxu1  ;;  %3515 = vtanh.f32 %v1355_v40  ;;  %v3394_v40 = vld [vmem:[%s5661_s1 + $0x1ec] ss:$16 sps:$4 sm:$0xff]   ;;  %v3389_v41 = vld [vmem:[%s5661_s1 + $0x1e0] ss:$16 sps:$4 sm:$0xff]  }
 0x717   :  { %v1364_v54 = vadd.f32 %v1354_v46, %v4638_v17  ;;  %v3108_v56 = vmul.f32 -1.442695, %v1356_v49  ;;  %v3392_v42 = vld [vmem:[%s5661_s1 + $0x1e8] ss:$16 sps:$4 sm:$0xff]   ;;  %v4835_v43 = vld [vmem:[%s5662_s2 + $0x100] ss:$16 sps:$4 sm:$0xff]  }
 0x718   :  { %v4849_v46 = vld [vmem:[%s5662_s2 + $0x124] ss:$16 sps:$4 sm:$0xff]   ;;  %v4854_v47 = vld [vmem:[%s5662_s2 + $0x12c] ss:$16 sps:$4 sm:$0xff]   ;;  %v4859_v49 = vld [vmem:[%s5662_s2 + $0x120] ss:$16 sps:$4 sm:$0xff]  }
 0x719   :  { %v4702_v57 = vmax.f32 %v1364_v54, %v1353_v30  ;;  %3517 = vpow2.f32 %v3108_v56  ;;  %v4864_v50 = vld [vmem:[%s5662_s2 + $0x128] ss:$16 sps:$4 sm:$0xff]   ;;  %v4873_v51 = vld [vmem:[%s5662_s2 + $0x144] ss:$16 sps:$4 sm:$0xff]   ;;  %v4878_v52 = vld [vmem:[%s5662_s2 + $0x14c] ss:$16 sps:$4 sm:$0xff]  }
 0x71a   :  { %v4885_v53 = vld [vmem:[%s5662_s2 + $0x140] ss:$16 sps:$4 sm:$0xff]   ;;  %v4897_v56 = vld [vmem:[%s5662_s2 + $0x164] ss:$16 sps:$4 sm:$0xff]  }
 0x71b   :  { %v1366_v36 = vsub.f32 %v1353_v30, %v4702_v57  ;;  %v1369_v55 = vsub.f32 %v1364_v54, %v4702_v57  ;;  %v3386_v30 = vld [vmem:[%s5661_s1 + $0x1c8] ss:$16 sps:$4 sm:$0xff]  }
 0x71c   :  { %v4890_v54 = vld [vmem:[%s5662_s2 + $0x148] ss:$16 sps:$4 sm:$0xff]  }
 0x71d   :  { %v1367_v2 = vmul.f32 1.442695, %v1366_v36  ;;  %v1370_v5 = vmul.f32 1.442695, %v1369_v55  ;;  %v4902_v36 = vld [vmem:[%s5662_s2 + $0x16c] ss:$16 sps:$4 sm:$0xff]  }
 0x71e   :  { %v4907_v55 = vld [vmem:[%s5662_s2 + $0x160] ss:$16 sps:$4 sm:$0xff]  }
 0x71f   :  { %3519 = vpow2.f32 %v1367_v2  ;;  %v4912_v2 = vld [vmem:[%s5662_s2 + $0x168] ss:$16 sps:$4 sm:$0xff]  }
 0x720   :  { %3521 = vpow2.f32 %v1370_v5  ;;  %v3516_v6 = vpop.eup %3515  ;;  %v4921_v5 = vld [vmem:[%s5662_s2 + $0x184] ss:$16 sps:$4 sm:$0xff]  }
 0x723   :  { %v3518_v58 = vpop.eup %3517 }
 0x724   :  { %v1361_v19 = vadd.f32 1.0, %v3518_v58  ;;  %v4933_v58 = vld [vmem:[%s5662_s2 + $0x180] ss:$16 sps:$4 sm:$0xff]  }
 0x729   :  { %v3520_v7 = vpop.eup %3519 }
 0x72a   :  { %v3522_v59 = vpop.eup %3521  ;;  %v1373_v8 = vmul.f32 %v3520_v7, %v3516_v6  ;;  %v4926_v6 = vld [vmem:[%s5662_s2 + $0x18c] ss:$16 sps:$4 sm:$0xff]  }
 0x72b   :  { %v1375_v60 = vmul.f32 %v3522_v59, %v4644_v11  ;;  %v1372_v14 = vmul.f32 %v3522_v59, %v4646_v12  ;;  %v3359_v11 = vld [vmem:[%s5661_s1 + $0x140] ss:$16 sps:$4 sm:$0xff]   ;;  %v3367_v12 = vld [vmem:[%s5661_s1 + $0x164] ss:$16 sps:$4 sm:$0xff]  }
 0x72c   :  { %v4945_v59 = vld [vmem:[%s5662_s2 + $0x1a4] ss:$16 sps:$4 sm:$0xff]  }
 0x72d   :  { %v4708_v35 = vadd.f32 %v3520_v7, %v1375_v60  ;;  %v4710_v38 = vadd.f32 %v1373_v8, %v1372_v14  ;;  %v4938_v7 = vld [vmem:[%s5662_s2 + $0x188] ss:$16 sps:$4 sm:$0xff]   ;;  %v4950_v8 = vld [vmem:[%s5662_s2 + $0x1ac] ss:$16 sps:$4 sm:$0xff]   ;;  %v4955_v60 = vld [vmem:[%s5662_s2 + $0x1a0] ss:$16 sps:$4 sm:$0xff]  }
 0x72e   :  { %v4960_v14 = vld [vmem:[%s5662_s2 + $0x1a8] ss:$16 sps:$4 sm:$0xff]  }
 0x72f   :  { %3523 = vrcp.f32 %v4708_v35 }
 0x730   :  { %3525 = vrcp.f32 %v1361_v19  ;;  %v4969_v19 = vld [vmem:[%s5662_s2 + $0x1c4] ss:$16 sps:$4 sm:$0xff]  }
 0x739   :  { %v3524_v17 = vpop.eup %3523 }
 0x73a   :  { %v1378_v39 = vmul.f32 %v3524_v17, %v4710_v38  ;;  %v3526_v61 = vpop.eup %3525  ;;  %v4974_v17 = vld [vmem:[%s5662_s2 + $0x1cc] ss:$16 sps:$4 sm:$0xff]  }
 0x73c   :  { %v4714_v63 = vmul.f32 %v3526_v61, %v1378_v39  ;;  %v4979_v39 = vld [vmem:[%s5662_s2 + $0x1c0] ss:$16 sps:$4 sm:$0xff]   ;;  %v4984_v61 = vld [vmem:[%s5662_s2 + $0x1c8] ss:$16 sps:$4 sm:$0xff]  }
 0x73e   :  { %v1381_v24 = vpack.c.bf16 %v4714_v63, %v4714_v63 }
 0x740   :  { %1415 = vmatmul.mubr.bf16.vlgmr.msra.gmra.mrb[44].mxu0 %v1381_v24  ;;  %1456 = vmatmul.mubr.bf16.vlgmr.msra.gmra.mrb[44].mxu1 %v1381_v24  ;;  %v5003_v24 = vld [vmem:[%s5662_s2 + $0x1e0] ss:$16 sps:$4 sm:$0xff]  }
 0x741   :  { %1786 = vmatpush1.bf16.msra.mxu0 %v3347_v3  ;;  %1859 = vmatpush1.bf16.msra.mxu1 %v3350_v21  ;;  %v4993_v3 = vld [vmem:[%s5662_s2 + $0x1e4] ss:$16 sps:$4 sm:$0xff]   ;;  %v4998_v21 = vld [vmem:[%s5662_s2 + $0x1ec] ss:$16 sps:$4 sm:$0xff]  }
 0x742   :  { %1787 = vmatprep.subr.bf16.mxu0 %v3355_v29  ;;  %1860 = vmatprep.subr.bf16.mxu1 %v3358_v27  ;;  %v5008_v29 = vld [vmem:[%s5662_s2 + $0x1e8] ss:$16 sps:$4 sm:$0xff]  }
 0x743   :  { %1817 = vmatprep.mubr.bf16.mxu0 %v5698_v1  ;;  %1890 = vmatprep.mubr.bf16.mxu1 %v5698_v1 }
 0x745   :  { %1788 = vmatpush1.bf16.msra.mxu0 %v3353_v0  ;;  %1861 = vmatpush1.bf16.msra.mxu1 %v3356_v10  ;;  %v5716_v10 = vld [vmem:[#allocation22_spill] sm:$0xff] }
 0x746   :  { %1789 = vmatprep.subr.bf16.mxu0 %v3361_v32  ;;  %1862 = vmatprep.subr.bf16.mxu1 %v3364_v62  ;;  %v5717_v62 = vld [vmem:[#allocation23_spill] sm:$0xff] }
 0x749   :  { %1790 = vmatpush1.bf16.msra.mxu0 %v3359_v11  ;;  %1863 = vmatpush1.bf16.msra.mxu1 %v3362_v34 }
 0x74a   :  { %1791 = vmatprep.subr.bf16.mxu0 %v3367_v12  ;;  %1864 = vmatprep.subr.bf16.mxu1 %v3370_v22  ;;  %v5718_v22 = vld [vmem:[#allocation24_spill] sm:$0xff] }
 0x74d   :  { %1792 = vmatpush1.bf16.msra.mxu0 %v3365_v13  ;;  %1865 = vmatpush1.bf16.msra.mxu1 %v3368_v33  ;;  %v5719_v33 = vld [vmem:[#allocation25_spill] sm:$0xff] }
 0x74e   :  { %1793 = vmatprep.subr.bf16.mxu0 %v3373_v37  ;;  %1866 = vmatprep.subr.bf16.mxu1 %v3376_v4 }
 0x751   :  { %1794 = vmatpush1.bf16.msra.mxu0 %v3371_v23  ;;  %1867 = vmatpush1.bf16.msra.mxu1 %v3374_v44 }
 0x752   :  { %1795 = vmatprep.subr.bf16.mxu0 %v3379_v48  ;;  %1868 = vmatprep.subr.bf16.mxu1 %v3382_v9 }
 0x755   :  { %1796 = vmatpush1.bf16.msra.mxu0 %v3377_v15  ;;  %1869 = vmatpush1.bf16.msra.mxu1 %v3380_v20 }
 0x756   :  { %1797 = vmatprep.subr.bf16.mxu0 %v3385_v16  ;;  %1870 = vmatprep.subr.bf16.mxu1 %v3388_v18 }
 0x759   :  { %1798 = vmatpush1.bf16.msra.mxu0 %v3383_v28  ;;  %1871 = vmatpush1.bf16.msra.mxu1 %v3386_v30 }
 0x75a   :  { %1799 = vmatprep.subr.bf16.mxu0 %v3391_v31  ;;  %1872 = vmatprep.subr.bf16.mxu1 %v3394_v40 }
 0x75d   :  { %1800 = vmatpush1.bf16.msra.mxu0 %v3389_v41  ;;  %1873 = vmatpush1.bf16.msra.mxu1 %v3392_v42 }
 0x760   :  { %1818 = vmatmul.mubr.bf16.vlgmr.msra.gmra.mrb[48].mxu0 %v4267_v26  ;;  %1891 = vmatmul.mubr.bf16.vlgmr.msra.gmra.mrb[48].mxu1 %v4267_v26  ;;  %v4825_v26 = vld [vmem:[%s5662_s2 + $0x104] ss:$16 sps:$4 sm:$0xff]  }
 0x761   :  { %1827 = vmatprep.mubr.bf16.mxu0 %v5698_v1  ;;  %1900 = vmatprep.mubr.bf16.mxu1 %v5698_v1 }
 0x762   :  { %2091 = vmatprep.subr.bf16.mxu0 %v4825_v26 }
 0x763   :  { %2092 = vmatpush1.bf16.msra.mxu0 %v4835_v43 }
 0x764   :  { %2093 = vmatprep.subr.bf16.mxu0 %v4849_v46 }
 0x767   :  { %2094 = vmatpush1.bf16.msra.mxu0 %v4859_v49 }
 0x768   :  { %1828 = vmatmul.mubr.bf16.gmra.mrb[52].mxu0 %v4392_v25  ;;  %1901 = vmatmul.mubr.bf16.gmra.mrb[52].mxu1 %v4392_v25  ;;  %v4830_v25 = vld [vmem:[%s5662_s2 + $0x10c] ss:$16 sps:$4 sm:$0xff]  }
 0x769   :  { %1837 = vmatprep.mubr.bf16.mxu0 %v5698_v1  ;;  %1910 = vmatprep.mubr.bf16.mxu1 %v5698_v1 }
 0x76a   :  { %2132 = vmatprep.subr.bf16.mxu1 %v4830_v25  ;;  %2095 = vmatprep.subr.bf16.mxu0 %v4873_v51 }
 0x76b   :  { %2096 = vmatpush1.bf16.msra.mxu0 %v4885_v53 }
 0x76c   :  { %2097 = vmatprep.subr.bf16.mxu0 %v4897_v56 }
 0x76f   :  { %2098 = vmatpush1.bf16.msra.mxu0 %v4907_v55 }
 0x770   :  { %1838 = vmatmul.mubr.bf16.gmra.mrb[56].mxu0 %v4657_v45  ;;  %1911 = vmatmul.mubr.bf16.gmra.mrb[56].mxu1 %v4657_v45  ;;  %v4840_v45 = vld [vmem:[%s5662_s2 + $0x108] ss:$16 sps:$4 sm:$0xff]  }
 0x771   :  { %1847 = vmatprep.mubr.bf16.mxu0 %v5698_v1  ;;  %1920 = vmatprep.mubr.bf16.mxu1 %v5698_v1 }
 0x772   :  { %2133 = vmatpush1.bf16.msra.mxu1 %v4840_v45  ;;  %2099 = vmatprep.subr.bf16.mxu0 %v4921_v5 }
 0x773   :  { %2134 = vmatprep.subr.bf16.mxu1 %v4854_v47  ;;  %2100 = vmatpush1.bf16.msra.mxu0 %v4933_v58 }
 0x774   :  { %2101 = vmatprep.subr.bf16.mxu0 %v4945_v59 }
 0x776   :  { %2135 = vmatpush1.bf16.msra.mxu1 %v4864_v50 }
 0x777   :  { %2136 = vmatprep.subr.bf16.mxu1 %v4878_v52  ;;  %2102 = vmatpush1.bf16.msra.mxu0 %v4955_v60 }
 0x778   :  { %2103 = vmatprep.subr.bf16.mxu0 %v4969_v19 }
 0x77a   :  { %2137 = vmatpush1.bf16.msra.mxu1 %v4890_v54 }
 0x77b   :  { %2138 = vmatprep.subr.bf16.mxu1 %v4902_v36  ;;  %2104 = vmatpush1.bf16.msra.mxu0 %v4979_v39 }
 0x77c   :  { %2105 = vmatprep.subr.bf16.mxu0 %v4993_v3 }
 0x77e   :  { %2139 = vmatpush1.bf16.msra.mxu1 %v4912_v2 }
 0x77f   :  { %2140 = vmatprep.subr.bf16.mxu1 %v4926_v6  ;;  %2106 = vmatpush1.bf16.msra.mxu0 %v5003_v24 }
 0x780   :  { %2201 = vmatprep.subr.bf16.mxu0 %v4825_v26 }
 0x782   :  { %2141 = vmatpush1.bf16.msra.mxu1 %v4938_v7 }
 0x783   :  { %2142 = vmatprep.subr.bf16.mxu1 %v4950_v8 }
 0x786   :  { %2143 = vmatpush1.bf16.msra.mxu1 %v4960_v14 }
 0x787   :  { %2144 = vmatprep.subr.bf16.mxu1 %v4974_v17 }
 0x78a   :  { %2145 = vmatpush1.bf16.msra.mxu1 %v4984_v61 }
 0x78b   :  { %2146 = vmatprep.subr.bf16.mxu1 %v4998_v21 }
 0x78e   :  { %2147 = vmatpush1.bf16.msra.mxu1 %v5008_v29 }
 0x78f   :  { %2242 = vmatprep.subr.bf16.mxu1 %v4830_v25 }
 0x813   :  { %v1416_v27 = vpop.f32.mrb[44].mxu0  ;;  %v1457_v0 = vpop.f32.mrb[44].mxu1 }
 0x814   :  { %v1464_v32 = vadd.f32 %v1416_v27, %v5716_v10  ;;  %v1466_v11 = vadd.f32 %v1457_v0, %v5717_v62  ;;  %v1418_v34 = vpop.f32.mrb[45].mxu0  ;;  %v1459_v12 = vpop.f32.mrb[45].mxu1 }
 0x815   :  { %v1465_v13 = vadd.f32 %v1418_v34, %v5718_v22  ;;  %v1467_v37 = vadd.f32 %v1459_v12, %v5719_v33  ;;  %v1420_v4 = vpop.f32.mrb[46].mxu0  ;;  %v1461_v23 = vpop.f32.mrb[46].mxu1 }
 0x816   :  { %v1421_v44 = vpop.f32.mrb[47].mxu0  ;;  %v1462_v48 = vpop.f32.mrb[47].mxu1  ;;  %3527 = vtanh.f32 %v1466_v11 }
 0x817   :  { %v1475_v9 = vadd.f32 %v1465_v13, %v4702_v57  ;;  %v3109_v20 = vmul.f32 -1.442695, %v1467_v37 }
 0x819   :  { %v1476_v15 = vmax.f32 %v1475_v9, %v1464_v32  ;;  %3529 = vpow2.f32 %v3109_v20 }
 0x81b   :  { %v1477_v16 = vsub.f32 %v1464_v32, %v1476_v15  ;;  %v1480_v18 = vsub.f32 %v1475_v9, %v1476_v15  ;;  %v1506_v9 = vld [vmem:[%s5663_s0 + $0x30] sm:$0xff]  ;;  %v1507_v15 = vld [vmem:[%s5663_s0 + $0x38] sm:$0xff] }
 0x81d   :  { %v1478_v28 = vmul.f32 1.442695, %v1477_v16  ;;  %v1481_v30 = vmul.f32 1.442695, %v1480_v18 }
 0x81f   :  { %3531 = vpow2.f32 %v1478_v28 }
 0x820   :  { %3533 = vpow2.f32 %v1481_v30  ;;  %v3528_v31 = vpop.eup %3527 }
 0x823   :  { %v3530_v40 = vpop.eup %3529 }
 0x824   :  { %v1472_v62 = vadd.f32 1.0, %v3530_v40 }
 0x829   :  { %v3532_v41 = vpop.eup %3531 }
 0x82a   :  { %v3534_v42 = vpop.eup %3533  ;;  %v1484_v27 = vmul.f32 %v3532_v41, %v3528_v31 }
 0x82b   :  { %v1486_v0 = vmul.f32 %v3534_v42, %v4708_v35  ;;  %v1483_v10 = vmul.f32 %v3534_v42, %v4710_v38 }
 0x82d   :  { %v1487_v57 = vadd.f32 %v3532_v41, %v1486_v0  ;;  %v1485_v34 = vadd.f32 %v1484_v27, %v1483_v10  ;;  %v1514_v41 = vadd.f32 %v1506_v9, %v4714_v63 }
 0x82f   :  { %3535 = vrcp.f32 %v1487_v57 }
 0x830   :  { %3537 = vrcp.f32 %v1472_v62 }
 0x833   :  { %v5023_v32 = vpop.f32.mrb[48].mxu0  ;;  %v5025_v11 = vpop.f32.mrb[48].mxu1 }
 0x834   :  { %v5027_v12 = vpop.f32.mrb[49].mxu0  ;;  %v5029_v22 = vpop.f32.mrb[49].mxu1 }
 0x835   :  { %v5031_v13 = vpop.f32.mrb[50].mxu0  ;;  %v5033_v33 = vpop.f32.mrb[50].mxu1 }
 0x836   :  { %v5035_v35 = vpop.f32.mrb[51].mxu0  ;;  %v5037_v38 = vpop.f32.mrb[51].mxu1 }
 0x839   :  { %v3536_v37 = vpop.eup %3535 }
 0x83a   :  { %v1489_v4 = vmul.f32 %v3536_v37, %v1485_v34  ;;  %v3538_v23 = vpop.eup %3537 }
 0x83b   :  { %v5039_v44 = vpop.f32.mrb[52].mxu0  ;;  %v5041_v48 = vpop.f32.mrb[52].mxu1 }
 0x83c   :  { %5720 = vst [vmem:[#allocation5_spill] sm:$0xff] %v5041_v48  ;;  %v5049_v20 = vpop.f32.mrb[53].mxu0  ;;  %v5051_v16 = vpop.f32.mrb[53].mxu1  ;;  %v1490_v18 = vmul.f32 %v3538_v23, %v1489_v4  ;;  %v3174_v23 = vld [vmem:[%s5664_s3 + $0x4] sm:$0xf] }
 0x83d   :  { %5721 = vst [vmem:[#allocation6_spill] sm:$0xff] %v5049_v20  ;;  %5722 = vst [vmem:[#allocation7_spill] sm:$0xff] %v5051_v16  ;;  %v5053_v28 = vpop.f32.mrb[54].mxu0  ;;  %v5055_v30 = vpop.f32.mrb[54].mxu1 }
 0x83e   :  { %5723 = vst [vmem:[#allocation8_spill] sm:$0xff] %v5053_v28  ;;  %5724 = vst [vmem:[#allocation9_spill] sm:$0xff] %v5055_v30  ;;  %v5057_v31 = vpop.f32.mrb[55].mxu0  ;;  %v5059_v40 = vpop.f32.mrb[55].mxu1  ;;  %v1515_v42 = vadd.f32 %v1507_v15, %v1490_v18 }
 0x83f   :  { %5725 = vst [vmem:[#allocation10_spill] sm:$0xff] %v5057_v31  ;;  %5726 = vst [vmem:[#allocation11_spill] sm:$0xff] %v5059_v40 }
 0x840   :  { %v1603_v27 = vpack.c.bf16 %v1515_v42, %v1514_v41 }
 0x842   :  { %1848 = vmatmul.mubr.bf16.gmra.mrb[60].mxu0 %v1603_v27  ;;  %1921 = vmatmul.mubr.bf16.gmra.mrb[60].mxu1 %v1603_v27 }
 0x843   :  { %v5062_v0 = vpop.f32.mrb[56].mxu0  ;;  %v5064_v10 = vpop.f32.mrb[56].mxu1  ;;  %2123 = vmatprep.mubr.bf16.mxu0 %v5698_v1  ;;  %2164 = vmatprep.mubr.bf16.mxu1 %v5698_v1 }
 0x844   :  { %5727 = vst [vmem:[#allocation12_spill] sm:$0xff] %v5062_v0  ;;  %5728 = vst [vmem:[#allocation13_spill] sm:$0xff] %v5064_v10  ;;  %v5068_v57 = vpop.f32.mrb[57].mxu0  ;;  %v5070_v62 = vpop.f32.mrb[57].mxu1 }
 0x845   :  { %5729 = vst [vmem:[#allocation14_spill] sm:$0xff] %v5068_v57  ;;  %5730 = vst [vmem:[#allocation15_spill] sm:$0xff] %v5070_v62  ;;  %v5072_v34 = vpop.f32.mrb[58].mxu0  ;;  %v5074_v37 = vpop.f32.mrb[58].mxu1 }
 0x846   :  { %5731 = vst [vmem:[#allocation16_spill] sm:$0xff] %v5072_v34  ;;  %5732 = vst [vmem:[#allocation17_spill] sm:$0xff] %v5074_v37  ;;  %v5076_v63 = vpop.f32.mrb[59].mxu0  ;;  %v5078_v4 = vpop.f32.mrb[59].mxu1 }
 0x847   :  { %5733 = vst [vmem:[#allocation18_spill] sm:$0xff] %v5076_v63  ;;  %5734 = vst [vmem:[#allocation19_spill] sm:$0xff] %v5078_v4  ;;  %v5741_v4 = vld [vmem:[#allocation4_spill] sm:$0xff] }
 0x848   :  { %v5742_v63 = vsub.s32 0, %v5741_v4  ;;  %v5743_v34 = vsub.s32 2, %v5741_v4 }
 0x84a   :  { %2124 = vmatmul.mubr.bf16.vlgmr.msra.gmra.mrb[64].mxu0 %v5698_v1  ;;  %2165 = vmatmul.mubr.bf16.vlgmr.msra.gmra.mrb[64].mxu1 %v5698_v1  ;;  %v5133_v37 = vrot.slane %v3174_v23, %v5742_v63  ;;  %v5137_v62 = vrot.slane %v3174_v23, %v5743_v34 }
 0x84b   :  { %2202 = vmatpush1.bf16.msra.mxu0 %v4835_v43  ;;  %2243 = vmatpush1.bf16.msra.mxu1 %v4840_v45 }
 0x84c   :  { %2203 = vmatprep.subr.bf16.mxu0 %v4849_v46  ;;  %2244 = vmatprep.subr.bf16.mxu1 %v4854_v47  ;;  %v1820_v63 = vadd.f32 %v5023_v32, %v5133_v37 }
 0x84d   :  { %2233 = vmatprep.mubr.bf16.mxu0 %v5698_v1  ;;  %2274 = vmatprep.mubr.bf16.mxu1 %v5698_v1 }
 0x84f   :  { %2204 = vmatpush1.bf16.msra.mxu0 %v4859_v49  ;;  %2245 = vmatpush1.bf16.msra.mxu1 %v4864_v50 }
 0x850   :  { %2205 = vmatprep.subr.bf16.mxu0 %v4873_v51  ;;  %2246 = vmatprep.subr.bf16.mxu1 %v4878_v52 }
 0x853   :  { %2206 = vmatpush1.bf16.msra.mxu0 %v4885_v53  ;;  %2247 = vmatpush1.bf16.msra.mxu1 %v4890_v54 }
 0x854   :  { %2207 = vmatprep.subr.bf16.mxu0 %v4897_v56  ;;  %2248 = vmatprep.subr.bf16.mxu1 %v4902_v36 }
 0x857   :  { %2208 = vmatpush1.bf16.msra.mxu0 %v4907_v55  ;;  %2249 = vmatpush1.bf16.msra.mxu1 %v4912_v2 }
 0x858   :  { %2209 = vmatprep.subr.bf16.mxu0 %v4921_v5  ;;  %2250 = vmatprep.subr.bf16.mxu1 %v4926_v6 }
 0x85b   :  { %2210 = vmatpush1.bf16.msra.mxu0 %v4933_v58  ;;  %2251 = vmatpush1.bf16.msra.mxu1 %v4938_v7 }
 0x85c   :  { %2211 = vmatprep.subr.bf16.mxu0 %v4945_v59  ;;  %2252 = vmatprep.subr.bf16.mxu1 %v4950_v8 }
 0x85f   :  { %2212 = vmatpush1.bf16.msra.mxu0 %v4955_v60  ;;  %2253 = vmatpush1.bf16.msra.mxu1 %v4960_v14 }
 0x860   :  { %2213 = vmatprep.subr.bf16.mxu0 %v4969_v19  ;;  %2254 = vmatprep.subr.bf16.mxu1 %v4974_v17 }
 0x863   :  { %2214 = vmatpush1.bf16.msra.mxu0 %v4979_v39  ;;  %2255 = vmatpush1.bf16.msra.mxu1 %v4984_v61 }
 0x864   :  { %2215 = vmatprep.subr.bf16.mxu0 %v4993_v3  ;;  %2256 = vmatprep.subr.bf16.mxu1 %v4998_v21 }
 0x867   :  { %2216 = vmatpush1.bf16.msra.mxu0 %v5003_v24  ;;  %2257 = vmatpush1.bf16.msra.mxu1 %v5008_v29 }
 0x868   :  { %2312 = vmatprep.subr.bf16.mxu0 %v4825_v26  ;;  %2353 = vmatprep.subr.bf16.mxu1 %v4830_v25 }
 0x915   :  { %v5119_v9 = vpop.f32.mrb[60].mxu0  ;;  %v5121_v15 = vpop.f32.mrb[60].mxu1 }
 0x916   :  { %5735 = vst [vmem:[#allocation20_spill] sm:$0xff] %v5119_v9  ;;  %5736 = vst [vmem:[#allocation21_spill] sm:$0xff] %v5121_v15  ;;  %v5123_v18 = vpop.f32.mrb[61].mxu0  ;;  %v5125_v41 = vpop.f32.mrb[61].mxu1 }
 0x917   :  { %5737 = vst [vmem:[#allocation22_spill] sm:$0xff] %v5123_v18  ;;  %5738 = vst [vmem:[#allocation23_spill] sm:$0xff] %v5125_v41  ;;  %v5127_v42 = vpop.f32.mrb[62].mxu0  ;;  %v5129_v27 = vpop.f32.mrb[62].mxu1  ;;  %v5746_v18 = vsub.s32 1, %v5741_v4 }
 0x918   :  { %5739 = vst [vmem:[#allocation24_spill] sm:$0xff] %v5127_v42  ;;  %5740 = vst [vmem:[#allocation25_spill] sm:$0xff] %v5129_v27  ;;  %v5139_v57 = vpop.f32.mrb[63].mxu0  ;;  %v5141_v9 = vpop.f32.mrb[63].mxu1  ;;  %v5747_v42 = vsub.s32 3, %v5741_v4  ;;  %v1893_v27 = vadd.f32 %v5025_v11, %v5137_v62 }
 0x919   :  { %5744 = vst [vmem:[#allocation4_spill] sm:$0xff] %v5139_v57  ;;  %5745 = vst [vmem:[#allocation26_spill] sm:$0xff] %v5141_v9  ;;  %v5145_v15 = vrot.slane %v3174_v23, %v5746_v18 }
 0x91a   :  { %v5149_v41 = vrot.slane %v3174_v23, %v5747_v42 }
 0x91b   :  { %v1822_v34 = vadd.f32 %v5027_v12, %v5145_v15 }
 0x91c   :  { %v1895_v9 = vadd.f32 %v5029_v22, %v5149_v41 }
 0x91d   :  { %v2125_v57 = vpop.f32.mrb[64].mxu0  ;;  %v2166_v10 = vpop.f32.mrb[64].mxu1 }
 0x91e   :  { %v2173_v18 = vadd.f32 %v2125_v57, %v1820_v63  ;;  %v2175_v0 = vadd.f32 %v2166_v10, %v1893_v27  ;;  %v2127_v40 = vpop.f32.mrb[65].mxu0  ;;  %v2168_v4 = vpop.f32.mrb[65].mxu1 }
 0x91f   :  { %v2174_v23 = vadd.f32 %v2127_v40, %v1822_v34  ;;  %v2176_v42 = vadd.f32 %v2168_v4, %v1895_v9  ;;  %v2129_v31 = vpop.f32.mrb[66].mxu0  ;;  %v2170_v30 = vpop.f32.mrb[66].mxu1  ;;  %v1824_v4 = vadd.f32 %v5031_v13, %v5133_v37 }
 0x920   :  { %v2130_v32 = vpop.f32.mrb[67].mxu0  ;;  %v2171_v28 = vpop.f32.mrb[67].mxu1  ;;  %3539 = vtanh.f32 %v2175_v0 }
 0x921   :  { %v5159_v16 = vmax.f32 %v2174_v23, %v2173_v18  ;;  %v3239_v11 = vmul.f32 -1.442695, %v2176_v42  ;;  %v1826_v42 = vadd.f32 %v5035_v35, %v5145_v15  ;;  %v1899_v32 = vadd.f32 %v5037_v38, %v5149_v41 }
 0x923   :  { %v2186_v12 = vsub.f32 %v2173_v18, %v5159_v16  ;;  %v2189_v20 = vsub.f32 %v2174_v23, %v5159_v16  ;;  %3541 = vpow2.f32 %v3239_v11  ;;  %v1897_v23 = vadd.f32 %v5033_v33, %v5137_v62 }
 0x925   :  { %v2187_v22 = vmul.f32 1.442695, %v2186_v12  ;;  %v2190_v48 = vmul.f32 1.442695, %v2189_v20 }
 0x927   :  { %3543 = vpow2.f32 %v2187_v22 }
 0x928   :  { %3545 = vpow2.f32 %v2190_v48 }
 0x92a   :  { %v3540_v10 = vpop.eup %3539 }
 0x92d   :  { %v3542_v40 = vpop.eup %3541 }
 0x92e   :  { %v2181_v63 = vadd.f32 1.0, %v3542_v40 }
 0x931   :  { %v3544_v57 = vpop.eup %3543 }
 0x932   :  { %v3546_v31 = vpop.eup %3545  ;;  %v2193_v30 = vmul.f32 %v3544_v57, %v3540_v10 }
 0x933   :  { %v2192_v9 = vmul.f32 0.0, %v3546_v31 }
 0x935   :  { %v5163_v28 = vadd.f32 %v2193_v30, %v2192_v9  ;;  %v5165_v27 = vadd.f32 %v3544_v57, %v2192_v9 }
 0x937   :  { %3547 = vrcp.f32 %v5165_v27 }
 0x938   :  { %3549 = vrcp.f32 %v2181_v63 }
 0x941   :  { %v3548_v0 = vpop.eup %3547 }
 0x942   :  { %v2197_v20 = vmul.f32 %v3548_v0, %v5163_v28  ;;  %v3550_v34 = vpop.eup %3549 }
 0x944   :  { %v2198_v18 = vmul.f32 %v3550_v34, %v2197_v20 }
 0x946   :  { %v2200_v48 = vpack.c.bf16 %v2198_v18, %v2198_v18 }
 0x948   :  { %2234 = vmatmul.mubr.bf16.vlgmr.msra.gmra.mrb[68].mxu0 %v2200_v48  ;;  %2275 = vmatmul.mubr.bf16.vlgmr.msra.gmra.mrb[68].mxu1 %v2200_v48 }
 0x949   :  { %2313 = vmatpush1.bf16.msra.mxu0 %v4835_v43  ;;  %2354 = vmatpush1.bf16.msra.mxu1 %v4840_v45 }
 0x94a   :  { %2314 = vmatprep.subr.bf16.mxu0 %v4849_v46  ;;  %2355 = vmatprep.subr.bf16.mxu1 %v4854_v47 }
 0x94b   :  { %2344 = vmatprep.mubr.bf16.mxu0 %v5698_v1  ;;  %2385 = vmatprep.mubr.bf16.mxu1 %v5698_v1 }
 0x94d   :  { %2315 = vmatpush1.bf16.msra.mxu0 %v4859_v49  ;;  %2356 = vmatpush1.bf16.msra.mxu1 %v4864_v50 }
 0x94e   :  { %2316 = vmatprep.subr.bf16.mxu0 %v4873_v51  ;;  %2357 = vmatprep.subr.bf16.mxu1 %v4878_v52 }
 0x951   :  { %2317 = vmatpush1.bf16.msra.mxu0 %v4885_v53  ;;  %2358 = vmatpush1.bf16.msra.mxu1 %v4890_v54 }
 0x952   :  { %2318 = vmatprep.subr.bf16.mxu0 %v4897_v56  ;;  %2359 = vmatprep.subr.bf16.mxu1 %v4902_v36 }
 0x955   :  { %2319 = vmatpush1.bf16.msra.mxu0 %v4907_v55  ;;  %2360 = vmatpush1.bf16.msra.mxu1 %v4912_v2 }
 0x956   :  { %2320 = vmatprep.subr.bf16.mxu0 %v4921_v5  ;;  %2361 = vmatprep.subr.bf16.mxu1 %v4926_v6 }
 0x959   :  { %2321 = vmatpush1.bf16.msra.mxu0 %v4933_v58  ;;  %2362 = vmatpush1.bf16.msra.mxu1 %v4938_v7 }
 0x95a   :  { %2322 = vmatprep.subr.bf16.mxu0 %v4945_v59  ;;  %2363 = vmatprep.subr.bf16.mxu1 %v4950_v8 }
 0x95d   :  { %2323 = vmatpush1.bf16.msra.mxu0 %v4955_v60  ;;  %2364 = vmatpush1.bf16.msra.mxu1 %v4960_v14 }
 0x95e   :  { %2324 = vmatprep.subr.bf16.mxu0 %v4969_v19  ;;  %2365 = vmatprep.subr.bf16.mxu1 %v4974_v17 }
 0x961   :  { %2325 = vmatpush1.bf16.msra.mxu0 %v4979_v39  ;;  %2366 = vmatpush1.bf16.msra.mxu1 %v4984_v61 }
 0x962   :  { %2326 = vmatprep.subr.bf16.mxu0 %v4993_v3  ;;  %2367 = vmatprep.subr.bf16.mxu1 %v4998_v21 }
 0x965   :  { %2327 = vmatpush1.bf16.msra.mxu0 %v5003_v24  ;;  %2368 = vmatpush1.bf16.msra.mxu1 %v5008_v29 }
 0x966   :  { %2423 = vmatprep.subr.bf16.mxu0 %v4825_v26  ;;  %2464 = vmatprep.subr.bf16.mxu1 %v4830_v25 }
 0xa1b   :  { %v2235_v11 = vpop.f32.mrb[68].mxu0  ;;  %v2276_v12 = vpop.f32.mrb[68].mxu1 }
 0xa1c   :  { %v2283_v22 = vadd.f32 %v2235_v11, %v1824_v4  ;;  %v2285_v10 = vadd.f32 %v2276_v12, %v1897_v23  ;;  %v2237_v40 = vpop.f32.mrb[69].mxu0  ;;  %v2278_v57 = vpop.f32.mrb[69].mxu1 }
 0xa1d   :  { %v2284_v31 = vadd.f32 %v2237_v40, %v1826_v42  ;;  %v2286_v30 = vadd.f32 %v2278_v57, %v1899_v32  ;;  %v2239_v9 = vpop.f32.mrb[70].mxu0  ;;  %v2280_v63 = vpop.f32.mrb[70].mxu1 }
 0xa1e   :  { %v2240_v13 = vpop.f32.mrb[71].mxu0  ;;  %v2281_v0 = vpop.f32.mrb[71].mxu1  ;;  %3551 = vtanh.f32 %v2285_v10 }
 0xa1f   :  { %v2294_v33 = vadd.f32 %v2284_v31, %v5159_v16  ;;  %v3240_v35 = vmul.f32 -1.442695, %v2286_v30  ;;  %v5749_v0 = vld [vmem:[#allocation6_spill] sm:$0xff] }
 0xa21   :  { %v5212_v20 = vmax.f32 %v2294_v33, %v2283_v22  ;;  %3553 = vpow2.f32 %v3240_v35  ;;  %v5750_v35 = vld [vmem:[#allocation7_spill] sm:$0xff] }
 0xa23   :  { %v2296_v34 = vsub.f32 %v2283_v22, %v5212_v20  ;;  %v2299_v38 = vsub.f32 %v2294_v33, %v5212_v20  ;;  %v1832_v33 = vadd.f32 %v5749_v0, %v5145_v15 }
 0xa25   :  { %v2297_v18 = vmul.f32 1.442695, %v2296_v34  ;;  %v2300_v48 = vmul.f32 1.442695, %v2299_v38  ;;  %v1905_v34 = vadd.f32 %v5750_v35, %v5149_v41 }
 0xa27   :  { %3555 = vpow2.f32 %v2297_v18 }
 0xa28   :  { %3557 = vpow2.f32 %v2300_v48  ;;  %v3552_v4 = vpop.eup %3551 }
 0xa2b   :  { %v3554_v23 = vpop.eup %3553 }
 0xa2c   :  { %v2291_v22 = vadd.f32 1.0, %v3554_v23 }
 0xa31   :  { %v3556_v42 = vpop.eup %3555 }
 0xa32   :  { %v3558_v32 = vpop.eup %3557  ;;  %v2303_v11 = vmul.f32 %v3556_v42, %v3552_v4 }
 0xa33   :  { %v2305_v16 = vmul.f32 %v3558_v32, %v5165_v27  ;;  %v2302_v12 = vmul.f32 %v3558_v32, %v5163_v28  ;;  %v1830_v28 = vadd.f32 %v5039_v44, %v5133_v37  ;;  %v5748_v27 = vld [vmem:[#allocation5_spill] sm:$0xff] }
 0xa34   :  { %v1903_v13 = vadd.f32 %v5748_v27, %v5137_v62 }
 0xa35   :  { %v5218_v40 = vadd.f32 %v3556_v42, %v2305_v16  ;;  %v5220_v57 = vadd.f32 %v2303_v11, %v2302_v12 }
 0xa37   :  { %3559 = vrcp.f32 %v5218_v40 }
 0xa38   :  { %3561 = vrcp.f32 %v2291_v22 }
 0xa41   :  { %v3560_v10 = vpop.eup %3559 }
 0xa42   :  { %v2308_v31 = vmul.f32 %v3560_v10, %v5220_v57  ;;  %v3562_v30 = vpop.eup %3561 }
 0xa44   :  { %v2309_v9 = vmul.f32 %v3562_v30, %v2308_v31 }
 0xa46   :  { %v2311_v63 = vpack.c.bf16 %v2309_v9, %v2309_v9 }
 0xa48   :  { %2345 = vmatmul.mubr.bf16.vlgmr.msra.gmra.mrb[72].mxu0 %v2311_v63  ;;  %2386 = vmatmul.mubr.bf16.vlgmr.msra.gmra.mrb[72].mxu1 %v2311_v63 }
 0xa49   :  { %2424 = vmatpush1.bf16.msra.mxu0 %v4835_v43  ;;  %2465 = vmatpush1.bf16.msra.mxu1 %v4840_v45 }
 0xa4a   :  { %2425 = vmatprep.subr.bf16.mxu0 %v4849_v46  ;;  %2466 = vmatprep.subr.bf16.mxu1 %v4854_v47 }
 0xa4b   :  { %2455 = vmatprep.mubr.bf16.mxu0 %v5698_v1  ;;  %2496 = vmatprep.mubr.bf16.mxu1 %v5698_v1 }
 0xa4d   :  { %2426 = vmatpush1.bf16.msra.mxu0 %v4859_v49  ;;  %2467 = vmatpush1.bf16.msra.mxu1 %v4864_v50 }
 0xa4e   :  { %2427 = vmatprep.subr.bf16.mxu0 %v4873_v51  ;;  %2468 = vmatprep.subr.bf16.mxu1 %v4878_v52 }
 0xa51   :  { %2428 = vmatpush1.bf16.msra.mxu0 %v4885_v53  ;;  %2469 = vmatpush1.bf16.msra.mxu1 %v4890_v54 }
 0xa52   :  { %2429 = vmatprep.subr.bf16.mxu0 %v4897_v56  ;;  %2470 = vmatprep.subr.bf16.mxu1 %v4902_v36 }
 0xa55   :  { %2430 = vmatpush1.bf16.msra.mxu0 %v4907_v55  ;;  %2471 = vmatpush1.bf16.msra.mxu1 %v4912_v2 }
 0xa56   :  { %2431 = vmatprep.subr.bf16.mxu0 %v4921_v5  ;;  %2472 = vmatprep.subr.bf16.mxu1 %v4926_v6 }
 0xa59   :  { %2432 = vmatpush1.bf16.msra.mxu0 %v4933_v58  ;;  %2473 = vmatpush1.bf16.msra.mxu1 %v4938_v7 }
 0xa5a   :  { %2433 = vmatprep.subr.bf16.mxu0 %v4945_v59  ;;  %2474 = vmatprep.subr.bf16.mxu1 %v4950_v8 }
 0xa5d   :  { %2434 = vmatpush1.bf16.msra.mxu0 %v4955_v60  ;;  %2475 = vmatpush1.bf16.msra.mxu1 %v4960_v14 }
 0xa5e   :  { %2435 = vmatprep.subr.bf16.mxu0 %v4969_v19  ;;  %2476 = vmatprep.subr.bf16.mxu1 %v4974_v17 }
 0xa61   :  { %2436 = vmatpush1.bf16.msra.mxu0 %v4979_v39  ;;  %2477 = vmatpush1.bf16.msra.mxu1 %v4984_v61 }
 0xa62   :  { %2437 = vmatprep.subr.bf16.mxu0 %v4993_v3  ;;  %2478 = vmatprep.subr.bf16.mxu1 %v4998_v21 }
 0xa65   :  { %2438 = vmatpush1.bf16.msra.mxu0 %v5003_v24  ;;  %2479 = vmatpush1.bf16.msra.mxu1 %v5008_v29 }
 0xa66   :  { %2534 = vmatprep.subr.bf16.mxu0 %v4825_v26  ;;  %2575 = vmatprep.subr.bf16.mxu1 %v4830_v25 }
 0xb1b   :  { %v2346_v38 = vpop.f32.mrb[72].mxu0  ;;  %v2387_v18 = vpop.f32.mrb[72].mxu1 }
 0xb1c   :  { %v2394_v48 = vadd.f32 %v2346_v38, %v1830_v28  ;;  %v2396_v4 = vadd.f32 %v2387_v18, %v1903_v13  ;;  %v2348_v23 = vpop.f32.mrb[73].mxu0  ;;  %v2389_v42 = vpop.f32.mrb[73].mxu1 }
 0xb1d   :  { %v2395_v32 = vadd.f32 %v2348_v23, %v1832_v33  ;;  %v2397_v11 = vadd.f32 %v2389_v42, %v1905_v34  ;;  %v2350_v16 = vpop.f32.mrb[74].mxu0  ;;  %v2391_v12 = vpop.f32.mrb[74].mxu1 }
 0xb1e   :  { %v2351_v44 = vpop.f32.mrb[75].mxu0  ;;  %v2392_v22 = vpop.f32.mrb[75].mxu1  ;;  %3563 = vtanh.f32 %v2396_v4  ;;  %v5752_v12 = vld [vmem:[#allocation9_spill] sm:$0xff] }
 0xb1f   :  { %v2405_v10 = vadd.f32 %v2395_v32, %v5212_v20  ;;  %v3241_v30 = vmul.f32 -1.442695, %v2397_v11  ;;  %v1907_v44 = vadd.f32 %v5752_v12, %v5137_v62  ;;  %v5753_v22 = vld [vmem:[#allocation10_spill] sm:$0xff] }
 0xb21   :  { %v5267_v31 = vmax.f32 %v2405_v10, %v2394_v48  ;;  %3565 = vpow2.f32 %v3241_v30  ;;  %v5754_v30 = vld [vmem:[#allocation11_spill] sm:$0xff] }
 0xb23   :  { %v2407_v9 = vsub.f32 %v2394_v48, %v5267_v31  ;;  %v2410_v63 = vsub.f32 %v2405_v10, %v5267_v31  ;;  %v1836_v10 = vadd.f32 %v5753_v22, %v5145_v15 }
 0xb25   :  { %v2408_v28 = vmul.f32 1.442695, %v2407_v9  ;;  %v2411_v27 = vmul.f32 1.442695, %v2410_v63  ;;  %v1909_v9 = vadd.f32 %v5754_v30, %v5149_v41 }
 0xb27   :  { %3567 = vpow2.f32 %v2408_v28 }
 0xb28   :  { %3569 = vpow2.f32 %v2411_v27  ;;  %v3564_v13 = vpop.eup %3563 }
 0xb2b   :  { %v3566_v0 = vpop.eup %3565 }
 0xb2c   :  { %v2402_v48 = vadd.f32 1.0, %v3566_v0 }
 0xb31   :  { %v3568_v33 = vpop.eup %3567 }
 0xb32   :  { %v3570_v35 = vpop.eup %3569  ;;  %v2414_v34 = vmul.f32 %v3568_v33, %v3564_v13 }
 0xb33   :  { %v2416_v20 = vmul.f32 %v3570_v35, %v5218_v40  ;;  %v2413_v38 = vmul.f32 %v3570_v35, %v5220_v57  ;;  %v5751_v40 = vld [vmem:[#allocation8_spill] sm:$0xff] }
 0xb34   :  { %v1834_v57 = vadd.f32 %v5751_v40, %v5133_v37 }
 0xb35   :  { %v5273_v18 = vadd.f32 %v3568_v33, %v2416_v20  ;;  %v5275_v23 = vadd.f32 %v2414_v34, %v2413_v38 }
 0xb37   :  { %3571 = vrcp.f32 %v5273_v18 }
 0xb38   :  { %3573 = vrcp.f32 %v2402_v48 }
 0xb41   :  { %v3572_v4 = vpop.eup %3571 }
 0xb42   :  { %v2419_v42 = vmul.f32 %v3572_v4, %v5275_v23  ;;  %v3574_v32 = vpop.eup %3573 }
 0xb44   :  { %v2420_v11 = vmul.f32 %v3574_v32, %v2419_v42 }
 0xb46   :  { %v2422_v16 = vpack.c.bf16 %v2420_v11, %v2420_v11 }
 0xb48   :  { %2456 = vmatmul.mubr.bf16.vlgmr.msra.gmra.mrb[76].mxu0 %v2422_v16  ;;  %2497 = vmatmul.mubr.bf16.vlgmr.msra.gmra.mrb[76].mxu1 %v2422_v16 }
 0xb49   :  { %2535 = vmatpush1.bf16.msra.mxu0 %v4835_v43  ;;  %2576 = vmatpush1.bf16.msra.mxu1 %v4840_v45 }
 0xb4a   :  { %2536 = vmatprep.subr.bf16.mxu0 %v4849_v46  ;;  %2577 = vmatprep.subr.bf16.mxu1 %v4854_v47 }
 0xb4b   :  { %2566 = vmatprep.mubr.bf16.mxu0 %v5698_v1  ;;  %2607 = vmatprep.mubr.bf16.mxu1 %v5698_v1 }
 0xb4d   :  { %2537 = vmatpush1.bf16.msra.mxu0 %v4859_v49  ;;  %2578 = vmatpush1.bf16.msra.mxu1 %v4864_v50 }
 0xb4e   :  { %2538 = vmatprep.subr.bf16.mxu0 %v4873_v51  ;;  %2579 = vmatprep.subr.bf16.mxu1 %v4878_v52 }
 0xb51   :  { %2539 = vmatpush1.bf16.msra.mxu0 %v4885_v53  ;;  %2580 = vmatpush1.bf16.msra.mxu1 %v4890_v54 }
 0xb52   :  { %2540 = vmatprep.subr.bf16.mxu0 %v4897_v56  ;;  %2581 = vmatprep.subr.bf16.mxu1 %v4902_v36 }
 0xb55   :  { %2541 = vmatpush1.bf16.msra.mxu0 %v4907_v55  ;;  %2582 = vmatpush1.bf16.msra.mxu1 %v4912_v2 }
 0xb56   :  { %2542 = vmatprep.subr.bf16.mxu0 %v4921_v5  ;;  %2583 = vmatprep.subr.bf16.mxu1 %v4926_v6 }
 0xb59   :  { %2543 = vmatpush1.bf16.msra.mxu0 %v4933_v58  ;;  %2584 = vmatpush1.bf16.msra.mxu1 %v4938_v7 }
 0xb5a   :  { %2544 = vmatprep.subr.bf16.mxu0 %v4945_v59  ;;  %2585 = vmatprep.subr.bf16.mxu1 %v4950_v8 }
 0xb5d   :  { %2545 = vmatpush1.bf16.msra.mxu0 %v4955_v60  ;;  %2586 = vmatpush1.bf16.msra.mxu1 %v4960_v14 }
 0xb5e   :  { %2546 = vmatprep.subr.bf16.mxu0 %v4969_v19  ;;  %2587 = vmatprep.subr.bf16.mxu1 %v4974_v17 }
 0xb61   :  { %2547 = vmatpush1.bf16.msra.mxu0 %v4979_v39  ;;  %2588 = vmatpush1.bf16.msra.mxu1 %v4984_v61 }
 0xb62   :  { %2548 = vmatprep.subr.bf16.mxu0 %v4993_v3  ;;  %2589 = vmatprep.subr.bf16.mxu1 %v4998_v21 }
 0xb65   :  { %2549 = vmatpush1.bf16.msra.mxu0 %v5003_v24  ;;  %2590 = vmatpush1.bf16.msra.mxu1 %v5008_v29 }
 0xb66   :  { %2645 = vmatprep.subr.bf16.mxu0 %v4825_v26  ;;  %2686 = vmatprep.subr.bf16.mxu1 %v4830_v25 }
 0xc1b   :  { %v2457_v63 = vpop.f32.mrb[76].mxu0  ;;  %v2498_v28 = vpop.f32.mrb[76].mxu1 }
 0xc1c   :  { %v2505_v27 = vadd.f32 %v2457_v63, %v1834_v57  ;;  %v2507_v13 = vadd.f32 %v2498_v28, %v1907_v44  ;;  %v2459_v0 = vpop.f32.mrb[77].mxu0  ;;  %v2500_v33 = vpop.f32.mrb[77].mxu1 }
 0xc1d   :  { %v2506_v35 = vadd.f32 %v2459_v0, %v1836_v10  ;;  %v2508_v34 = vadd.f32 %v2500_v33, %v1909_v9  ;;  %v2461_v20 = vpop.f32.mrb[78].mxu0  ;;  %v2502_v38 = vpop.f32.mrb[78].mxu1 }
 0xc1e   :  { %v2462_v48 = vpop.f32.mrb[79].mxu0  ;;  %v2503_v4 = vpop.f32.mrb[79].mxu1  ;;  %3575 = vtanh.f32 %v2507_v13 }
 0xc1f   :  { %v2516_v42 = vadd.f32 %v2506_v35, %v5267_v31  ;;  %v3242_v11 = vmul.f32 -1.442695, %v2508_v34 }
 0xc21   :  { %v5322_v32 = vmax.f32 %v2516_v42, %v2505_v27  ;;  %3577 = vpow2.f32 %v3242_v11 }
 0xc23   :  { %v2518_v16 = vsub.f32 %v2505_v27, %v5322_v32  ;;  %v2521_v40 = vsub.f32 %v2516_v42, %v5322_v32 }
 0xc25   :  { %v2519_v57 = vmul.f32 1.442695, %v2518_v16  ;;  %v2522_v12 = vmul.f32 1.442695, %v2521_v40 }
 0xc27   :  { %3579 = vpow2.f32 %v2519_v57  ;;  %v5392_v57 = vld [vmem:[%s5662_s2 + $0x100] ss:$16 sps:$4 sm:$0xff]  }
 0xc28   :  { %3581 = vpow2.f32 %v2522_v12  ;;  %v3576_v44 = vpop.eup %3575  ;;  %v5398_v12 = vld [vmem:[%s5662_s2 + $0x108] ss:$16 sps:$4 sm:$0xff]  }
 0xc2b   :  { %v3578_v22 = vpop.eup %3577 }
 0xc2c   :  { %v2513_v27 = vadd.f32 1.0, %v3578_v22  ;;  %v5410_v22 = vld [vmem:[%s5662_s2 + $0x12c] ss:$16 sps:$4 sm:$0xff]  }
 0xc31   :  { %v3580_v10 = vpop.eup %3579 }
 0xc32   :  { %v3582_v30 = vpop.eup %3581  ;;  %v2525_v9 = vmul.f32 %v3580_v10, %v3576_v44  ;;  %v5404_v44 = vld [vmem:[%s5662_s2 + $0x124] ss:$16 sps:$4 sm:$0xff]  }
 0xc33   :  { %v2527_v31 = vmul.f32 %v3582_v30, %v5273_v18  ;;  %v2524_v63 = vmul.f32 %v3582_v30, %v5275_v23  ;;  %v5424_v30 = vld [vmem:[%s5662_s2 + $0x128] ss:$16 sps:$4 sm:$0xff]  }
 0xc35   :  { %v5328_v28 = vadd.f32 %v3580_v10, %v2527_v31  ;;  %v5330_v0 = vadd.f32 %v2525_v9, %v2524_v63  ;;  %v5418_v10 = vld [vmem:[%s5662_s2 + $0x120] ss:$16 sps:$4 sm:$0xff]   ;;  %v5430_v9 = vld [vmem:[%s5662_s2 + $0x144] ss:$16 sps:$4 sm:$0xff]   ;;  %v5436_v31 = vld [vmem:[%s5662_s2 + $0x14c] ss:$16 sps:$4 sm:$0xff]  }
 0xc36   :  { %v5442_v63 = vld [vmem:[%s5662_s2 + $0x140] ss:$16 sps:$4 sm:$0xff]  }
 0xc37   :  { %3583 = vrcp.f32 %v5328_v28 }
 0xc38   :  { %3585 = vrcp.f32 %v2513_v27  ;;  %v5454_v27 = vld [vmem:[%s5662_s2 + $0x164] ss:$16 sps:$4 sm:$0xff]  }
 0xc41   :  { %v3584_v13 = vpop.eup %3583 }
 0xc42   :  { %v2530_v33 = vmul.f32 %v3584_v13, %v5330_v0  ;;  %v3586_v35 = vpop.eup %3585  ;;  %v5466_v13 = vld [vmem:[%s5662_s2 + $0x160] ss:$16 sps:$4 sm:$0xff]  }
 0xc44   :  { %v2531_v34 = vmul.f32 %v3586_v35, %v2530_v33  ;;  %v5472_v33 = vld [vmem:[%s5662_s2 + $0x168] ss:$16 sps:$4 sm:$0xff]   ;;  %v5478_v35 = vld [vmem:[%s5662_s2 + $0x184] ss:$16 sps:$4 sm:$0xff]  }
 0xc46   :  { %v2533_v20 = vpack.c.bf16 %v2531_v34, %v2531_v34  ;;  %v5484_v34 = vld [vmem:[%s5662_s2 + $0x18c] ss:$16 sps:$4 sm:$0xff]  }
 0xc48   :  { %2567 = vmatmul.mubr.bf16.vlgmr.msra.gmra.mrb[80].mxu0 %v2533_v20  ;;  %2608 = vmatmul.mubr.bf16.vlgmr.msra.gmra.mrb[80].mxu1 %v2533_v20  ;;  %v5490_v20 = vld [vmem:[%s5662_s2 + $0x180] ss:$16 sps:$4 sm:$0xff]  }
 0xc49   :  { %2646 = vmatpush1.bf16.msra.mxu0 %v4835_v43  ;;  %2687 = vmatpush1.bf16.msra.mxu1 %v4840_v45  ;;  %v5755_v43 = vld [vmem:[#allocation12_spill] sm:$0xff] }
 0xc4a   :  { %2647 = vmatprep.subr.bf16.mxu0 %v4849_v46  ;;  %2688 = vmatprep.subr.bf16.mxu1 %v4854_v47  ;;  %v1840_v45 = vadd.f32 %v5755_v43, %v5133_v37  ;;  %v5756_v46 = vld [vmem:[#allocation13_spill] sm:$0xff] }
 0xc4b   :  { %2677 = vmatprep.mubr.bf16.mxu0 %v5698_v1  ;;  %2718 = vmatprep.mubr.bf16.mxu1 %v5698_v1  ;;  %v1913_v47 = vadd.f32 %v5756_v46, %v5137_v62  ;;  %v5496_v43 = vld [vmem:[%s5662_s2 + $0x188] ss:$16 sps:$4 sm:$0xff]   ;;  %v5508_v46 = vld [vmem:[%s5662_s2 + $0x1ac] ss:$16 sps:$4 sm:$0xff]  }
 0xc4d   :  { %2648 = vmatpush1.bf16.msra.mxu0 %v4859_v49  ;;  %2689 = vmatpush1.bf16.msra.mxu1 %v4864_v50  ;;  %v5757_v49 = vld [vmem:[#allocation14_spill] sm:$0xff] }
 0xc4e   :  { %2649 = vmatprep.subr.bf16.mxu0 %v4873_v51  ;;  %2690 = vmatprep.subr.bf16.mxu1 %v4878_v52  ;;  %v1842_v50 = vadd.f32 %v5757_v49, %v5145_v15  ;;  %v5758_v51 = vld [vmem:[#allocation15_spill] sm:$0xff] }
 0xc4f   :  { %v1915_v52 = vadd.f32 %v5758_v51, %v5149_v41  ;;  %v5520_v49 = vld [vmem:[%s5662_s2 + $0x1a8] ss:$16 sps:$4 sm:$0xff]   ;;  %v5532_v51 = vld [vmem:[%s5662_s2 + $0x1cc] ss:$16 sps:$4 sm:$0xff]  }
 0xc51   :  { %2650 = vmatpush1.bf16.msra.mxu0 %v4885_v53  ;;  %2691 = vmatpush1.bf16.msra.mxu1 %v4890_v54 }
 0xc52   :  { %2651 = vmatprep.subr.bf16.mxu0 %v4897_v56  ;;  %2692 = vmatprep.subr.bf16.mxu1 %v4902_v36 }
 0xc55   :  { %2652 = vmatpush1.bf16.msra.mxu0 %v4907_v55  ;;  %2693 = vmatpush1.bf16.msra.mxu1 %v4912_v2 }
 0xc56   :  { %2653 = vmatprep.subr.bf16.mxu0 %v4921_v5  ;;  %2694 = vmatprep.subr.bf16.mxu1 %v4926_v6 }
 0xc59   :  { %2654 = vmatpush1.bf16.msra.mxu0 %v4933_v58  ;;  %2695 = vmatpush1.bf16.msra.mxu1 %v4938_v7 }
 0xc5a   :  { %2655 = vmatprep.subr.bf16.mxu0 %v4945_v59  ;;  %2696 = vmatprep.subr.bf16.mxu1 %v4950_v8 }
 0xc5d   :  { %2656 = vmatpush1.bf16.msra.mxu0 %v4955_v60  ;;  %2697 = vmatpush1.bf16.msra.mxu1 %v4960_v14 }
 0xc5e   :  { %2657 = vmatprep.subr.bf16.mxu0 %v4969_v19  ;;  %2698 = vmatprep.subr.bf16.mxu1 %v4974_v17 }
 0xc61   :  { %2658 = vmatpush1.bf16.msra.mxu0 %v4979_v39  ;;  %2699 = vmatpush1.bf16.msra.mxu1 %v4984_v61 }
 0xc62   :  { %2659 = vmatprep.subr.bf16.mxu0 %v4993_v3  ;;  %2700 = vmatprep.subr.bf16.mxu1 %v4998_v21 }
 0xc65   :  { %2660 = vmatpush1.bf16.msra.mxu0 %v5003_v24  ;;  %2701 = vmatpush1.bf16.msra.mxu1 %v5008_v29 }
 0xc66   :  { %2756 = vmatprep.subr.bf16.mxu0 %v4825_v26  ;;  %2797 = vmatprep.subr.bf16.mxu1 %v4830_v25 }
 0xd1b   :  { %v2568_v53 = vpop.f32.mrb[80].mxu0  ;;  %v2609_v54 = vpop.f32.mrb[80].mxu1 }
 0xd1c   :  { %v2616_v56 = vadd.f32 %v2568_v53, %v1840_v45  ;;  %v2618_v36 = vadd.f32 %v2609_v54, %v1913_v47  ;;  %v2570_v55 = vpop.f32.mrb[81].mxu0  ;;  %v2611_v26 = vpop.f32.mrb[81].mxu1  ;;  %v5502_v45 = vld [vmem:[%s5662_s2 + $0x1a4] ss:$16 sps:$4 sm:$0xff]   ;;  %v5514_v47 = vld [vmem:[%s5662_s2 + $0x1a0] ss:$16 sps:$4 sm:$0xff]  }
 0xd1d   :  { %v2617_v2 = vadd.f32 %v2570_v55, %v1842_v50  ;;  %v2619_v25 = vadd.f32 %v2611_v26, %v1915_v52  ;;  %v2572_v5 = vpop.f32.mrb[82].mxu0  ;;  %v2613_v6 = vpop.f32.mrb[82].mxu1  ;;  %v5526_v50 = vld [vmem:[%s5662_s2 + $0x1c4] ss:$16 sps:$4 sm:$0xff]   ;;  %v5538_v52 = vld [vmem:[%s5662_s2 + $0x1c0] ss:$16 sps:$4 sm:$0xff]  }
 0xd1e   :  { %v2573_v58 = vpop.f32.mrb[83].mxu0  ;;  %v2614_v7 = vpop.f32.mrb[83].mxu1  ;;  %3587 = vtanh.f32 %v2618_v36  ;;  %v5544_v53 = vld [vmem:[%s5662_s2 + $0x1c8] ss:$16 sps:$4 sm:$0xff]   ;;  %v5550_v54 = vld [vmem:[%s5662_s2 + $0x1e4] ss:$16 sps:$4 sm:$0xff]  }
 0xd1f   :  { %v2627_v59 = vadd.f32 %v2617_v2, %v5322_v32  ;;  %v3243_v60 = vmul.f32 -1.442695, %v2619_v25  ;;  %v5562_v36 = vld [vmem:[%s5662_s2 + $0x1e0] ss:$16 sps:$4 sm:$0xff]   ;;  %v5568_v55 = vld [vmem:[%s5662_s2 + $0x1e8] ss:$16 sps:$4 sm:$0xff]  }
 0xd20   :  { %v3697_v26 = vld [vmem:[%s5662_s2 + $0x104] ss:$16 sps:$4 sm:$0xff]   ;;  %v3698_v2 = vld [vmem:[%s5662_s2 + $0x10c] ss:$16 sps:$4 sm:$0xff]  }
 0xd21   :  { %v5377_v8 = vmax.f32 %v2627_v59, %v2616_v56  ;;  %3589 = vpow2.f32 %v3243_v60  ;;  %v5759_v25 = vld [vmem:[#allocation16_spill] sm:$0xff]  ;;  %v5760_v6 = vld [vmem:[#allocation17_spill] sm:$0xff]  ;;  %v5761_v7 = vld [vmem:[#allocation18_spill] sm:$0xff] }
 0xd22   :  { %v1844_v5 = vadd.f32 %v5759_v25, %v5133_v37  ;;  %v1917_v58 = vadd.f32 %v5760_v6, %v5137_v62  ;;  %v5762_v60 = vld [vmem:[#allocation19_spill] sm:$0xff] }
 0xd23   :  { %v2629_v14 = vsub.f32 %v2616_v56, %v5377_v8  ;;  %v2632_v19 = vsub.f32 %v2627_v59, %v5377_v8  ;;  %v5556_v56 = vld [vmem:[%s5662_s2 + $0x1ec] ss:$16 sps:$4 sm:$0xff]   ;;  %v1846_v59 = vadd.f32 %v5761_v7, %v5145_v15 }
 0xd25   :  { %v2630_v17 = vmul.f32 1.442695, %v2629_v14  ;;  %v2633_v39 = vmul.f32 1.442695, %v2632_v19  ;;  %v1919_v14 = vadd.f32 %v5762_v60, %v5149_v41 }
 0xd27   :  { %3591 = vpow2.f32 %v2630_v17 }
 0xd28   :  { %3593 = vpow2.f32 %v2633_v39  ;;  %v3588_v61 = vpop.eup %3587 }
 0xd2b   :  { %v3590_v3 = vpop.eup %3589 }
 0xd2c   :  { %v2624_v48 = vadd.f32 1.0, %v3590_v3 }
 0xd31   :  { %v3592_v21 = vpop.eup %3591 }
 0xd32   :  { %v3594_v24 = vpop.eup %3593  ;;  %v2636_v29 = vmul.f32 %v3592_v21, %v3588_v61 }
 0xd33   :  { %v2638_v18 = vmul.f32 %v3594_v24, %v5328_v28  ;;  %v2635_v23 = vmul.f32 %v3594_v24, %v5330_v0  ;;  %v5448_v28 = vld [vmem:[%s5662_s2 + $0x148] ss:$16 sps:$4 sm:$0xff]   ;;  %v5460_v0 = vld [vmem:[%s5662_s2 + $0x16c] ss:$16 sps:$4 sm:$0xff]  }
 0xd35   :  { %v5383_v38 = vadd.f32 %v3592_v21, %v2638_v18  ;;  %v5385_v4 = vadd.f32 %v2636_v29, %v2635_v23 }
 0xd37   :  { %3595 = vrcp.f32 %v5383_v38 }
 0xd38   :  { %3597 = vrcp.f32 %v2624_v48 }
 0xd41   :  { %v3596_v42 = vpop.eup %3595 }
 0xd42   :  { %v2641_v32 = vmul.f32 %v3596_v42, %v5385_v4  ;;  %v3598_v11 = vpop.eup %3597 }
 0xd44   :  { %v2642_v16 = vmul.f32 %v3598_v11, %v2641_v32 }
 0xd46   :  { %v2644_v40 = vpack.c.bf16 %v2642_v16, %v2642_v16 }
 0xd48   :  { %2678 = vmatmul.mubr.bf16.vlgmr.msra.gmra.mrb[84].mxu0 %v2644_v40  ;;  %2719 = vmatmul.mubr.bf16.vlgmr.msra.gmra.mrb[84].mxu1 %v2644_v40 }
 0xd49   :  { %2757 = vmatpush1.bf16.msra.mxu0 %v5392_v57  ;;  %2798 = vmatpush1.bf16.msra.mxu1 %v5398_v12 }
 0xd4a   :  { %2758 = vmatprep.subr.bf16.mxu0 %v5404_v44  ;;  %2799 = vmatprep.subr.bf16.mxu1 %v5410_v22 }
 0xd4b   :  { %2788 = vmatprep.mubr.bf16.mxu0 %v5698_v1  ;;  %2829 = vmatprep.mubr.bf16.mxu1 %v5698_v1 }
 0xd4d   :  { %2759 = vmatpush1.bf16.msra.mxu0 %v5418_v10  ;;  %2800 = vmatpush1.bf16.msra.mxu1 %v5424_v30 }
 0xd4e   :  { %2760 = vmatprep.subr.bf16.mxu0 %v5430_v9  ;;  %2801 = vmatprep.subr.bf16.mxu1 %v5436_v31 }
 0xd51   :  { %2761 = vmatpush1.bf16.msra.mxu0 %v5442_v63  ;;  %2802 = vmatpush1.bf16.msra.mxu1 %v5448_v28 }
 0xd52   :  { %2762 = vmatprep.subr.bf16.mxu0 %v5454_v27  ;;  %2803 = vmatprep.subr.bf16.mxu1 %v5460_v0 }
 0xd55   :  { %2763 = vmatpush1.bf16.msra.mxu0 %v5466_v13  ;;  %2804 = vmatpush1.bf16.msra.mxu1 %v5472_v33 }
 0xd56   :  { %2764 = vmatprep.subr.bf16.mxu0 %v5478_v35  ;;  %2805 = vmatprep.subr.bf16.mxu1 %v5484_v34 }
 0xd59   :  { %2765 = vmatpush1.bf16.msra.mxu0 %v5490_v20  ;;  %2806 = vmatpush1.bf16.msra.mxu1 %v5496_v43 }
 0xd5a   :  { %2766 = vmatprep.subr.bf16.mxu0 %v5502_v45  ;;  %2807 = vmatprep.subr.bf16.mxu1 %v5508_v46 }
 0xd5d   :  { %2767 = vmatpush1.bf16.msra.mxu0 %v5514_v47  ;;  %2808 = vmatpush1.bf16.msra.mxu1 %v5520_v49 }
 0xd5e   :  { %2768 = vmatprep.subr.bf16.mxu0 %v5526_v50  ;;  %2809 = vmatprep.subr.bf16.mxu1 %v5532_v51 }
 0xd61   :  { %2769 = vmatpush1.bf16.msra.mxu0 %v5538_v52  ;;  %2810 = vmatpush1.bf16.msra.mxu1 %v5544_v53 }
 0xd62   :  { %2770 = vmatprep.subr.bf16.mxu0 %v5550_v54  ;;  %2811 = vmatprep.subr.bf16.mxu1 %v5556_v56 }
 0xd65   :  { %2771 = vmatpush1.bf16.msra.mxu0 %v5562_v36  ;;  %2812 = vmatpush1.bf16.msra.mxu1 %v5568_v55 }
 0xd66   :  { %2867 = vmatprep.subr.bf16.mxu0 %v3697_v26  ;;  %2908 = vmatprep.subr.bf16.mxu1 %v3698_v2 }
 0xe1b   :  { %v2679_v19 = vpop.f32.mrb[84].mxu0  ;;  %v2720_v17 = vpop.f32.mrb[84].mxu1 }
 0xe1c   :  { %v2727_v39 = vadd.f32 %v2679_v19, %v1844_v5  ;;  %v2729_v61 = vadd.f32 %v2720_v17, %v1917_v58  ;;  %v2681_v3 = vpop.f32.mrb[85].mxu0  ;;  %v2722_v21 = vpop.f32.mrb[85].mxu1 }
 0xe1d   :  { %v2728_v24 = vadd.f32 %v2681_v3, %v1846_v59  ;;  %v2730_v29 = vadd.f32 %v2722_v21, %v1919_v14  ;;  %v2683_v18 = vpop.f32.mrb[86].mxu0  ;;  %v2724_v23 = vpop.f32.mrb[86].mxu1 }
 0xe1e   :  { %v2684_v48 = vpop.f32.mrb[87].mxu0  ;;  %v2725_v42 = vpop.f32.mrb[87].mxu1  ;;  %3599 = vtanh.f32 %v2729_v61 }
 0xe1f   :  { %v2738_v32 = vadd.f32 %v2728_v24, %v5377_v8  ;;  %v3244_v16 = vmul.f32 -1.442695, %v2730_v29 }
 0xe21   :  { %v5586_v11 = vmax.f32 %v2738_v32, %v2727_v39  ;;  %3601 = vpow2.f32 %v3244_v16 }
 0xe23   :  { %v2740_v40 = vsub.f32 %v2727_v39, %v5586_v11  ;;  %v2743_v26 = vsub.f32 %v2738_v32, %v5586_v11 }
 0xe25   :  { %v2741_v2 = vmul.f32 1.442695, %v2740_v40  ;;  %v2744_v25 = vmul.f32 1.442695, %v2743_v26  ;;  %v11_v26 = vstv %s5665_s5 }
 0xe26   :  { %12 = vst [vmem:[#allocation3] sm:$0x1] %v11_v26 }
 0xe27   :  { %3603 = vpow2.f32 %v2741_v2  ;;  %v5767_v2 = vld [vmem:[#allocation24_spill] sm:$0xff] }
 0xe28   :  { %3605 = vpow2.f32 %v2744_v25  ;;  %v3600_v5 = vpop.eup %3599  ;;  %v1854_v25 = vadd.f32 %v5767_v2, %v5133_v37 }
 0xe2b   :  { %v3602_v6 = vpop.eup %3601 }
 0xe2c   :  { %v2735_v19 = vadd.f32 1.0, %v3602_v6 }
 0xe31   :  { %v3604_v58 = vpop.eup %3603 }
 0xe32   :  { %v3606_v7 = vpop.eup %3605  ;;  %v2747_v59 = vmul.f32 %v3604_v58, %v3600_v5  ;;  %v5768_v5 = vld [vmem:[#allocation25_spill] sm:$0xff] }
 0xe33   :  { %v2749_v8 = vmul.f32 %v3606_v7, %v5383_v38  ;;  %v2746_v60 = vmul.f32 %v3606_v7, %v5385_v4  ;;  %v5764_v4 = vld [vmem:[#allocation21_spill] sm:$0xff]  ;;  %v1927_v6 = vadd.f32 %v5768_v5, %v5137_v62 }
 0xe35   :  { %v5592_v14 = vadd.f32 %v3604_v58, %v2749_v8  ;;  %v5594_v17 = vadd.f32 %v2747_v59, %v2746_v60  ;;  %v5769_v58 = vld [vmem:[#allocation4_spill] sm:$0xff]  ;;  %v5770_v59 = vld [vmem:[#allocation26_spill] sm:$0xff] }
 0xe36   :  { %v1856_v7 = vadd.f32 %v5769_v58, %v5145_v15  ;;  %v1929_v8 = vadd.f32 %v5770_v59, %v5149_v41 }
 0xe37   :  { %3607 = vrcp.f32 %v5592_v14 }
 0xe38   :  { %3609 = vrcp.f32 %v2735_v19 }
 0xe41   :  { %v3608_v39 = vpop.eup %3607 }
 0xe42   :  { %v2752_v61 = vmul.f32 %v3608_v39, %v5594_v17  ;;  %v3610_v3 = vpop.eup %3609 }
 0xe44   :  { %v2753_v21 = vmul.f32 %v3610_v3, %v2752_v61 }
 0xe46   :  { %v2755_v24 = vpack.c.bf16 %v2753_v21, %v2753_v21 }
 0xe48   :  { %2789 = vmatmul.mubr.bf16.vlgmr.msra.gmra.mrb[88].mxu0 %v2755_v24  ;;  %2830 = vmatmul.mubr.bf16.vlgmr.msra.gmra.mrb[88].mxu1 %v2755_v24 }
 0xe49   :  { %2868 = vmatpush1.bf16.msra.mxu0 %v5392_v57  ;;  %2909 = vmatpush1.bf16.msra.mxu1 %v5398_v12  ;;  %v1923_v57 = vadd.f32 %v5764_v4, %v5137_v62  ;;  %v5765_v12 = vld [vmem:[#allocation22_spill] sm:$0xff] }
 0xe4a   :  { %2869 = vmatprep.subr.bf16.mxu0 %v5404_v44  ;;  %2910 = vmatprep.subr.bf16.mxu1 %v5410_v22  ;;  %v1852_v44 = vadd.f32 %v5765_v12, %v5145_v15  ;;  %v5766_v22 = vld [vmem:[#allocation23_spill] sm:$0xff] }
 0xe4b   :  { %2899 = vmatprep.mubr.bf16.mxu0 %v5698_v1  ;;  %2940 = vmatprep.mubr.bf16.mxu1 %v5698_v1  ;;  %v5763_v1 = vld [vmem:[#allocation20_spill] sm:$0xff] }
 0xe4c   :  { %v1850_v38 = vadd.f32 %v5763_v1, %v5133_v37 }
 0xe4d   :  { %2870 = vmatpush1.bf16.msra.mxu0 %v5418_v10  ;;  %2911 = vmatpush1.bf16.msra.mxu1 %v5424_v30  ;;  %v1925_v10 = vadd.f32 %v5766_v22, %v5149_v41 }
 0xe4e   :  { %2871 = vmatprep.subr.bf16.mxu0 %v5430_v9  ;;  %2912 = vmatprep.subr.bf16.mxu1 %v5436_v31 }
 0xe51   :  { %2872 = vmatpush1.bf16.msra.mxu0 %v5442_v63  ;;  %2913 = vmatpush1.bf16.msra.mxu1 %v5448_v28 }
 0xe52   :  { %2873 = vmatprep.subr.bf16.mxu0 %v5454_v27  ;;  %2914 = vmatprep.subr.bf16.mxu1 %v5460_v0 }
 0xe55   :  { %2874 = vmatpush1.bf16.msra.mxu0 %v5466_v13  ;;  %2915 = vmatpush1.bf16.msra.mxu1 %v5472_v33 }
 0xe56   :  { %2875 = vmatprep.subr.bf16.mxu0 %v5478_v35  ;;  %2916 = vmatprep.subr.bf16.mxu1 %v5484_v34 }
 0xe59   :  { %2876 = vmatpush1.bf16.msra.mxu0 %v5490_v20  ;;  %2917 = vmatpush1.bf16.msra.mxu1 %v5496_v43 }
 0xe5a   :  { %2877 = vmatprep.subr.bf16.mxu0 %v5502_v45  ;;  %2918 = vmatprep.subr.bf16.mxu1 %v5508_v46 }
 0xe5d   :  { %2878 = vmatpush1.bf16.msra.mxu0 %v5514_v47  ;;  %2919 = vmatpush1.bf16.msra.mxu1 %v5520_v49 }
 0xe5e   :  { %2879 = vmatprep.subr.bf16.mxu0 %v5526_v50  ;;  %2920 = vmatprep.subr.bf16.mxu1 %v5532_v51 }
 0xe61   :  { %2880 = vmatpush1.bf16.msra.mxu0 %v5538_v52  ;;  %2921 = vmatpush1.bf16.msra.mxu1 %v5544_v53 }
 0xe62   :  { %2881 = vmatprep.subr.bf16.mxu0 %v5550_v54  ;;  %2922 = vmatprep.subr.bf16.mxu1 %v5556_v56 }
 0xe65   :  { %2882 = vmatpush1.bf16.msra.mxu0 %v5562_v36  ;;  %2923 = vmatpush1.bf16.msra.mxu1 %v5568_v55 }
 0xf1b   :  { %v2790_v30 = vpop.f32.mrb[88].mxu0  ;;  %v2831_v9 = vpop.f32.mrb[88].mxu1 }
 0xf1c   :  { %v2838_v31 = vadd.f32 %v2790_v30, %v1850_v38  ;;  %v2840_v63 = vadd.f32 %v2831_v9, %v1923_v57  ;;  %v2792_v28 = vpop.f32.mrb[89].mxu0  ;;  %v2833_v27 = vpop.f32.mrb[89].mxu1 }
 0xf1d   :  { %v2839_v0 = vadd.f32 %v2792_v28, %v1852_v44  ;;  %v2841_v13 = vadd.f32 %v2833_v27, %v1925_v10  ;;  %v2794_v33 = vpop.f32.mrb[90].mxu0  ;;  %v2835_v35 = vpop.f32.mrb[90].mxu1 }
 0xf1e   :  { %v2795_v34 = vpop.f32.mrb[91].mxu0  ;;  %v2836_v20 = vpop.f32.mrb[91].mxu1  ;;  %3611 = vtanh.f32 %v2840_v63 }
 0xf1f   :  { %v2849_v43 = vadd.f32 %v2839_v0, %v5586_v11  ;;  %v3245_v46 = vmul.f32 -1.442695, %v2841_v13  ;;  %v2992_v20 = vld [vmem:[%s5663_s0 + $0x38] sm:$0xff] }
 0xf21   :  { %v2850_v45 = vmax.f32 %v2849_v43, %v2838_v31  ;;  %3613 = vpow2.f32 %v3245_v46 }
 0xf23   :  { %v2851_v47 = vsub.f32 %v2838_v31, %v2850_v45  ;;  %v2854_v49 = vsub.f32 %v2849_v43, %v2850_v45 }
 0xf25   :  { %v2852_v50 = vmul.f32 1.442695, %v2851_v47  ;;  %v2855_v51 = vmul.f32 1.442695, %v2854_v49  ;;  %v3248_v49 = vld [vmem:[#allocation3] ss:$0 sm:$0xff] }
 0xf27   :  { %3615 = vpow2.f32 %v2852_v50 }
 0xf28   :  { %3617 = vpow2.f32 %v2855_v51  ;;  %v3612_v52 = vpop.eup %3611 }
 0xf2b   :  { %v3614_v53 = vpop.eup %3613 }
 0xf2c   :  { %v2846_v23 = vadd.f32 1.0, %v3614_v53 }
 0xf31   :  { %v3616_v54 = vpop.eup %3615 }
 0xf32   :  { %v3618_v56 = vpop.eup %3617  ;;  %v2858_v36 = vmul.f32 %v3616_v54, %v3612_v52 }
 0xf33   :  { %v2860_v55 = vmul.f32 %v3618_v56, %v5592_v14  ;;  %v2857_v29 = vmul.f32 %v3618_v56, %v5594_v17 }
 0xf35   :  { %v2861_v18 = vadd.f32 %v3616_v54, %v2860_v55  ;;  %v2859_v48 = vadd.f32 %v2858_v36, %v2857_v29 }
 0xf37   :  { %3619 = vrcp.f32 %v2861_v18 }
 0xf38   :  { %3621 = vrcp.f32 %v2846_v23 }
 0xf41   :  { %v3620_v42 = vpop.eup %3619 }
 0xf42   :  { %v2863_v32 = vmul.f32 %v3620_v42, %v2859_v48  ;;  %v3622_v11 = vpop.eup %3621 }
 0xf44   :  { %v2864_v16 = vmul.f32 %v3622_v11, %v2863_v32 }
 0xf46   :  { %v2866_v40 = vpack.c.bf16 %v2864_v16, %v2864_v16 }
 0xf48   :  { %2900 = vmatmul.mubr.bf16.vlgmr.msra.gmra.mrb[92].mxu0 %v2866_v40  ;;  %2941 = vmatmul.mubr.bf16.vlgmr.msra.gmra.mrb[92].mxu1 %v2866_v40 }
0x101b   :  { %v2901_v60 = vpop.f32.mrb[92].mxu0  ;;  %v2942_v14 = vpop.f32.mrb[92].mxu1 }
0x101c   :  { %v2949_v19 = vadd.f32 %v2901_v60, %v1854_v25  ;;  %v2951_v17 = vadd.f32 %v2942_v14, %v1927_v6  ;;  %v2903_v39 = vpop.f32.mrb[93].mxu0  ;;  %v2944_v61 = vpop.f32.mrb[93].mxu1 }
0x101d   :  { %v2950_v3 = vadd.f32 %v2903_v39, %v1856_v7  ;;  %v2952_v21 = vadd.f32 %v2944_v61, %v1929_v8  ;;  %v2905_v24 = vpop.f32.mrb[94].mxu0  ;;  %v2946_v1 = vpop.f32.mrb[94].mxu1 }
0x101e   :  { %v2906_v37 = vpop.f32.mrb[95].mxu0  ;;  %v2947_v38 = vpop.f32.mrb[95].mxu1  ;;  %3623 = vtanh.f32 %v2951_v17 }
0x101f   :  { %v2960_v4 = vadd.f32 %v2950_v3, %v2850_v45  ;;  %v3246_v57 = vmul.f32 -1.442695, %v2952_v21  ;;  %v3247_v45 = vld [vmem:[%s5666_s4] ss:$0 sm:$0xff] }
0x1021   :  { %v2961_v62 = vmax.f32 %v2960_v4, %v2949_v19  ;;  %3625 = vpow2.f32 %v3246_v57 }
0x1023   :  { %v2962_v12 = vsub.f32 %v2949_v19, %v2961_v62  ;;  %v2965_v15 = vsub.f32 %v2960_v4, %v2961_v62 }
0x1025   :  { %v2963_v44 = vmul.f32 1.442695, %v2962_v12  ;;  %v2966_v41 = vmul.f32 1.442695, %v2965_v15 }
0x1027   :  { %3627 = vpow2.f32 %v2963_v44 }
0x1028   :  { %3629 = vpow2.f32 %v2966_v41  ;;  %v3624_v22 = vpop.eup %3623 }
0x102b   :  { %v3626_v10 = vpop.eup %3625 }
0x102c   :  { %v2957_v27 = vadd.f32 1.0, %v3626_v10 }
0x1031   :  { %v3628_v30 = vpop.eup %3627 }
0x1032   :  { %v3630_v9 = vpop.eup %3629  ;;  %v2969_v31 = vmul.f32 %v3628_v30, %v3624_v22 }
0x1033   :  { %v2971_v63 = vmul.f32 %v3630_v9, %v2861_v18  ;;  %v2968_v28 = vmul.f32 %v3630_v9, %v2859_v48 }
0x1035   :  { %v2970_v0 = vadd.f32 %v2969_v31, %v2968_v28  ;;  %v2972_v13 = vadd.f32 %v3628_v30, %v2971_v63 }
0x1037   :  { %3631 = vrcp.f32 %v2972_v13 }
0x1038   :  { %3633 = vrcp.f32 %v2957_v27 }
0x1041   :  { %v3632_v33 = vpop.eup %3631 }
0x1042   :  { %v2974_v35 = vmul.f32 %v3632_v33, %v2970_v0  ;;  %v3634_v34 = vpop.eup %3633 }
0x1044   :  { %v2975_v43 = vmul.f32 %v3634_v34, %v2974_v35 }
0x1046   :  { %v3000_v46 = vadd.f32 %v2992_v20, %v2975_v43 }
0x1048   :  { %v3017_v47 = vmul.f32 %v3247_v45, %v3000_v46 }
0x104a   :  { %3018 = vadd.xlane.f32.xlu0 %v3017_v47 }
0x10d7   :  { %v3019_v50 = vpop.xlane.xlu0 %3018 }
0x10d8   :  { %v3027_v51 = vadd.f32 %v3248_v49, %v3019_v50 }
0x10da   :  { %3030 = vperm.xlu0 %3250, %v3027_v51  }
0x1159   :  { %v3031_v52 = vpop.permute.xlu0 %3030 }
0x115a   :  { %3033 = vst [vmem:[%s5667_s6] sm:$0xff] %v3031_v52 }

</bundles_post_ra>
